<compile_context>
chip_gen: v7x
topology: tpu7x:2x2x1
jax: 0.10.0
libtpu: 0.0.40
codegen_flags: <defaults>
</compile_context>

<pallas_src>
import jax
import jax.numpy as jnp
from jax.experimental import pallas as pl
from jax.experimental.pallas import tpu as pltpu

_BN_EPS = 1e-5
_N_BLOCKS = 4          # BasicBlocks per branch (fixed by StageModule)


# ----------------------------------------------------------------------------
# In-kernel 3x3 conv helper (CHW-transposed, lane-dense layout)
# ----------------------------------------------------------------------------
def _conv3x3_chw(act, wt, bias, h, w, masks, relu, sel=None):
    """3x3 conv (pad=1) + folded BN (+ ReLU) on a (Cin, H*W) f32 activation.

    act   : (Cin, P)       P = H*W on the lane dimension (lane-dense)
    wt    : (Cout, 9*Cin)  bf16, BN scale already folded in
    bias  : (Cout, 1)      f32 folded BN bias
    masks : (2, P)         f32 {0,1}; row 0 kills cols j==0, row 1 kills j==W-1
    sel   : optional (P, P/4) f32 {0,1} column-selection matrix -> stride-2 conv
    returns (Cout, P) or (Cout, P/4) f32
    """
    cin, p = act.shape
    # Zero-pad the flattened spatial axis by (W+1) on each side: every vertical
    # out-of-image tap lands in the zero pad; horizontal row-wrap is handled by
    # the edge masks.  Every tap below is a contiguous lane-offset slice of this
    # one VMEM-resident buffer (no HBM traffic, no 3-D lane-sparse scratch).
    zpad = jnp.zeros((cin, w + 1), jnp.float32)
    padact = jnp.concatenate([zpad, act, zpad], axis=1)      # (Cin, P + 2W + 2)
    not_left = masks[0:1, :]      # invalid when pulling from column j-1
    not_right = masks[1:2, :]     # invalid when pulling from column j+1
    taps = []
    for dh in range(3):
        for dw in range(3):
            d = (dh - 1) * w + (dw - 1)                      # flattened offset
            t = padact[:, w + 1 + d: w + 1 + d + p]          # out[p'] = act[p'+d]
            if dw == 0:
                t = t * not_left
            elif dw == 2:
                t = t * not_right
            taps.append(t)
    # (9*Cin, P) im2col^T: sublane-aligned concat (Cin is a multiple of 8).
    xcolt = jnp.concatenate(taps, axis=0).astype(jnp.bfloat16)
    # ONE MXU matmul per conv, big P dimension on lanes.
    y = jnp.dot(wt, xcolt, preferred_element_type=jnp.float32) + bias
    if sel is not None:           # stride 2: pick every other row/column
        y = jnp.dot(y, sel, preferred_element_type=jnp.float32)
    if relu:
        y = jnp.maximum(y, 0.0)
    return y


# ----------------------------------------------------------------------------
# Parameter construction (all folding / repacking hoisted to init time)
# ----------------------------------------------------------------------------
def make_conv_bn(key, cin, cout, ksize):
    """Conv(bias=False)+BN(eval) -> transposed, BN-scale-folded weight + bias."""
    k1, k2, k3, k4, k5 = jax.random.split(key, 5)
    w = 0.1 * jax.random.normal(k1, (ksize, ksize, cin, cout), jnp.float32)
    gamma = 1.0 + 0.1 * jax.random.normal(k2, (cout,), jnp.float32)
    beta = 0.05 * jax.random.normal(k3, (cout,), jnp.float32)
    mean = 0.1 * jax.random.normal(k4, (cout,), jnp.float32)
    var = jax.random.uniform(k5, (cout,), jnp.float32, 0.5, 1.5)
    scale = gamma / jnp.sqrt(var + _BN_EPS)
    bias = beta - mean * scale
    # Wt[cout, (dh*K + dw)*cin + ci] = scale[cout] * w[dh, dw, ci, cout]
    wt = (w.transpose(3, 0, 1, 2).reshape(cout, ksize * ksize * cin)
          * scale[:, None]).astype(jnp.bfloat16)
    return wt, bias.reshape(cout, 1)


def make_downselect(h, w):
    """(H*W, H/2*W/2) {0,1} matrix: column q selects input pixel (2*qi, 2*qj)."""
    h2, w2 = h // 2, w // 2
    q = jnp.arange(h2 * w2)
    src = 2 * (q // w2) * w + 2 * (q % w2)
    return (jnp.arange(h * w)[:, None] == src[None, :]).astype(jnp.float32)


def make_upsample(h, w, f):
    """(H*W, fH*fW) {0,1} matrix implementing nearest-neighbour upsample by f."""
    hd, wd = h * f, w * f
    p = jnp.arange(hd * wd)
    src = (p // wd // f) * w + (p % wd) // f
    return (jnp.arange(h * w)[:, None] == src[None, :]).astype(jnp.float32)


def init_stage_module(key, stage, output_branches, c, h, w):
    max_lv = max(stage, output_branches)
    dims = [(c * 2 ** i, h // 2 ** i, w // 2 ** i) for i in range(max_lv)]
    meta = {"stage": stage, "output_branches": output_branches,
            "branch_dims": dims}
    params = {"branches": [], "fuse": []}
    # branches: 4 BasicBlocks (8 conv+BN) per branch, pre-stacked per branch
    for i in range(stage):
        ci, _, _ = dims[i]
        ws, bs = [], []
        for _ in range(2 * _N_BLOCKS):
            key, k = jax.random.split(key)
            wt, bias = make_conv_bn(k, ci, ci, 3)
            ws.append(wt)
            bs.append(bias)
        params["branches"].append({"w": jnp.stack(ws),     # (8, C_i, 9C_i) bf16
                                   "b": jnp.stack(bs)})    # (8, C_i, 1)    f32
    # fuse layers
    for i in range(output_branches):
        row = []
        ci, _, _ = dims[i]
        for j in range(stage):
            cj, hj, wj = dims[j]
            if i == j:
                row.append(None)
            elif i < j:                       # 1x1 conv + BN + nearest upsample
                key, k = jax.random.split(key)
                wt, bias = make_conv_bn(k, cj, ci, 1)
                row.append({"type": "up", "w": wt, "b": bias,
                            "U": make_upsample(hj, wj, 2 ** (j - i))})
            else:                             # (i-j) conv3x3/s2 + BN (+ReLU)
                ops = []
                hh, ww, ch = hj, wj, cj
                for s in range(i - j):
                    cout = ch if s < i - j - 1 else ci
                    key, k = jax.random.split(key)
                    wt, bias = make_conv_bn(k, ch, cout, 3)
                    ops.append({"w": wt, "b": bias, "hw": (hh, ww),
                                "S": make_downselect(hh, ww)})
                    hh, ww, ch = hh // 2, ww // 2, cout
                row.append({"type": "down", "ops": ops})
        params["fuse"].append(row)
    return params, meta


# ----------------------------------------------------------------------------
# Fused StageModule forward: one pallas_call for everything
# ----------------------------------------------------------------------------
def _zero_index_map(ndim):
    return lambda b: (0,) * ndim


def build_stage_forward(params, meta, batch, dtype=jnp.float32):
    stage = meta["stage"]
    ob = meta["output_branches"]
    dims = meta["branch_dims"]

    # ---- flatten every parameter / constant into one positional input list --
    warrs = []

    def _slot(a):
        warrs.append(a)
        return len(warrs) - 1

    mask_slots = {}

    def _mask_slot(h, w):
        if (h, w) not in mask_slots:
            col = jnp.arange(h * w) % w
            m = jnp.stack([(col != 0), (col != w - 1)]).astype(jnp.float32)
            mask_slots[(h, w)] = _slot(m)                    # (2, H*W)
        return mask_slots[(h, w)]

    branch_idx = []
    for i in range(stage):
        _, hi, wi = dims[i]
        branch_idx.append((_slot(params["branches"][i]["w"]),
                           _slot(params["branches"][i]["b"]),
                           _mask_slot(hi, wi)))

    fuse_idx = []
    for i in range(ob):
        row = []
        for j in range(stage):
            e = params["fuse"][i][j]
            if e is None:
                row.append(None)
            elif e["type"] == "up":
                row.append(("up", _slot(e["w"]), _slot(e["b"]), _slot(e["U"])))
            else:
                steps = []
                for op in e["ops"]:
                    hh, ww = op["hw"]
                    steps.append((_slot(op["w"]), _slot(op["b"]),
                                  _slot(op["S"]), _mask_slot(hh, ww), hh, ww))
                row.append(("down", steps))
        fuse_idx.append(row)

    n_w = len(warrs)

    # --------------------------------- kernel --------------------------------
    def kernel(*refs):
        x_refs = refs[:stage]
        wr = refs[stage:stage + n_w]
        o_refs = refs[stage + n_w:]

        # Branches: 4 fused BasicBlocks each; activations never leave VMEM.
        bouts = []
        for i in range(stage):
            _, hi, wi = dims[i]
            wi_, bi_, mi_ = branch_idx[i]
            masks = wr[mi_][...]
            act = x_refs[i][0].astype(jnp.float32)           # (C_i, H_i*W_i)
            for blk in range(_N_BLOCKS):
                res = act
                act = _conv3x3_chw(act, wr[wi_][2 * blk], wr[bi_][2 * blk],
                                   hi, wi, masks, relu=True)
                act = _conv3x3_chw(act, wr[wi_][2 * blk + 1],
                                   wr[bi_][2 * blk + 1],
                                   hi, wi, masks, relu=False)
                act = jnp.maximum(act + res, 0.0)            # residual + ReLU
            bouts.append(act)

        # Fuse: cross-resolution terms computed and summed in VMEM; upsample /
        # stride-2 select are tiny {0,1} matmuls on the otherwise idle MXU.
        for i in range(ob):
            acc = None
            for j in range(stage):
                e = fuse_idx[i][j]
                if e is None:
                    term = bouts[j]
                elif e[0] == "up":
                    _, ws_, bs_, us_ = e
                    y = jnp.dot(wr[ws_][...], bouts[j].astype(jnp.bfloat16),
                                preferred_element_type=jnp.float32)
                    y = y + wr[bs_][...]
                    term = jnp.dot(y, wr[us_][...],
                                   preferred_element_type=jnp.float32)
                else:
                    steps = e[1]
                    y = bouts[j]
                    for s, (ws_, bs_, ss_, ms_, hh, ww) in enumerate(steps):
                        y = _conv3x3_chw(y, wr[ws_][...], wr[bs_][...], hh, ww,
                                         wr[ms_][...],
                                         relu=(s < len(steps) - 1),
                                         sel=wr[ss_][...])
                    term = y
                acc = term if acc is None else acc + term
            o_refs[i][0] = jnp.maximum(acc, 0.0).astype(o_refs[i].dtype)

    # --------------------------------- specs ---------------------------------
    in_specs = [pl.BlockSpec((1, dims[i][0], dims[i][1] * dims[i][2]),
                             lambda b: (b, 0, 0)) for i in range(stage)]
    in_specs += [pl.BlockSpec(a.shape, _zero_index_map(a.ndim)) for a in warrs]
    out_specs = [pl.BlockSpec((1, dims[i][0], dims[i][1] * dims[i][2]),
                              lambda b: (b, 0, 0)) for i in range(ob)]
    out_shape = [jax.ShapeDtypeStruct((batch, dims[i][0],
                                       dims[i][1] * dims[i][2]), dtype)
                 for i in range(ob)]

    call = pl.pallas_call(
        kernel,
        grid=(batch,),                       # parallel over batch -> 2 TCs on v7x
        in_specs=in_specs,
        out_specs=out_specs,
        out_shape=out_shape,
        compiler_params=pltpu.CompilerParams(dimension_semantics=("parallel",)),
    )
    return call, warrs


def stage_module_forward(params, meta, xs):
    """xs: list of NCHW arrays (matching the PyTorch module layout)."""
    stage = meta["stage"]
    dims = meta["branch_dims"]
    assert len(xs) == stage
    n = xs[0].shape[0]
    call, warrs = build_stage_forward(params, meta, n, dtype=xs[0].dtype)
    flat_x = [x.reshape(n, dims[i][0], dims[i][1] * dims[i][2])
              for i, x in enumerate(xs)]
    outs = call(*flat_x, *warrs)
    return [o.reshape(n, dims[i][0], dims[i][1], dims[i][2])
            for i, o in enumerate(outs)]


# ----------------------------------------------------------------------------
if __name__ == "__main__":
    # StageModule(stage=2, output_branches=2, c=8, bn_momentum=0.1)
    stage, output_branches, c = 2, 2, 8
    n, h, w = 2, 16, 16

    root = jax.random.PRNGKey(0)
    kp, kx0, kx1 = jax.random.split(root, 3)
    params, meta = init_stage_module(kp, stage, output_branches, c, h, w)

    # NCHW inputs (same layout as the PyTorch module):
    #   branch 0: (2, 8, 16, 16), branch 1: (2, 16, 8, 8)
    x0 = jax.random.normal(kx0, (n, c, h, w), jnp.float32)
    x1 = jax.random.normal(kx1, (n, 2 * c, h // 2, w // 2), jnp.float32)

    fwd = jax.jit(lambda a, b: stage_module_forward(params, meta, [a, b]))
    outs = fwd(x0, x1)
    for o in outs:
        jax.block_until_ready(o)

    assert outs[0].shape == (n, c, h, w)
    assert outs[1].shape == (n, 2 * c, h // 2, w // 2)
    assert all(bool(jnp.all(jnp.isfinite(o))) for o in outs)
    print("KERNEL_OK")
</pallas_src>

<mosaic_0001>
module attributes {stable_mosaic.version = 11 : i64} {
  func.func @kernel(%arg0: i32, %arg1: memref<1x8x256xf32, #tpu.memory_space<vmem>>, %arg2: memref<1x16x64xf32, #tpu.memory_space<vmem>>, %arg3: memref<8x8x72xbf16, #tpu.memory_space<vmem>>, %arg4: memref<8x8x1xf32, #tpu.memory_space<vmem>>, %arg5: memref<2x256xf32, #tpu.memory_space<vmem>>, %arg6: memref<8x16x144xbf16, #tpu.memory_space<vmem>>, %arg7: memref<8x16x1xf32, #tpu.memory_space<vmem>>, %arg8: memref<2x64xf32, #tpu.memory_space<vmem>>, %arg9: memref<8x16xbf16, #tpu.memory_space<vmem>>, %arg10: memref<8x1xf32, #tpu.memory_space<vmem>>, %arg11: memref<64x256xf32, #tpu.memory_space<vmem>>, %arg12: memref<16x72xbf16, #tpu.memory_space<vmem>>, %arg13: memref<16x1xf32, #tpu.memory_space<vmem>>, %arg14: memref<256x64xf32, #tpu.memory_space<vmem>>, %arg15: memref<1x8x256xf32, #tpu.memory_space<vmem>>, %arg16: memref<1x16x64xf32, #tpu.memory_space<vmem>>) attributes {dimension_semantics = [#tpu.dimension_semantics<parallel>], iteration_bounds = array<i64: 2>, scalar_prefetch = 0 : i64, scratch_operands = 0 : i64, tpu.core_type = #tpu.core_type<tc>, window_params = [{transform_indices = @transform_0, window_bounds = array<i64: 1, 8, 256>}, {transform_indices = @transform_1, window_bounds = array<i64: 1, 16, 64>}, {pipeline_mode = #tpu.pipeline_mode<synchronous>, transform_indices = @transform_2, window_bounds = array<i64: 8, 8, 72>}, {pipeline_mode = #tpu.pipeline_mode<synchronous>, transform_indices = @transform_3, window_bounds = array<i64: 8, 8, 1>}, {pipeline_mode = #tpu.pipeline_mode<synchronous>, transform_indices = @transform_4, window_bounds = array<i64: 2, 256>}, {pipeline_mode = #tpu.pipeline_mode<synchronous>, transform_indices = @transform_5, window_bounds = array<i64: 8, 16, 144>}, {pipeline_mode = #tpu.pipeline_mode<synchronous>, transform_indices = @transform_6, window_bounds = array<i64: 8, 16, 1>}, {pipeline_mode = #tpu.pipeline_mode<synchronous>, transform_indices = @transform_7, window_bounds = array<i64: 2, 64>}, {pipeline_mode = #tpu.pipeline_mode<synchronous>, transform_indices = @transform_8, window_bounds = array<i64: 8, 16>}, {pipeline_mode = #tpu.pipeline_mode<synchronous>, transform_indices = @transform_9, window_bounds = array<i64: 8, 1>}, {pipeline_mode = #tpu.pipeline_mode<synchronous>, transform_indices = @transform_10, window_bounds = array<i64: 64, 256>}, {pipeline_mode = #tpu.pipeline_mode<synchronous>, transform_indices = @transform_11, window_bounds = array<i64: 16, 72>}, {pipeline_mode = #tpu.pipeline_mode<synchronous>, transform_indices = @transform_12, window_bounds = array<i64: 16, 1>}, {pipeline_mode = #tpu.pipeline_mode<synchronous>, transform_indices = @transform_13, window_bounds = array<i64: 256, 64>}, {transform_indices = @transform_14, window_bounds = array<i64: 1, 8, 256>}, {transform_indices = @transform_15, window_bounds = array<i64: 1, 16, 64>}]} {
    %c0 = arith.constant 0 : index
    %c0_0 = arith.constant 0 : index
    %0 = vector.load %arg5[%c0, %c0_0] : memref<2x256xf32, #tpu.memory_space<vmem>>, vector<2x256xf32>
    %c0_1 = arith.constant 0 : index
    %c0_2 = arith.constant 0 : index
    %c0_3 = arith.constant 0 : index
    %1 = vector.load %arg1[%c0_1, %c0_2, %c0_3] : memref<1x8x256xf32, #tpu.memory_space<vmem>>, vector<1x8x256xf32>
    %2 = vector.shape_cast %1 : vector<1x8x256xf32> to vector<8x256xf32>
    %c0_4 = arith.constant 0 : index
    %c0_5 = arith.constant 0 : index
    %c0_6 = arith.constant 0 : index
    %3 = vector.load %arg3[%c0_4, %c0_5, %c0_6] : memref<8x8x72xbf16, #tpu.memory_space<vmem>>, vector<1x8x72xbf16>
    %4 = vector.shape_cast %3 : vector<1x8x72xbf16> to vector<8x72xbf16>
    %c0_7 = arith.constant 0 : index
    %c0_8 = arith.constant 0 : index
    %c0_9 = arith.constant 0 : index
    %5 = vector.load %arg4[%c0_7, %c0_8, %c0_9] : memref<8x8x1xf32, #tpu.memory_space<vmem>>, vector<1x8x1xf32>
    %6 = vector.shape_cast %5 : vector<1x8x1xf32> to vector<8x1xf32>
    %cst = arith.constant 0.000000e+00 : f32
    %7 = vector.broadcast %cst : f32 to vector<8x17xf32>
    %8 = tpu.concatenate %7, %2, %7 in 1 : vector<8x17xf32>, vector<8x256xf32>, vector<8x17xf32> -> vector<8x290xf32>
    %9 = vector.extract_strided_slice %0 {offsets = [0, 0], sizes = [1, 256], strides = [1, 1]} : vector<2x256xf32> to vector<1x256xf32>
    %10 = vector.extract_strided_slice %0 {offsets = [1, 0], sizes = [1, 256], strides = [1, 1]} : vector<2x256xf32> to vector<1x256xf32>
    %11 = vector.extract_strided_slice %8 {offsets = [0, 0], sizes = [8, 256], strides = [1, 1]} : vector<8x290xf32> to vector<8x256xf32>
    %12 = vector.broadcast %9 : vector<1x256xf32> to vector<8x256xf32>
    %13 = arith.mulf %11, %12 : vector<8x256xf32>
    %14 = vector.extract_strided_slice %8 {offsets = [0, 1], sizes = [8, 256], strides = [1, 1]} : vector<8x290xf32> to vector<8x256xf32>
    %15 = vector.extract_strided_slice %8 {offsets = [0, 2], sizes = [8, 256], strides = [1, 1]} : vector<8x290xf32> to vector<8x256xf32>
    %16 = vector.broadcast %10 : vector<1x256xf32> to vector<8x256xf32>
    %17 = arith.mulf %15, %16 : vector<8x256xf32>
    %18 = vector.extract_strided_slice %8 {offsets = [0, 16], sizes = [8, 256], strides = [1, 1]} : vector<8x290xf32> to vector<8x256xf32>
    %19 = vector.broadcast %9 : vector<1x256xf32> to vector<8x256xf32>
    %20 = arith.mulf %18, %19 : vector<8x256xf32>
    %21 = vector.extract_strided_slice %8 {offsets = [0, 17], sizes = [8, 256], strides = [1, 1]} : vector<8x290xf32> to vector<8x256xf32>
    %22 = vector.extract_strided_slice %8 {offsets = [0, 18], sizes = [8, 256], strides = [1, 1]} : vector<8x290xf32> to vector<8x256xf32>
    %23 = vector.broadcast %10 : vector<1x256xf32> to vector<8x256xf32>
    %24 = arith.mulf %22, %23 : vector<8x256xf32>
    %25 = vector.extract_strided_slice %8 {offsets = [0, 32], sizes = [8, 256], strides = [1, 1]} : vector<8x290xf32> to vector<8x256xf32>
    %26 = vector.broadcast %9 : vector<1x256xf32> to vector<8x256xf32>
    %27 = arith.mulf %25, %26 : vector<8x256xf32>
    %28 = vector.extract_strided_slice %8 {offsets = [0, 33], sizes = [8, 256], strides = [1, 1]} : vector<8x290xf32> to vector<8x256xf32>
    %29 = vector.extract_strided_slice %8 {offsets = [0, 34], sizes = [8, 256], strides = [1, 1]} : vector<8x290xf32> to vector<8x256xf32>
    %30 = vector.broadcast %10 : vector<1x256xf32> to vector<8x256xf32>
    %31 = arith.mulf %29, %30 : vector<8x256xf32>
    %32 = tpu.concatenate %13, %14, %17, %20, %21, %24, %27, %28, %31 in 0 : vector<8x256xf32>, vector<8x256xf32>, vector<8x256xf32>, vector<8x256xf32>, vector<8x256xf32>, vector<8x256xf32>, vector<8x256xf32>, vector<8x256xf32>, vector<8x256xf32> -> vector<72x256xf32>
    %33 = arith.truncf %32 : vector<72x256xf32> to vector<72x256xbf16>
    %cst_10 = arith.constant dense<0.000000e+00> : vector<8x256xf32>
    %34 = tpu.matmul %4, %33, %cst_10 {dimension_numbers = #tpu.dot_dimension_numbers<[1], [0], [0], [1], [0, 0, 1, 1], [], []>} : vector<8x72xbf16>, vector<72x256xbf16>, vector<8x256xf32> -> vector<8x256xf32>
    %35 = vector.broadcast %6 : vector<8x1xf32> to vector<8x256xf32>
    %36 = arith.addf %34, %35 : vector<8x256xf32>
    %cst_11 = arith.constant 0.000000e+00 : f32
    %37 = vector.broadcast %cst_11 : f32 to vector<8x256xf32>
    %38 = arith.maximumf %36, %37 : vector<8x256xf32>
    %c1 = arith.constant 1 : index
    %c0_12 = arith.constant 0 : index
    %c0_13 = arith.constant 0 : index
    %39 = vector.load %arg3[%c1, %c0_12, %c0_13] : memref<8x8x72xbf16, #tpu.memory_space<vmem>>, vector<1x8x72xbf16>
    %40 = vector.shape_cast %39 : vector<1x8x72xbf16> to vector<8x72xbf16>
    %c1_14 = arith.constant 1 : index
    %c0_15 = arith.constant 0 : index
    %c0_16 = arith.constant 0 : index
    %41 = vector.load %arg4[%c1_14, %c0_15, %c0_16] : memref<8x8x1xf32, #tpu.memory_space<vmem>>, vector<1x8x1xf32>
    %42 = vector.shape_cast %41 : vector<1x8x1xf32> to vector<8x1xf32>
    %cst_17 = arith.constant 0.000000e+00 : f32
    %43 = vector.broadcast %cst_17 : f32 to vector<8x17xf32>
    %44 = tpu.concatenate %43, %38, %43 in 1 : vector<8x17xf32>, vector<8x256xf32>, vector<8x17xf32> -> vector<8x290xf32>
    %45 = vector.extract_strided_slice %0 {offsets = [0, 0], sizes = [1, 256], strides = [1, 1]} : vector<2x256xf32> to vector<1x256xf32>
    %46 = vector.extract_strided_slice %0 {offsets = [1, 0], sizes = [1, 256], strides = [1, 1]} : vector<2x256xf32> to vector<1x256xf32>
    %47 = vector.extract_strided_slice %44 {offsets = [0, 0], sizes = [8, 256], strides = [1, 1]} : vector<8x290xf32> to vector<8x256xf32>
    %48 = vector.broadcast %45 : vector<1x256xf32> to vector<8x256xf32>
    %49 = arith.mulf %47, %48 : vector<8x256xf32>
    %50 = vector.extract_strided_slice %44 {offsets = [0, 1], sizes = [8, 256], strides = [1, 1]} : vector<8x290xf32> to vector<8x256xf32>
    %51 = vector.extract_strided_slice %44 {offsets = [0, 2], sizes = [8, 256], strides = [1, 1]} : vector<8x290xf32> to vector<8x256xf32>
    %52 = vector.broadcast %46 : vector<1x256xf32> to vector<8x256xf32>
    %53 = arith.mulf %51, %52 : vector<8x256xf32>
    %54 = vector.extract_strided_slice %44 {offsets = [0, 16], sizes = [8, 256], strides = [1, 1]} : vector<8x290xf32> to vector<8x256xf32>
    %55 = vector.broadcast %45 : vector<1x256xf32> to vector<8x256xf32>
    %56 = arith.mulf %54, %55 : vector<8x256xf32>
    %57 = vector.extract_strided_slice %44 {offsets = [0, 17], sizes = [8, 256], strides = [1, 1]} : vector<8x290xf32> to vector<8x256xf32>
    %58 = vector.extract_strided_slice %44 {offsets = [0, 18], sizes = [8, 256], strides = [1, 1]} : vector<8x290xf32> to vector<8x256xf32>
    %59 = vector.broadcast %46 : vector<1x256xf32> to vector<8x256xf32>
    %60 = arith.mulf %58, %59 : vector<8x256xf32>
    %61 = vector.extract_strided_slice %44 {offsets = [0, 32], sizes = [8, 256], strides = [1, 1]} : vector<8x290xf32> to vector<8x256xf32>
    %62 = vector.broadcast %45 : vector<1x256xf32> to vector<8x256xf32>
    %63 = arith.mulf %61, %62 : vector<8x256xf32>
    %64 = vector.extract_strided_slice %44 {offsets = [0, 33], sizes = [8, 256], strides = [1, 1]} : vector<8x290xf32> to vector<8x256xf32>
    %65 = vector.extract_strided_slice %44 {offsets = [0, 34], sizes = [8, 256], strides = [1, 1]} : vector<8x290xf32> to vector<8x256xf32>
    %66 = vector.broadcast %46 : vector<1x256xf32> to vector<8x256xf32>
    %67 = arith.mulf %65, %66 : vector<8x256xf32>
    %68 = tpu.concatenate %49, %50, %53, %56, %57, %60, %63, %64, %67 in 0 : vector<8x256xf32>, vector<8x256xf32>, vector<8x256xf32>, vector<8x256xf32>, vector<8x256xf32>, vector<8x256xf32>, vector<8x256xf32>, vector<8x256xf32>, vector<8x256xf32> -> vector<72x256xf32>
    %69 = arith.truncf %68 : vector<72x256xf32> to vector<72x256xbf16>
    %cst_18 = arith.constant dense<0.000000e+00> : vector<8x256xf32>
    %70 = tpu.matmul %40, %69, %cst_18 {dimension_numbers = #tpu.dot_dimension_numbers<[1], [0], [0], [1], [0, 0, 1, 1], [], []>} : vector<8x72xbf16>, vector<72x256xbf16>, vector<8x256xf32> -> vector<8x256xf32>
    %71 = vector.broadcast %42 : vector<8x1xf32> to vector<8x256xf32>
    %72 = arith.addf %70, %71 : vector<8x256xf32>
    %73 = arith.addf %72, %2 : vector<8x256xf32>
    %cst_19 = arith.constant 0.000000e+00 : f32
    %74 = vector.broadcast %cst_19 : f32 to vector<8x256xf32>
    %75 = arith.maximumf %73, %74 : vector<8x256xf32>
    %c2 = arith.constant 2 : index
    %c0_20 = arith.constant 0 : index
    %c0_21 = arith.constant 0 : index
    %76 = vector.load %arg3[%c2, %c0_20, %c0_21] : memref<8x8x72xbf16, #tpu.memory_space<vmem>>, vector<1x8x72xbf16>
    %77 = vector.shape_cast %76 : vector<1x8x72xbf16> to vector<8x72xbf16>
    %c2_22 = arith.constant 2 : index
    %c0_23 = arith.constant 0 : index
    %c0_24 = arith.constant 0 : index
    %78 = vector.load %arg4[%c2_22, %c0_23, %c0_24] : memref<8x8x1xf32, #tpu.memory_space<vmem>>, vector<1x8x1xf32>
    %79 = vector.shape_cast %78 : vector<1x8x1xf32> to vector<8x1xf32>
    %cst_25 = arith.constant 0.000000e+00 : f32
    %80 = vector.broadcast %cst_25 : f32 to vector<8x17xf32>
    %81 = tpu.concatenate %80, %75, %80 in 1 : vector<8x17xf32>, vector<8x256xf32>, vector<8x17xf32> -> vector<8x290xf32>
    %82 = vector.extract_strided_slice %0 {offsets = [0, 0], sizes = [1, 256], strides = [1, 1]} : vector<2x256xf32> to vector<1x256xf32>
    %83 = vector.extract_strided_slice %0 {offsets = [1, 0], sizes = [1, 256], strides = [1, 1]} : vector<2x256xf32> to vector<1x256xf32>
    %84 = vector.extract_strided_slice %81 {offsets = [0, 0], sizes = [8, 256], strides = [1, 1]} : vector<8x290xf32> to vector<8x256xf32>
    %85 = vector.broadcast %82 : vector<1x256xf32> to vector<8x256xf32>
    %86 = arith.mulf %84, %85 : vector<8x256xf32>
    %87 = vector.extract_strided_slice %81 {offsets = [0, 1], sizes = [8, 256], strides = [1, 1]} : vector<8x290xf32> to vector<8x256xf32>
    %88 = vector.extract_strided_slice %81 {offsets = [0, 2], sizes = [8, 256], strides = [1, 1]} : vector<8x290xf32> to vector<8x256xf32>
    %89 = vector.broadcast %83 : vector<1x256xf32> to vector<8x256xf32>
    %90 = arith.mulf %88, %89 : vector<8x256xf32>
    %91 = vector.extract_strided_slice %81 {offsets = [0, 16], sizes = [8, 256], strides = [1, 1]} : vector<8x290xf32> to vector<8x256xf32>
    %92 = vector.broadcast %82 : vector<1x256xf32> to vector<8x256xf32>
    %93 = arith.mulf %91, %92 : vector<8x256xf32>
    %94 = vector.extract_strided_slice %81 {offsets = [0, 17], sizes = [8, 256], strides = [1, 1]} : vector<8x290xf32> to vector<8x256xf32>
    %95 = vector.extract_strided_slice %81 {offsets = [0, 18], sizes = [8, 256], strides = [1, 1]} : vector<8x290xf32> to vector<8x256xf32>
    %96 = vector.broadcast %83 : vector<1x256xf32> to vector<8x256xf32>
    %97 = arith.mulf %95, %96 : vector<8x256xf32>
    %98 = vector.extract_strided_slice %81 {offsets = [0, 32], sizes = [8, 256], strides = [1, 1]} : vector<8x290xf32> to vector<8x256xf32>
    %99 = vector.broadcast %82 : vector<1x256xf32> to vector<8x256xf32>
    %100 = arith.mulf %98, %99 : vector<8x256xf32>
    %101 = vector.extract_strided_slice %81 {offsets = [0, 33], sizes = [8, 256], strides = [1, 1]} : vector<8x290xf32> to vector<8x256xf32>
    %102 = vector.extract_strided_slice %81 {offsets = [0, 34], sizes = [8, 256], strides = [1, 1]} : vector<8x290xf32> to vector<8x256xf32>
    %103 = vector.broadcast %83 : vector<1x256xf32> to vector<8x256xf32>
    %104 = arith.mulf %102, %103 : vector<8x256xf32>
    %105 = tpu.concatenate %86, %87, %90, %93, %94, %97, %100, %101, %104 in 0 : vector<8x256xf32>, vector<8x256xf32>, vector<8x256xf32>, vector<8x256xf32>, vector<8x256xf32>, vector<8x256xf32>, vector<8x256xf32>, vector<8x256xf32>, vector<8x256xf32> -> vector<72x256xf32>
    %106 = arith.truncf %105 : vector<72x256xf32> to vector<72x256xbf16>
    %cst_26 = arith.constant dense<0.000000e+00> : vector<8x256xf32>
    %107 = tpu.matmul %77, %106, %cst_26 {dimension_numbers = #tpu.dot_dimension_numbers<[1], [0], [0], [1], [0, 0, 1, 1], [], []>} : vector<8x72xbf16>, vector<72x256xbf16>, vector<8x256xf32> -> vector<8x256xf32>
    %108 = vector.broadcast %79 : vector<8x1xf32> to vector<8x256xf32>
    %109 = arith.addf %107, %108 : vector<8x256xf32>
    %cst_27 = arith.constant 0.000000e+00 : f32
    %110 = vector.broadcast %cst_27 : f32 to vector<8x256xf32>
    %111 = arith.maximumf %109, %110 : vector<8x256xf32>
    %c3 = arith.constant 3 : index
    %c0_28 = arith.constant 0 : index
    %c0_29 = arith.constant 0 : index
    %112 = vector.load %arg3[%c3, %c0_28, %c0_29] : memref<8x8x72xbf16, #tpu.memory_space<vmem>>, vector<1x8x72xbf16>
    %113 = vector.shape_cast %112 : vector<1x8x72xbf16> to vector<8x72xbf16>
    %c3_30 = arith.constant 3 : index
    %c0_31 = arith.constant 0 : index
    %c0_32 = arith.constant 0 : index
    %114 = vector.load %arg4[%c3_30, %c0_31, %c0_32] : memref<8x8x1xf32, #tpu.memory_space<vmem>>, vector<1x8x1xf32>
    %115 = vector.shape_cast %114 : vector<1x8x1xf32> to vector<8x1xf32>
    %cst_33 = arith.constant 0.000000e+00 : f32
    %116 = vector.broadcast %cst_33 : f32 to vector<8x17xf32>
    %117 = tpu.concatenate %116, %111, %116 in 1 : vector<8x17xf32>, vector<8x256xf32>, vector<8x17xf32> -> vector<8x290xf32>
    %118 = vector.extract_strided_slice %0 {offsets = [0, 0], sizes = [1, 256], strides = [1, 1]} : vector<2x256xf32> to vector<1x256xf32>
    %119 = vector.extract_strided_slice %0 {offsets = [1, 0], sizes = [1, 256], strides = [1, 1]} : vector<2x256xf32> to vector<1x256xf32>
    %120 = vector.extract_strided_slice %117 {offsets = [0, 0], sizes = [8, 256], strides = [1, 1]} : vector<8x290xf32> to vector<8x256xf32>
    %121 = vector.broadcast %118 : vector<1x256xf32> to vector<8x256xf32>
    %122 = arith.mulf %120, %121 : vector<8x256xf32>
    %123 = vector.extract_strided_slice %117 {offsets = [0, 1], sizes = [8, 256], strides = [1, 1]} : vector<8x290xf32> to vector<8x256xf32>
    %124 = vector.extract_strided_slice %117 {offsets = [0, 2], sizes = [8, 256], strides = [1, 1]} : vector<8x290xf32> to vector<8x256xf32>
    %125 = vector.broadcast %119 : vector<1x256xf32> to vector<8x256xf32>
    %126 = arith.mulf %124, %125 : vector<8x256xf32>
    %127 = vector.extract_strided_slice %117 {offsets = [0, 16], sizes = [8, 256], strides = [1, 1]} : vector<8x290xf32> to vector<8x256xf32>
    %128 = vector.broadcast %118 : vector<1x256xf32> to vector<8x256xf32>
    %129 = arith.mulf %127, %128 : vector<8x256xf32>
    %130 = vector.extract_strided_slice %117 {offsets = [0, 17], sizes = [8, 256], strides = [1, 1]} : vector<8x290xf32> to vector<8x256xf32>
    %131 = vector.extract_strided_slice %117 {offsets = [0, 18], sizes = [8, 256], strides = [1, 1]} : vector<8x290xf32> to vector<8x256xf32>
    %132 = vector.broadcast %119 : vector<1x256xf32> to vector<8x256xf32>
    %133 = arith.mulf %131, %132 : vector<8x256xf32>
    %134 = vector.extract_strided_slice %117 {offsets = [0, 32], sizes = [8, 256], strides = [1, 1]} : vector<8x290xf32> to vector<8x256xf32>
    %135 = vector.broadcast %118 : vector<1x256xf32> to vector<8x256xf32>
    %136 = arith.mulf %134, %135 : vector<8x256xf32>
    %137 = vector.extract_strided_slice %117 {offsets = [0, 33], sizes = [8, 256], strides = [1, 1]} : vector<8x290xf32> to vector<8x256xf32>
    %138 = vector.extract_strided_slice %117 {offsets = [0, 34], sizes = [8, 256], strides = [1, 1]} : vector<8x290xf32> to vector<8x256xf32>
    %139 = vector.broadcast %119 : vector<1x256xf32> to vector<8x256xf32>
    %140 = arith.mulf %138, %139 : vector<8x256xf32>
    %141 = tpu.concatenate %122, %123, %126, %129, %130, %133, %136, %137, %140 in 0 : vector<8x256xf32>, vector<8x256xf32>, vector<8x256xf32>, vector<8x256xf32>, vector<8x256xf32>, vector<8x256xf32>, vector<8x256xf32>, vector<8x256xf32>, vector<8x256xf32> -> vector<72x256xf32>
    %142 = arith.truncf %141 : vector<72x256xf32> to vector<72x256xbf16>
    %cst_34 = arith.constant dense<0.000000e+00> : vector<8x256xf32>
    %143 = tpu.matmul %113, %142, %cst_34 {dimension_numbers = #tpu.dot_dimension_numbers<[1], [0], [0], [1], [0, 0, 1, 1], [], []>} : vector<8x72xbf16>, vector<72x256xbf16>, vector<8x256xf32> -> vector<8x256xf32>
    %144 = vector.broadcast %115 : vector<8x1xf32> to vector<8x256xf32>
    %145 = arith.addf %143, %144 : vector<8x256xf32>
    %146 = arith.addf %145, %75 : vector<8x256xf32>
    %cst_35 = arith.constant 0.000000e+00 : f32
    %147 = vector.broadcast %cst_35 : f32 to vector<8x256xf32>
    %148 = arith.maximumf %146, %147 : vector<8x256xf32>
    %c4 = arith.constant 4 : index
    %c0_36 = arith.constant 0 : index
    %c0_37 = arith.constant 0 : index
    %149 = vector.load %arg3[%c4, %c0_36, %c0_37] : memref<8x8x72xbf16, #tpu.memory_space<vmem>>, vector<1x8x72xbf16>
    %150 = vector.shape_cast %149 : vector<1x8x72xbf16> to vector<8x72xbf16>
    %c4_38 = arith.constant 4 : index
    %c0_39 = arith.constant 0 : index
    %c0_40 = arith.constant 0 : index
    %151 = vector.load %arg4[%c4_38, %c0_39, %c0_40] : memref<8x8x1xf32, #tpu.memory_space<vmem>>, vector<1x8x1xf32>
    %152 = vector.shape_cast %151 : vector<1x8x1xf32> to vector<8x1xf32>
    %cst_41 = arith.constant 0.000000e+00 : f32
    %153 = vector.broadcast %cst_41 : f32 to vector<8x17xf32>
    %154 = tpu.concatenate %153, %148, %153 in 1 : vector<8x17xf32>, vector<8x256xf32>, vector<8x17xf32> -> vector<8x290xf32>
    %155 = vector.extract_strided_slice %0 {offsets = [0, 0], sizes = [1, 256], strides = [1, 1]} : vector<2x256xf32> to vector<1x256xf32>
    %156 = vector.extract_strided_slice %0 {offsets = [1, 0], sizes = [1, 256], strides = [1, 1]} : vector<2x256xf32> to vector<1x256xf32>
    %157 = vector.extract_strided_slice %154 {offsets = [0, 0], sizes = [8, 256], strides = [1, 1]} : vector<8x290xf32> to vector<8x256xf32>
    %158 = vector.broadcast %155 : vector<1x256xf32> to vector<8x256xf32>
    %159 = arith.mulf %157, %158 : vector<8x256xf32>
    %160 = vector.extract_strided_slice %154 {offsets = [0, 1], sizes = [8, 256], strides = [1, 1]} : vector<8x290xf32> to vector<8x256xf32>
    %161 = vector.extract_strided_slice %154 {offsets = [0, 2], sizes = [8, 256], strides = [1, 1]} : vector<8x290xf32> to vector<8x256xf32>
    %162 = vector.broadcast %156 : vector<1x256xf32> to vector<8x256xf32>
    %163 = arith.mulf %161, %162 : vector<8x256xf32>
    %164 = vector.extract_strided_slice %154 {offsets = [0, 16], sizes = [8, 256], strides = [1, 1]} : vector<8x290xf32> to vector<8x256xf32>
    %165 = vector.broadcast %155 : vector<1x256xf32> to vector<8x256xf32>
    %166 = arith.mulf %164, %165 : vector<8x256xf32>
    %167 = vector.extract_strided_slice %154 {offsets = [0, 17], sizes = [8, 256], strides = [1, 1]} : vector<8x290xf32> to vector<8x256xf32>
    %168 = vector.extract_strided_slice %154 {offsets = [0, 18], sizes = [8, 256], strides = [1, 1]} : vector<8x290xf32> to vector<8x256xf32>
    %169 = vector.broadcast %156 : vector<1x256xf32> to vector<8x256xf32>
    %170 = arith.mulf %168, %169 : vector<8x256xf32>
    %171 = vector.extract_strided_slice %154 {offsets = [0, 32], sizes = [8, 256], strides = [1, 1]} : vector<8x290xf32> to vector<8x256xf32>
    %172 = vector.broadcast %155 : vector<1x256xf32> to vector<8x256xf32>
    %173 = arith.mulf %171, %172 : vector<8x256xf32>
    %174 = vector.extract_strided_slice %154 {offsets = [0, 33], sizes = [8, 256], strides = [1, 1]} : vector<8x290xf32> to vector<8x256xf32>
    %175 = vector.extract_strided_slice %154 {offsets = [0, 34], sizes = [8, 256], strides = [1, 1]} : vector<8x290xf32> to vector<8x256xf32>
    %176 = vector.broadcast %156 : vector<1x256xf32> to vector<8x256xf32>
    %177 = arith.mulf %175, %176 : vector<8x256xf32>
    %178 = tpu.concatenate %159, %160, %163, %166, %167, %170, %173, %174, %177 in 0 : vector<8x256xf32>, vector<8x256xf32>, vector<8x256xf32>, vector<8x256xf32>, vector<8x256xf32>, vector<8x256xf32>, vector<8x256xf32>, vector<8x256xf32>, vector<8x256xf32> -> vector<72x256xf32>
    %179 = arith.truncf %178 : vector<72x256xf32> to vector<72x256xbf16>
    %cst_42 = arith.constant dense<0.000000e+00> : vector<8x256xf32>
    %180 = tpu.matmul %150, %179, %cst_42 {dimension_numbers = #tpu.dot_dimension_numbers<[1], [0], [0], [1], [0, 0, 1, 1], [], []>} : vector<8x72xbf16>, vector<72x256xbf16>, vector<8x256xf32> -> vector<8x256xf32>
    %181 = vector.broadcast %152 : vector<8x1xf32> to vector<8x256xf32>
    %182 = arith.addf %180, %181 : vector<8x256xf32>
    %cst_43 = arith.constant 0.000000e+00 : f32
    %183 = vector.broadcast %cst_43 : f32 to vector<8x256xf32>
    %184 = arith.maximumf %182, %183 : vector<8x256xf32>
    %c5 = arith.constant 5 : index
    %c0_44 = arith.constant 0 : index
    %c0_45 = arith.constant 0 : index
    %185 = vector.load %arg3[%c5, %c0_44, %c0_45] : memref<8x8x72xbf16, #tpu.memory_space<vmem>>, vector<1x8x72xbf16>
    %186 = vector.shape_cast %185 : vector<1x8x72xbf16> to vector<8x72xbf16>
    %c5_46 = arith.constant 5 : index
    %c0_47 = arith.constant 0 : index
    %c0_48 = arith.constant 0 : index
    %187 = vector.load %arg4[%c5_46, %c0_47, %c0_48] : memref<8x8x1xf32, #tpu.memory_space<vmem>>, vector<1x8x1xf32>
    %188 = vector.shape_cast %187 : vector<1x8x1xf32> to vector<8x1xf32>
    %cst_49 = arith.constant 0.000000e+00 : f32
    %189 = vector.broadcast %cst_49 : f32 to vector<8x17xf32>
    %190 = tpu.concatenate %189, %184, %189 in 1 : vector<8x17xf32>, vector<8x256xf32>, vector<8x17xf32> -> vector<8x290xf32>
    %191 = vector.extract_strided_slice %0 {offsets = [0, 0], sizes = [1, 256], strides = [1, 1]} : vector<2x256xf32> to vector<1x256xf32>
    %192 = vector.extract_strided_slice %0 {offsets = [1, 0], sizes = [1, 256], strides = [1, 1]} : vector<2x256xf32> to vector<1x256xf32>
    %193 = vector.extract_strided_slice %190 {offsets = [0, 0], sizes = [8, 256], strides = [1, 1]} : vector<8x290xf32> to vector<8x256xf32>
    %194 = vector.broadcast %191 : vector<1x256xf32> to vector<8x256xf32>
    %195 = arith.mulf %193, %194 : vector<8x256xf32>
    %196 = vector.extract_strided_slice %190 {offsets = [0, 1], sizes = [8, 256], strides = [1, 1]} : vector<8x290xf32> to vector<8x256xf32>
    %197 = vector.extract_strided_slice %190 {offsets = [0, 2], sizes = [8, 256], strides = [1, 1]} : vector<8x290xf32> to vector<8x256xf32>
    %198 = vector.broadcast %192 : vector<1x256xf32> to vector<8x256xf32>
    %199 = arith.mulf %197, %198 : vector<8x256xf32>
    %200 = vector.extract_strided_slice %190 {offsets = [0, 16], sizes = [8, 256], strides = [1, 1]} : vector<8x290xf32> to vector<8x256xf32>
    %201 = vector.broadcast %191 : vector<1x256xf32> to vector<8x256xf32>
    %202 = arith.mulf %200, %201 : vector<8x256xf32>
    %203 = vector.extract_strided_slice %190 {offsets = [0, 17], sizes = [8, 256], strides = [1, 1]} : vector<8x290xf32> to vector<8x256xf32>
    %204 = vector.extract_strided_slice %190 {offsets = [0, 18], sizes = [8, 256], strides = [1, 1]} : vector<8x290xf32> to vector<8x256xf32>
    %205 = vector.broadcast %192 : vector<1x256xf32> to vector<8x256xf32>
    %206 = arith.mulf %204, %205 : vector<8x256xf32>
    %207 = vector.extract_strided_slice %190 {offsets = [0, 32], sizes = [8, 256], strides = [1, 1]} : vector<8x290xf32> to vector<8x256xf32>
    %208 = vector.broadcast %191 : vector<1x256xf32> to vector<8x256xf32>
    %209 = arith.mulf %207, %208 : vector<8x256xf32>
    %210 = vector.extract_strided_slice %190 {offsets = [0, 33], sizes = [8, 256], strides = [1, 1]} : vector<8x290xf32> to vector<8x256xf32>
    %211 = vector.extract_strided_slice %190 {offsets = [0, 34], sizes = [8, 256], strides = [1, 1]} : vector<8x290xf32> to vector<8x256xf32>
    %212 = vector.broadcast %192 : vector<1x256xf32> to vector<8x256xf32>
    %213 = arith.mulf %211, %212 : vector<8x256xf32>
    %214 = tpu.concatenate %195, %196, %199, %202, %203, %206, %209, %210, %213 in 0 : vector<8x256xf32>, vector<8x256xf32>, vector<8x256xf32>, vector<8x256xf32>, vector<8x256xf32>, vector<8x256xf32>, vector<8x256xf32>, vector<8x256xf32>, vector<8x256xf32> -> vector<72x256xf32>
    %215 = arith.truncf %214 : vector<72x256xf32> to vector<72x256xbf16>
    %cst_50 = arith.constant dense<0.000000e+00> : vector<8x256xf32>
    %216 = tpu.matmul %186, %215, %cst_50 {dimension_numbers = #tpu.dot_dimension_numbers<[1], [0], [0], [1], [0, 0, 1, 1], [], []>} : vector<8x72xbf16>, vector<72x256xbf16>, vector<8x256xf32> -> vector<8x256xf32>
    %217 = vector.broadcast %188 : vector<8x1xf32> to vector<8x256xf32>
    %218 = arith.addf %216, %217 : vector<8x256xf32>
    %219 = arith.addf %218, %148 : vector<8x256xf32>
    %cst_51 = arith.constant 0.000000e+00 : f32
    %220 = vector.broadcast %cst_51 : f32 to vector<8x256xf32>
    %221 = arith.maximumf %219, %220 : vector<8x256xf32>
    %c6 = arith.constant 6 : index
    %c0_52 = arith.constant 0 : index
    %c0_53 = arith.constant 0 : index
    %222 = vector.load %arg3[%c6, %c0_52, %c0_53] : memref<8x8x72xbf16, #tpu.memory_space<vmem>>, vector<1x8x72xbf16>
    %223 = vector.shape_cast %222 : vector<1x8x72xbf16> to vector<8x72xbf16>
    %c6_54 = arith.constant 6 : index
    %c0_55 = arith.constant 0 : index
    %c0_56 = arith.constant 0 : index
    %224 = vector.load %arg4[%c6_54, %c0_55, %c0_56] : memref<8x8x1xf32, #tpu.memory_space<vmem>>, vector<1x8x1xf32>
    %225 = vector.shape_cast %224 : vector<1x8x1xf32> to vector<8x1xf32>
    %cst_57 = arith.constant 0.000000e+00 : f32
    %226 = vector.broadcast %cst_57 : f32 to vector<8x17xf32>
    %227 = tpu.concatenate %226, %221, %226 in 1 : vector<8x17xf32>, vector<8x256xf32>, vector<8x17xf32> -> vector<8x290xf32>
    %228 = vector.extract_strided_slice %0 {offsets = [0, 0], sizes = [1, 256], strides = [1, 1]} : vector<2x256xf32> to vector<1x256xf32>
    %229 = vector.extract_strided_slice %0 {offsets = [1, 0], sizes = [1, 256], strides = [1, 1]} : vector<2x256xf32> to vector<1x256xf32>
    %230 = vector.extract_strided_slice %227 {offsets = [0, 0], sizes = [8, 256], strides = [1, 1]} : vector<8x290xf32> to vector<8x256xf32>
    %231 = vector.broadcast %228 : vector<1x256xf32> to vector<8x256xf32>
    %232 = arith.mulf %230, %231 : vector<8x256xf32>
    %233 = vector.extract_strided_slice %227 {offsets = [0, 1], sizes = [8, 256], strides = [1, 1]} : vector<8x290xf32> to vector<8x256xf32>
    %234 = vector.extract_strided_slice %227 {offsets = [0, 2], sizes = [8, 256], strides = [1, 1]} : vector<8x290xf32> to vector<8x256xf32>
    %235 = vector.broadcast %229 : vector<1x256xf32> to vector<8x256xf32>
    %236 = arith.mulf %234, %235 : vector<8x256xf32>
    %237 = vector.extract_strided_slice %227 {offsets = [0, 16], sizes = [8, 256], strides = [1, 1]} : vector<8x290xf32> to vector<8x256xf32>
    %238 = vector.broadcast %228 : vector<1x256xf32> to vector<8x256xf32>
    %239 = arith.mulf %237, %238 : vector<8x256xf32>
    %240 = vector.extract_strided_slice %227 {offsets = [0, 17], sizes = [8, 256], strides = [1, 1]} : vector<8x290xf32> to vector<8x256xf32>
    %241 = vector.extract_strided_slice %227 {offsets = [0, 18], sizes = [8, 256], strides = [1, 1]} : vector<8x290xf32> to vector<8x256xf32>
    %242 = vector.broadcast %229 : vector<1x256xf32> to vector<8x256xf32>
    %243 = arith.mulf %241, %242 : vector<8x256xf32>
    %244 = vector.extract_strided_slice %227 {offsets = [0, 32], sizes = [8, 256], strides = [1, 1]} : vector<8x290xf32> to vector<8x256xf32>
    %245 = vector.broadcast %228 : vector<1x256xf32> to vector<8x256xf32>
    %246 = arith.mulf %244, %245 : vector<8x256xf32>
    %247 = vector.extract_strided_slice %227 {offsets = [0, 33], sizes = [8, 256], strides = [1, 1]} : vector<8x290xf32> to vector<8x256xf32>
    %248 = vector.extract_strided_slice %227 {offsets = [0, 34], sizes = [8, 256], strides = [1, 1]} : vector<8x290xf32> to vector<8x256xf32>
    %249 = vector.broadcast %229 : vector<1x256xf32> to vector<8x256xf32>
    %250 = arith.mulf %248, %249 : vector<8x256xf32>
    %251 = tpu.concatenate %232, %233, %236, %239, %240, %243, %246, %247, %250 in 0 : vector<8x256xf32>, vector<8x256xf32>, vector<8x256xf32>, vector<8x256xf32>, vector<8x256xf32>, vector<8x256xf32>, vector<8x256xf32>, vector<8x256xf32>, vector<8x256xf32> -> vector<72x256xf32>
    %252 = arith.truncf %251 : vector<72x256xf32> to vector<72x256xbf16>
    %cst_58 = arith.constant dense<0.000000e+00> : vector<8x256xf32>
    %253 = tpu.matmul %223, %252, %cst_58 {dimension_numbers = #tpu.dot_dimension_numbers<[1], [0], [0], [1], [0, 0, 1, 1], [], []>} : vector<8x72xbf16>, vector<72x256xbf16>, vector<8x256xf32> -> vector<8x256xf32>
    %254 = vector.broadcast %225 : vector<8x1xf32> to vector<8x256xf32>
    %255 = arith.addf %253, %254 : vector<8x256xf32>
    %cst_59 = arith.constant 0.000000e+00 : f32
    %256 = vector.broadcast %cst_59 : f32 to vector<8x256xf32>
    %257 = arith.maximumf %255, %256 : vector<8x256xf32>
    %c7 = arith.constant 7 : index
    %c0_60 = arith.constant 0 : index
    %c0_61 = arith.constant 0 : index
    %258 = vector.load %arg3[%c7, %c0_60, %c0_61] : memref<8x8x72xbf16, #tpu.memory_space<vmem>>, vector<1x8x72xbf16>
    %259 = vector.shape_cast %258 : vector<1x8x72xbf16> to vector<8x72xbf16>
    %c7_62 = arith.constant 7 : index
    %c0_63 = arith.constant 0 : index
    %c0_64 = arith.constant 0 : index
    %260 = vector.load %arg4[%c7_62, %c0_63, %c0_64] : memref<8x8x1xf32, #tpu.memory_space<vmem>>, vector<1x8x1xf32>
    %261 = vector.shape_cast %260 : vector<1x8x1xf32> to vector<8x1xf32>
    %cst_65 = arith.constant 0.000000e+00 : f32
    %262 = vector.broadcast %cst_65 : f32 to vector<8x17xf32>
    %263 = tpu.concatenate %262, %257, %262 in 1 : vector<8x17xf32>, vector<8x256xf32>, vector<8x17xf32> -> vector<8x290xf32>
    %264 = vector.extract_strided_slice %0 {offsets = [0, 0], sizes = [1, 256], strides = [1, 1]} : vector<2x256xf32> to vector<1x256xf32>
    %265 = vector.extract_strided_slice %0 {offsets = [1, 0], sizes = [1, 256], strides = [1, 1]} : vector<2x256xf32> to vector<1x256xf32>
    %266 = vector.extract_strided_slice %263 {offsets = [0, 0], sizes = [8, 256], strides = [1, 1]} : vector<8x290xf32> to vector<8x256xf32>
    %267 = vector.broadcast %264 : vector<1x256xf32> to vector<8x256xf32>
    %268 = arith.mulf %266, %267 : vector<8x256xf32>
    %269 = vector.extract_strided_slice %263 {offsets = [0, 1], sizes = [8, 256], strides = [1, 1]} : vector<8x290xf32> to vector<8x256xf32>
    %270 = vector.extract_strided_slice %263 {offsets = [0, 2], sizes = [8, 256], strides = [1, 1]} : vector<8x290xf32> to vector<8x256xf32>
    %271 = vector.broadcast %265 : vector<1x256xf32> to vector<8x256xf32>
    %272 = arith.mulf %270, %271 : vector<8x256xf32>
    %273 = vector.extract_strided_slice %263 {offsets = [0, 16], sizes = [8, 256], strides = [1, 1]} : vector<8x290xf32> to vector<8x256xf32>
    %274 = vector.broadcast %264 : vector<1x256xf32> to vector<8x256xf32>
    %275 = arith.mulf %273, %274 : vector<8x256xf32>
    %276 = vector.extract_strided_slice %263 {offsets = [0, 17], sizes = [8, 256], strides = [1, 1]} : vector<8x290xf32> to vector<8x256xf32>
    %277 = vector.extract_strided_slice %263 {offsets = [0, 18], sizes = [8, 256], strides = [1, 1]} : vector<8x290xf32> to vector<8x256xf32>
    %278 = vector.broadcast %265 : vector<1x256xf32> to vector<8x256xf32>
    %279 = arith.mulf %277, %278 : vector<8x256xf32>
    %280 = vector.extract_strided_slice %263 {offsets = [0, 32], sizes = [8, 256], strides = [1, 1]} : vector<8x290xf32> to vector<8x256xf32>
    %281 = vector.broadcast %264 : vector<1x256xf32> to vector<8x256xf32>
    %282 = arith.mulf %280, %281 : vector<8x256xf32>
    %283 = vector.extract_strided_slice %263 {offsets = [0, 33], sizes = [8, 256], strides = [1, 1]} : vector<8x290xf32> to vector<8x256xf32>
    %284 = vector.extract_strided_slice %263 {offsets = [0, 34], sizes = [8, 256], strides = [1, 1]} : vector<8x290xf32> to vector<8x256xf32>
    %285 = vector.broadcast %265 : vector<1x256xf32> to vector<8x256xf32>
    %286 = arith.mulf %284, %285 : vector<8x256xf32>
    %287 = tpu.concatenate %268, %269, %272, %275, %276, %279, %282, %283, %286 in 0 : vector<8x256xf32>, vector<8x256xf32>, vector<8x256xf32>, vector<8x256xf32>, vector<8x256xf32>, vector<8x256xf32>, vector<8x256xf32>, vector<8x256xf32>, vector<8x256xf32> -> vector<72x256xf32>
    %288 = arith.truncf %287 : vector<72x256xf32> to vector<72x256xbf16>
    %cst_66 = arith.constant dense<0.000000e+00> : vector<8x256xf32>
    %289 = tpu.matmul %259, %288, %cst_66 {dimension_numbers = #tpu.dot_dimension_numbers<[1], [0], [0], [1], [0, 0, 1, 1], [], []>} : vector<8x72xbf16>, vector<72x256xbf16>, vector<8x256xf32> -> vector<8x256xf32>
    %290 = vector.broadcast %261 : vector<8x1xf32> to vector<8x256xf32>
    %291 = arith.addf %289, %290 : vector<8x256xf32>
    %292 = arith.addf %291, %221 : vector<8x256xf32>
    %cst_67 = arith.constant 0.000000e+00 : f32
    %293 = vector.broadcast %cst_67 : f32 to vector<8x256xf32>
    %294 = arith.maximumf %292, %293 : vector<8x256xf32>
    %c0_68 = arith.constant 0 : index
    %c0_69 = arith.constant 0 : index
    %295 = vector.load %arg8[%c0_68, %c0_69] : memref<2x64xf32, #tpu.memory_space<vmem>>, vector<2x64xf32>
    %c0_70 = arith.constant 0 : index
    %c0_71 = arith.constant 0 : index
    %c0_72 = arith.constant 0 : index
    %296 = vector.load %arg2[%c0_70, %c0_71, %c0_72] : memref<1x16x64xf32, #tpu.memory_space<vmem>>, vector<1x16x64xf32>
    %297 = vector.shape_cast %296 : vector<1x16x64xf32> to vector<16x64xf32>
    %c0_73 = arith.constant 0 : index
    %c0_74 = arith.constant 0 : index
    %c0_75 = arith.constant 0 : index
    %298 = vector.load %arg6[%c0_73, %c0_74, %c0_75] : memref<8x16x144xbf16, #tpu.memory_space<vmem>>, vector<1x16x144xbf16>
    %299 = vector.shape_cast %298 : vector<1x16x144xbf16> to vector<16x144xbf16>
    %c0_76 = arith.constant 0 : index
    %c0_77 = arith.constant 0 : index
    %c0_78 = arith.constant 0 : index
    %300 = vector.load %arg7[%c0_76, %c0_77, %c0_78] : memref<8x16x1xf32, #tpu.memory_space<vmem>>, vector<1x16x1xf32>
    %301 = vector.shape_cast %300 : vector<1x16x1xf32> to vector<16x1xf32>
    %cst_79 = arith.constant 0.000000e+00 : f32
    %302 = vector.broadcast %cst_79 : f32 to vector<16x9xf32>
    %303 = tpu.concatenate %302, %297, %302 in 1 : vector<16x9xf32>, vector<16x64xf32>, vector<16x9xf32> -> vector<16x82xf32>
    %304 = vector.extract_strided_slice %295 {offsets = [0, 0], sizes = [1, 64], strides = [1, 1]} : vector<2x64xf32> to vector<1x64xf32>
    %305 = vector.extract_strided_slice %295 {offsets = [1, 0], sizes = [1, 64], strides = [1, 1]} : vector<2x64xf32> to vector<1x64xf32>
    %306 = vector.extract_strided_slice %303 {offsets = [0, 0], sizes = [16, 64], strides = [1, 1]} : vector<16x82xf32> to vector<16x64xf32>
    %307 = vector.broadcast %304 : vector<1x64xf32> to vector<16x64xf32>
    %308 = arith.mulf %306, %307 : vector<16x64xf32>
    %309 = vector.extract_strided_slice %303 {offsets = [0, 1], sizes = [16, 64], strides = [1, 1]} : vector<16x82xf32> to vector<16x64xf32>
    %310 = vector.extract_strided_slice %303 {offsets = [0, 2], sizes = [16, 64], strides = [1, 1]} : vector<16x82xf32> to vector<16x64xf32>
    %311 = vector.broadcast %305 : vector<1x64xf32> to vector<16x64xf32>
    %312 = arith.mulf %310, %311 : vector<16x64xf32>
    %313 = vector.extract_strided_slice %303 {offsets = [0, 8], sizes = [16, 64], strides = [1, 1]} : vector<16x82xf32> to vector<16x64xf32>
    %314 = vector.broadcast %304 : vector<1x64xf32> to vector<16x64xf32>
    %315 = arith.mulf %313, %314 : vector<16x64xf32>
    %316 = vector.extract_strided_slice %303 {offsets = [0, 9], sizes = [16, 64], strides = [1, 1]} : vector<16x82xf32> to vector<16x64xf32>
    %317 = vector.extract_strided_slice %303 {offsets = [0, 10], sizes = [16, 64], strides = [1, 1]} : vector<16x82xf32> to vector<16x64xf32>
    %318 = vector.broadcast %305 : vector<1x64xf32> to vector<16x64xf32>
    %319 = arith.mulf %317, %318 : vector<16x64xf32>
    %320 = vector.extract_strided_slice %303 {offsets = [0, 16], sizes = [16, 64], strides = [1, 1]} : vector<16x82xf32> to vector<16x64xf32>
    %321 = vector.broadcast %304 : vector<1x64xf32> to vector<16x64xf32>
    %322 = arith.mulf %320, %321 : vector<16x64xf32>
    %323 = vector.extract_strided_slice %303 {offsets = [0, 17], sizes = [16, 64], strides = [1, 1]} : vector<16x82xf32> to vector<16x64xf32>
    %324 = vector.extract_strided_slice %303 {offsets = [0, 18], sizes = [16, 64], strides = [1, 1]} : vector<16x82xf32> to vector<16x64xf32>
    %325 = vector.broadcast %305 : vector<1x64xf32> to vector<16x64xf32>
    %326 = arith.mulf %324, %325 : vector<16x64xf32>
    %327 = tpu.concatenate %308, %309, %312, %315, %316, %319, %322, %323, %326 in 0 : vector<16x64xf32>, vector<16x64xf32>, vector<16x64xf32>, vector<16x64xf32>, vector<16x64xf32>, vector<16x64xf32>, vector<16x64xf32>, vector<16x64xf32>, vector<16x64xf32> -> vector<144x64xf32>
    %328 = arith.truncf %327 : vector<144x64xf32> to vector<144x64xbf16>
    %cst_80 = arith.constant dense<0.000000e+00> : vector<16x64xf32>
    %329 = tpu.matmul %299, %328, %cst_80 {dimension_numbers = #tpu.dot_dimension_numbers<[1], [0], [0], [1], [0, 0, 1, 1], [], []>} : vector<16x144xbf16>, vector<144x64xbf16>, vector<16x64xf32> -> vector<16x64xf32>
    %330 = vector.broadcast %301 : vector<16x1xf32> to vector<16x64xf32>
    %331 = arith.addf %329, %330 : vector<16x64xf32>
    %cst_81 = arith.constant 0.000000e+00 : f32
    %332 = vector.broadcast %cst_81 : f32 to vector<16x64xf32>
    %333 = arith.maximumf %331, %332 : vector<16x64xf32>
    %c1_82 = arith.constant 1 : index
    %c0_83 = arith.constant 0 : index
    %c0_84 = arith.constant 0 : index
    %334 = vector.load %arg6[%c1_82, %c0_83, %c0_84] : memref<8x16x144xbf16, #tpu.memory_space<vmem>>, vector<1x16x144xbf16>
    %335 = vector.shape_cast %334 : vector<1x16x144xbf16> to vector<16x144xbf16>
    %c1_85 = arith.constant 1 : index
    %c0_86 = arith.constant 0 : index
    %c0_87 = arith.constant 0 : index
    %336 = vector.load %arg7[%c1_85, %c0_86, %c0_87] : memref<8x16x1xf32, #tpu.memory_space<vmem>>, vector<1x16x1xf32>
    %337 = vector.shape_cast %336 : vector<1x16x1xf32> to vector<16x1xf32>
    %cst_88 = arith.constant 0.000000e+00 : f32
    %338 = vector.broadcast %cst_88 : f32 to vector<16x9xf32>
    %339 = tpu.concatenate %338, %333, %338 in 1 : vector<16x9xf32>, vector<16x64xf32>, vector<16x9xf32> -> vector<16x82xf32>
    %340 = vector.extract_strided_slice %295 {offsets = [0, 0], sizes = [1, 64], strides = [1, 1]} : vector<2x64xf32> to vector<1x64xf32>
    %341 = vector.extract_strided_slice %295 {offsets = [1, 0], sizes = [1, 64], strides = [1, 1]} : vector<2x64xf32> to vector<1x64xf32>
    %342 = vector.extract_strided_slice %339 {offsets = [0, 0], sizes = [16, 64], strides = [1, 1]} : vector<16x82xf32> to vector<16x64xf32>
    %343 = vector.broadcast %340 : vector<1x64xf32> to vector<16x64xf32>
    %344 = arith.mulf %342, %343 : vector<16x64xf32>
    %345 = vector.extract_strided_slice %339 {offsets = [0, 1], sizes = [16, 64], strides = [1, 1]} : vector<16x82xf32> to vector<16x64xf32>
    %346 = vector.extract_strided_slice %339 {offsets = [0, 2], sizes = [16, 64], strides = [1, 1]} : vector<16x82xf32> to vector<16x64xf32>
    %347 = vector.broadcast %341 : vector<1x64xf32> to vector<16x64xf32>
    %348 = arith.mulf %346, %347 : vector<16x64xf32>
    %349 = vector.extract_strided_slice %339 {offsets = [0, 8], sizes = [16, 64], strides = [1, 1]} : vector<16x82xf32> to vector<16x64xf32>
    %350 = vector.broadcast %340 : vector<1x64xf32> to vector<16x64xf32>
    %351 = arith.mulf %349, %350 : vector<16x64xf32>
    %352 = vector.extract_strided_slice %339 {offsets = [0, 9], sizes = [16, 64], strides = [1, 1]} : vector<16x82xf32> to vector<16x64xf32>
    %353 = vector.extract_strided_slice %339 {offsets = [0, 10], sizes = [16, 64], strides = [1, 1]} : vector<16x82xf32> to vector<16x64xf32>
    %354 = vector.broadcast %341 : vector<1x64xf32> to vector<16x64xf32>
    %355 = arith.mulf %353, %354 : vector<16x64xf32>
    %356 = vector.extract_strided_slice %339 {offsets = [0, 16], sizes = [16, 64], strides = [1, 1]} : vector<16x82xf32> to vector<16x64xf32>
    %357 = vector.broadcast %340 : vector<1x64xf32> to vector<16x64xf32>
    %358 = arith.mulf %356, %357 : vector<16x64xf32>
    %359 = vector.extract_strided_slice %339 {offsets = [0, 17], sizes = [16, 64], strides = [1, 1]} : vector<16x82xf32> to vector<16x64xf32>
    %360 = vector.extract_strided_slice %339 {offsets = [0, 18], sizes = [16, 64], strides = [1, 1]} : vector<16x82xf32> to vector<16x64xf32>
    %361 = vector.broadcast %341 : vector<1x64xf32> to vector<16x64xf32>
    %362 = arith.mulf %360, %361 : vector<16x64xf32>
    %363 = tpu.concatenate %344, %345, %348, %351, %352, %355, %358, %359, %362 in 0 : vector<16x64xf32>, vector<16x64xf32>, vector<16x64xf32>, vector<16x64xf32>, vector<16x64xf32>, vector<16x64xf32>, vector<16x64xf32>, vector<16x64xf32>, vector<16x64xf32> -> vector<144x64xf32>
    %364 = arith.truncf %363 : vector<144x64xf32> to vector<144x64xbf16>
    %cst_89 = arith.constant dense<0.000000e+00> : vector<16x64xf32>
    %365 = tpu.matmul %335, %364, %cst_89 {dimension_numbers = #tpu.dot_dimension_numbers<[1], [0], [0], [1], [0, 0, 1, 1], [], []>} : vector<16x144xbf16>, vector<144x64xbf16>, vector<16x64xf32> -> vector<16x64xf32>
    %366 = vector.broadcast %337 : vector<16x1xf32> to vector<16x64xf32>
    %367 = arith.addf %365, %366 : vector<16x64xf32>
    %368 = arith.addf %367, %297 : vector<16x64xf32>
    %cst_90 = arith.constant 0.000000e+00 : f32
    %369 = vector.broadcast %cst_90 : f32 to vector<16x64xf32>
    %370 = arith.maximumf %368, %369 : vector<16x64xf32>
    %c2_91 = arith.constant 2 : index
    %c0_92 = arith.constant 0 : index
    %c0_93 = arith.constant 0 : index
    %371 = vector.load %arg6[%c2_91, %c0_92, %c0_93] : memref<8x16x144xbf16, #tpu.memory_space<vmem>>, vector<1x16x144xbf16>
    %372 = vector.shape_cast %371 : vector<1x16x144xbf16> to vector<16x144xbf16>
    %c2_94 = arith.constant 2 : index
    %c0_95 = arith.constant 0 : index
    %c0_96 = arith.constant 0 : index
    %373 = vector.load %arg7[%c2_94, %c0_95, %c0_96] : memref<8x16x1xf32, #tpu.memory_space<vmem>>, vector<1x16x1xf32>
    %374 = vector.shape_cast %373 : vector<1x16x1xf32> to vector<16x1xf32>
    %cst_97 = arith.constant 0.000000e+00 : f32
    %375 = vector.broadcast %cst_97 : f32 to vector<16x9xf32>
    %376 = tpu.concatenate %375, %370, %375 in 1 : vector<16x9xf32>, vector<16x64xf32>, vector<16x9xf32> -> vector<16x82xf32>
    %377 = vector.extract_strided_slice %295 {offsets = [0, 0], sizes = [1, 64], strides = [1, 1]} : vector<2x64xf32> to vector<1x64xf32>
    %378 = vector.extract_strided_slice %295 {offsets = [1, 0], sizes = [1, 64], strides = [1, 1]} : vector<2x64xf32> to vector<1x64xf32>
    %379 = vector.extract_strided_slice %376 {offsets = [0, 0], sizes = [16, 64], strides = [1, 1]} : vector<16x82xf32> to vector<16x64xf32>
    %380 = vector.broadcast %377 : vector<1x64xf32> to vector<16x64xf32>
    %381 = arith.mulf %379, %380 : vector<16x64xf32>
    %382 = vector.extract_strided_slice %376 {offsets = [0, 1], sizes = [16, 64], strides = [1, 1]} : vector<16x82xf32> to vector<16x64xf32>
    %383 = vector.extract_strided_slice %376 {offsets = [0, 2], sizes = [16, 64], strides = [1, 1]} : vector<16x82xf32> to vector<16x64xf32>
    %384 = vector.broadcast %378 : vector<1x64xf32> to vector<16x64xf32>
    %385 = arith.mulf %383, %384 : vector<16x64xf32>
    %386 = vector.extract_strided_slice %376 {offsets = [0, 8], sizes = [16, 64], strides = [1, 1]} : vector<16x82xf32> to vector<16x64xf32>
    %387 = vector.broadcast %377 : vector<1x64xf32> to vector<16x64xf32>
    %388 = arith.mulf %386, %387 : vector<16x64xf32>
    %389 = vector.extract_strided_slice %376 {offsets = [0, 9], sizes = [16, 64], strides = [1, 1]} : vector<16x82xf32> to vector<16x64xf32>
    %390 = vector.extract_strided_slice %376 {offsets = [0, 10], sizes = [16, 64], strides = [1, 1]} : vector<16x82xf32> to vector<16x64xf32>
    %391 = vector.broadcast %378 : vector<1x64xf32> to vector<16x64xf32>
    %392 = arith.mulf %390, %391 : vector<16x64xf32>
    %393 = vector.extract_strided_slice %376 {offsets = [0, 16], sizes = [16, 64], strides = [1, 1]} : vector<16x82xf32> to vector<16x64xf32>
    %394 = vector.broadcast %377 : vector<1x64xf32> to vector<16x64xf32>
    %395 = arith.mulf %393, %394 : vector<16x64xf32>
    %396 = vector.extract_strided_slice %376 {offsets = [0, 17], sizes = [16, 64], strides = [1, 1]} : vector<16x82xf32> to vector<16x64xf32>
    %397 = vector.extract_strided_slice %376 {offsets = [0, 18], sizes = [16, 64], strides = [1, 1]} : vector<16x82xf32> to vector<16x64xf32>
    %398 = vector.broadcast %378 : vector<1x64xf32> to vector<16x64xf32>
    %399 = arith.mulf %397, %398 : vector<16x64xf32>
    %400 = tpu.concatenate %381, %382, %385, %388, %389, %392, %395, %396, %399 in 0 : vector<16x64xf32>, vector<16x64xf32>, vector<16x64xf32>, vector<16x64xf32>, vector<16x64xf32>, vector<16x64xf32>, vector<16x64xf32>, vector<16x64xf32>, vector<16x64xf32> -> vector<144x64xf32>
    %401 = arith.truncf %400 : vector<144x64xf32> to vector<144x64xbf16>
    %cst_98 = arith.constant dense<0.000000e+00> : vector<16x64xf32>
    %402 = tpu.matmul %372, %401, %cst_98 {dimension_numbers = #tpu.dot_dimension_numbers<[1], [0], [0], [1], [0, 0, 1, 1], [], []>} : vector<16x144xbf16>, vector<144x64xbf16>, vector<16x64xf32> -> vector<16x64xf32>
    %403 = vector.broadcast %374 : vector<16x1xf32> to vector<16x64xf32>
    %404 = arith.addf %402, %403 : vector<16x64xf32>
    %cst_99 = arith.constant 0.000000e+00 : f32
    %405 = vector.broadcast %cst_99 : f32 to vector<16x64xf32>
    %406 = arith.maximumf %404, %405 : vector<16x64xf32>
    %c3_100 = arith.constant 3 : index
    %c0_101 = arith.constant 0 : index
    %c0_102 = arith.constant 0 : index
    %407 = vector.load %arg6[%c3_100, %c0_101, %c0_102] : memref<8x16x144xbf16, #tpu.memory_space<vmem>>, vector<1x16x144xbf16>
    %408 = vector.shape_cast %407 : vector<1x16x144xbf16> to vector<16x144xbf16>
    %c3_103 = arith.constant 3 : index
    %c0_104 = arith.constant 0 : index
    %c0_105 = arith.constant 0 : index
    %409 = vector.load %arg7[%c3_103, %c0_104, %c0_105] : memref<8x16x1xf32, #tpu.memory_space<vmem>>, vector<1x16x1xf32>
    %410 = vector.shape_cast %409 : vector<1x16x1xf32> to vector<16x1xf32>
    %cst_106 = arith.constant 0.000000e+00 : f32
    %411 = vector.broadcast %cst_106 : f32 to vector<16x9xf32>
    %412 = tpu.concatenate %411, %406, %411 in 1 : vector<16x9xf32>, vector<16x64xf32>, vector<16x9xf32> -> vector<16x82xf32>
    %413 = vector.extract_strided_slice %295 {offsets = [0, 0], sizes = [1, 64], strides = [1, 1]} : vector<2x64xf32> to vector<1x64xf32>
    %414 = vector.extract_strided_slice %295 {offsets = [1, 0], sizes = [1, 64], strides = [1, 1]} : vector<2x64xf32> to vector<1x64xf32>
    %415 = vector.extract_strided_slice %412 {offsets = [0, 0], sizes = [16, 64], strides = [1, 1]} : vector<16x82xf32> to vector<16x64xf32>
    %416 = vector.broadcast %413 : vector<1x64xf32> to vector<16x64xf32>
    %417 = arith.mulf %415, %416 : vector<16x64xf32>
    %418 = vector.extract_strided_slice %412 {offsets = [0, 1], sizes = [16, 64], strides = [1, 1]} : vector<16x82xf32> to vector<16x64xf32>
    %419 = vector.extract_strided_slice %412 {offsets = [0, 2], sizes = [16, 64], strides = [1, 1]} : vector<16x82xf32> to vector<16x64xf32>
    %420 = vector.broadcast %414 : vector<1x64xf32> to vector<16x64xf32>
    %421 = arith.mulf %419, %420 : vector<16x64xf32>
    %422 = vector.extract_strided_slice %412 {offsets = [0, 8], sizes = [16, 64], strides = [1, 1]} : vector<16x82xf32> to vector<16x64xf32>
    %423 = vector.broadcast %413 : vector<1x64xf32> to vector<16x64xf32>
    %424 = arith.mulf %422, %423 : vector<16x64xf32>
    %425 = vector.extract_strided_slice %412 {offsets = [0, 9], sizes = [16, 64], strides = [1, 1]} : vector<16x82xf32> to vector<16x64xf32>
    %426 = vector.extract_strided_slice %412 {offsets = [0, 10], sizes = [16, 64], strides = [1, 1]} : vector<16x82xf32> to vector<16x64xf32>
    %427 = vector.broadcast %414 : vector<1x64xf32> to vector<16x64xf32>
    %428 = arith.mulf %426, %427 : vector<16x64xf32>
    %429 = vector.extract_strided_slice %412 {offsets = [0, 16], sizes = [16, 64], strides = [1, 1]} : vector<16x82xf32> to vector<16x64xf32>
    %430 = vector.broadcast %413 : vector<1x64xf32> to vector<16x64xf32>
    %431 = arith.mulf %429, %430 : vector<16x64xf32>
    %432 = vector.extract_strided_slice %412 {offsets = [0, 17], sizes = [16, 64], strides = [1, 1]} : vector<16x82xf32> to vector<16x64xf32>
    %433 = vector.extract_strided_slice %412 {offsets = [0, 18], sizes = [16, 64], strides = [1, 1]} : vector<16x82xf32> to vector<16x64xf32>
    %434 = vector.broadcast %414 : vector<1x64xf32> to vector<16x64xf32>
    %435 = arith.mulf %433, %434 : vector<16x64xf32>
    %436 = tpu.concatenate %417, %418, %421, %424, %425, %428, %431, %432, %435 in 0 : vector<16x64xf32>, vector<16x64xf32>, vector<16x64xf32>, vector<16x64xf32>, vector<16x64xf32>, vector<16x64xf32>, vector<16x64xf32>, vector<16x64xf32>, vector<16x64xf32> -> vector<144x64xf32>
    %437 = arith.truncf %436 : vector<144x64xf32> to vector<144x64xbf16>
    %cst_107 = arith.constant dense<0.000000e+00> : vector<16x64xf32>
    %438 = tpu.matmul %408, %437, %cst_107 {dimension_numbers = #tpu.dot_dimension_numbers<[1], [0], [0], [1], [0, 0, 1, 1], [], []>} : vector<16x144xbf16>, vector<144x64xbf16>, vector<16x64xf32> -> vector<16x64xf32>
    %439 = vector.broadcast %410 : vector<16x1xf32> to vector<16x64xf32>
    %440 = arith.addf %438, %439 : vector<16x64xf32>
    %441 = arith.addf %440, %370 : vector<16x64xf32>
    %cst_108 = arith.constant 0.000000e+00 : f32
    %442 = vector.broadcast %cst_108 : f32 to vector<16x64xf32>
    %443 = arith.maximumf %441, %442 : vector<16x64xf32>
    %c4_109 = arith.constant 4 : index
    %c0_110 = arith.constant 0 : index
    %c0_111 = arith.constant 0 : index
    %444 = vector.load %arg6[%c4_109, %c0_110, %c0_111] : memref<8x16x144xbf16, #tpu.memory_space<vmem>>, vector<1x16x144xbf16>
    %445 = vector.shape_cast %444 : vector<1x16x144xbf16> to vector<16x144xbf16>
    %c4_112 = arith.constant 4 : index
    %c0_113 = arith.constant 0 : index
    %c0_114 = arith.constant 0 : index
    %446 = vector.load %arg7[%c4_112, %c0_113, %c0_114] : memref<8x16x1xf32, #tpu.memory_space<vmem>>, vector<1x16x1xf32>
    %447 = vector.shape_cast %446 : vector<1x16x1xf32> to vector<16x1xf32>
    %cst_115 = arith.constant 0.000000e+00 : f32
    %448 = vector.broadcast %cst_115 : f32 to vector<16x9xf32>
    %449 = tpu.concatenate %448, %443, %448 in 1 : vector<16x9xf32>, vector<16x64xf32>, vector<16x9xf32> -> vector<16x82xf32>
    %450 = vector.extract_strided_slice %295 {offsets = [0, 0], sizes = [1, 64], strides = [1, 1]} : vector<2x64xf32> to vector<1x64xf32>
    %451 = vector.extract_strided_slice %295 {offsets = [1, 0], sizes = [1, 64], strides = [1, 1]} : vector<2x64xf32> to vector<1x64xf32>
    %452 = vector.extract_strided_slice %449 {offsets = [0, 0], sizes = [16, 64], strides = [1, 1]} : vector<16x82xf32> to vector<16x64xf32>
    %453 = vector.broadcast %450 : vector<1x64xf32> to vector<16x64xf32>
    %454 = arith.mulf %452, %453 : vector<16x64xf32>
    %455 = vector.extract_strided_slice %449 {offsets = [0, 1], sizes = [16, 64], strides = [1, 1]} : vector<16x82xf32> to vector<16x64xf32>
    %456 = vector.extract_strided_slice %449 {offsets = [0, 2], sizes = [16, 64], strides = [1, 1]} : vector<16x82xf32> to vector<16x64xf32>
    %457 = vector.broadcast %451 : vector<1x64xf32> to vector<16x64xf32>
    %458 = arith.mulf %456, %457 : vector<16x64xf32>
    %459 = vector.extract_strided_slice %449 {offsets = [0, 8], sizes = [16, 64], strides = [1, 1]} : vector<16x82xf32> to vector<16x64xf32>
    %460 = vector.broadcast %450 : vector<1x64xf32> to vector<16x64xf32>
    %461 = arith.mulf %459, %460 : vector<16x64xf32>
    %462 = vector.extract_strided_slice %449 {offsets = [0, 9], sizes = [16, 64], strides = [1, 1]} : vector<16x82xf32> to vector<16x64xf32>
    %463 = vector.extract_strided_slice %449 {offsets = [0, 10], sizes = [16, 64], strides = [1, 1]} : vector<16x82xf32> to vector<16x64xf32>
    %464 = vector.broadcast %451 : vector<1x64xf32> to vector<16x64xf32>
    %465 = arith.mulf %463, %464 : vector<16x64xf32>
    %466 = vector.extract_strided_slice %449 {offsets = [0, 16], sizes = [16, 64], strides = [1, 1]} : vector<16x82xf32> to vector<16x64xf32>
    %467 = vector.broadcast %450 : vector<1x64xf32> to vector<16x64xf32>
    %468 = arith.mulf %466, %467 : vector<16x64xf32>
    %469 = vector.extract_strided_slice %449 {offsets = [0, 17], sizes = [16, 64], strides = [1, 1]} : vector<16x82xf32> to vector<16x64xf32>
    %470 = vector.extract_strided_slice %449 {offsets = [0, 18], sizes = [16, 64], strides = [1, 1]} : vector<16x82xf32> to vector<16x64xf32>
    %471 = vector.broadcast %451 : vector<1x64xf32> to vector<16x64xf32>
    %472 = arith.mulf %470, %471 : vector<16x64xf32>
    %473 = tpu.concatenate %454, %455, %458, %461, %462, %465, %468, %469, %472 in 0 : vector<16x64xf32>, vector<16x64xf32>, vector<16x64xf32>, vector<16x64xf32>, vector<16x64xf32>, vector<16x64xf32>, vector<16x64xf32>, vector<16x64xf32>, vector<16x64xf32> -> vector<144x64xf32>
    %474 = arith.truncf %473 : vector<144x64xf32> to vector<144x64xbf16>
    %cst_116 = arith.constant dense<0.000000e+00> : vector<16x64xf32>
    %475 = tpu.matmul %445, %474, %cst_116 {dimension_numbers = #tpu.dot_dimension_numbers<[1], [0], [0], [1], [0, 0, 1, 1], [], []>} : vector<16x144xbf16>, vector<144x64xbf16>, vector<16x64xf32> -> vector<16x64xf32>
    %476 = vector.broadcast %447 : vector<16x1xf32> to vector<16x64xf32>
    %477 = arith.addf %475, %476 : vector<16x64xf32>
    %cst_117 = arith.constant 0.000000e+00 : f32
    %478 = vector.broadcast %cst_117 : f32 to vector<16x64xf32>
    %479 = arith.maximumf %477, %478 : vector<16x64xf32>
    %c5_118 = arith.constant 5 : index
    %c0_119 = arith.constant 0 : index
    %c0_120 = arith.constant 0 : index
    %480 = vector.load %arg6[%c5_118, %c0_119, %c0_120] : memref<8x16x144xbf16, #tpu.memory_space<vmem>>, vector<1x16x144xbf16>
    %481 = vector.shape_cast %480 : vector<1x16x144xbf16> to vector<16x144xbf16>
    %c5_121 = arith.constant 5 : index
    %c0_122 = arith.constant 0 : index
    %c0_123 = arith.constant 0 : index
    %482 = vector.load %arg7[%c5_121, %c0_122, %c0_123] : memref<8x16x1xf32, #tpu.memory_space<vmem>>, vector<1x16x1xf32>
    %483 = vector.shape_cast %482 : vector<1x16x1xf32> to vector<16x1xf32>
    %cst_124 = arith.constant 0.000000e+00 : f32
    %484 = vector.broadcast %cst_124 : f32 to vector<16x9xf32>
    %485 = tpu.concatenate %484, %479, %484 in 1 : vector<16x9xf32>, vector<16x64xf32>, vector<16x9xf32> -> vector<16x82xf32>
    %486 = vector.extract_strided_slice %295 {offsets = [0, 0], sizes = [1, 64], strides = [1, 1]} : vector<2x64xf32> to vector<1x64xf32>
    %487 = vector.extract_strided_slice %295 {offsets = [1, 0], sizes = [1, 64], strides = [1, 1]} : vector<2x64xf32> to vector<1x64xf32>
    %488 = vector.extract_strided_slice %485 {offsets = [0, 0], sizes = [16, 64], strides = [1, 1]} : vector<16x82xf32> to vector<16x64xf32>
    %489 = vector.broadcast %486 : vector<1x64xf32> to vector<16x64xf32>
    %490 = arith.mulf %488, %489 : vector<16x64xf32>
    %491 = vector.extract_strided_slice %485 {offsets = [0, 1], sizes = [16, 64], strides = [1, 1]} : vector<16x82xf32> to vector<16x64xf32>
    %492 = vector.extract_strided_slice %485 {offsets = [0, 2], sizes = [16, 64], strides = [1, 1]} : vector<16x82xf32> to vector<16x64xf32>
    %493 = vector.broadcast %487 : vector<1x64xf32> to vector<16x64xf32>
    %494 = arith.mulf %492, %493 : vector<16x64xf32>
    %495 = vector.extract_strided_slice %485 {offsets = [0, 8], sizes = [16, 64], strides = [1, 1]} : vector<16x82xf32> to vector<16x64xf32>
    %496 = vector.broadcast %486 : vector<1x64xf32> to vector<16x64xf32>
    %497 = arith.mulf %495, %496 : vector<16x64xf32>
    %498 = vector.extract_strided_slice %485 {offsets = [0, 9], sizes = [16, 64], strides = [1, 1]} : vector<16x82xf32> to vector<16x64xf32>
    %499 = vector.extract_strided_slice %485 {offsets = [0, 10], sizes = [16, 64], strides = [1, 1]} : vector<16x82xf32> to vector<16x64xf32>
    %500 = vector.broadcast %487 : vector<1x64xf32> to vector<16x64xf32>
    %501 = arith.mulf %499, %500 : vector<16x64xf32>
    %502 = vector.extract_strided_slice %485 {offsets = [0, 16], sizes = [16, 64], strides = [1, 1]} : vector<16x82xf32> to vector<16x64xf32>
    %503 = vector.broadcast %486 : vector<1x64xf32> to vector<16x64xf32>
    %504 = arith.mulf %502, %503 : vector<16x64xf32>
    %505 = vector.extract_strided_slice %485 {offsets = [0, 17], sizes = [16, 64], strides = [1, 1]} : vector<16x82xf32> to vector<16x64xf32>
    %506 = vector.extract_strided_slice %485 {offsets = [0, 18], sizes = [16, 64], strides = [1, 1]} : vector<16x82xf32> to vector<16x64xf32>
    %507 = vector.broadcast %487 : vector<1x64xf32> to vector<16x64xf32>
    %508 = arith.mulf %506, %507 : vector<16x64xf32>
    %509 = tpu.concatenate %490, %491, %494, %497, %498, %501, %504, %505, %508 in 0 : vector<16x64xf32>, vector<16x64xf32>, vector<16x64xf32>, vector<16x64xf32>, vector<16x64xf32>, vector<16x64xf32>, vector<16x64xf32>, vector<16x64xf32>, vector<16x64xf32> -> vector<144x64xf32>
    %510 = arith.truncf %509 : vector<144x64xf32> to vector<144x64xbf16>
    %cst_125 = arith.constant dense<0.000000e+00> : vector<16x64xf32>
    %511 = tpu.matmul %481, %510, %cst_125 {dimension_numbers = #tpu.dot_dimension_numbers<[1], [0], [0], [1], [0, 0, 1, 1], [], []>} : vector<16x144xbf16>, vector<144x64xbf16>, vector<16x64xf32> -> vector<16x64xf32>
    %512 = vector.broadcast %483 : vector<16x1xf32> to vector<16x64xf32>
    %513 = arith.addf %511, %512 : vector<16x64xf32>
    %514 = arith.addf %513, %443 : vector<16x64xf32>
    %cst_126 = arith.constant 0.000000e+00 : f32
    %515 = vector.broadcast %cst_126 : f32 to vector<16x64xf32>
    %516 = arith.maximumf %514, %515 : vector<16x64xf32>
    %c6_127 = arith.constant 6 : index
    %c0_128 = arith.constant 0 : index
    %c0_129 = arith.constant 0 : index
    %517 = vector.load %arg6[%c6_127, %c0_128, %c0_129] : memref<8x16x144xbf16, #tpu.memory_space<vmem>>, vector<1x16x144xbf16>
    %518 = vector.shape_cast %517 : vector<1x16x144xbf16> to vector<16x144xbf16>
    %c6_130 = arith.constant 6 : index
    %c0_131 = arith.constant 0 : index
    %c0_132 = arith.constant 0 : index
    %519 = vector.load %arg7[%c6_130, %c0_131, %c0_132] : memref<8x16x1xf32, #tpu.memory_space<vmem>>, vector<1x16x1xf32>
    %520 = vector.shape_cast %519 : vector<1x16x1xf32> to vector<16x1xf32>
    %cst_133 = arith.constant 0.000000e+00 : f32
    %521 = vector.broadcast %cst_133 : f32 to vector<16x9xf32>
    %522 = tpu.concatenate %521, %516, %521 in 1 : vector<16x9xf32>, vector<16x64xf32>, vector<16x9xf32> -> vector<16x82xf32>
    %523 = vector.extract_strided_slice %295 {offsets = [0, 0], sizes = [1, 64], strides = [1, 1]} : vector<2x64xf32> to vector<1x64xf32>
    %524 = vector.extract_strided_slice %295 {offsets = [1, 0], sizes = [1, 64], strides = [1, 1]} : vector<2x64xf32> to vector<1x64xf32>
    %525 = vector.extract_strided_slice %522 {offsets = [0, 0], sizes = [16, 64], strides = [1, 1]} : vector<16x82xf32> to vector<16x64xf32>
    %526 = vector.broadcast %523 : vector<1x64xf32> to vector<16x64xf32>
    %527 = arith.mulf %525, %526 : vector<16x64xf32>
    %528 = vector.extract_strided_slice %522 {offsets = [0, 1], sizes = [16, 64], strides = [1, 1]} : vector<16x82xf32> to vector<16x64xf32>
    %529 = vector.extract_strided_slice %522 {offsets = [0, 2], sizes = [16, 64], strides = [1, 1]} : vector<16x82xf32> to vector<16x64xf32>
    %530 = vector.broadcast %524 : vector<1x64xf32> to vector<16x64xf32>
    %531 = arith.mulf %529, %530 : vector<16x64xf32>
    %532 = vector.extract_strided_slice %522 {offsets = [0, 8], sizes = [16, 64], strides = [1, 1]} : vector<16x82xf32> to vector<16x64xf32>
    %533 = vector.broadcast %523 : vector<1x64xf32> to vector<16x64xf32>
    %534 = arith.mulf %532, %533 : vector<16x64xf32>
    %535 = vector.extract_strided_slice %522 {offsets = [0, 9], sizes = [16, 64], strides = [1, 1]} : vector<16x82xf32> to vector<16x64xf32>
    %536 = vector.extract_strided_slice %522 {offsets = [0, 10], sizes = [16, 64], strides = [1, 1]} : vector<16x82xf32> to vector<16x64xf32>
    %537 = vector.broadcast %524 : vector<1x64xf32> to vector<16x64xf32>
    %538 = arith.mulf %536, %537 : vector<16x64xf32>
    %539 = vector.extract_strided_slice %522 {offsets = [0, 16], sizes = [16, 64], strides = [1, 1]} : vector<16x82xf32> to vector<16x64xf32>
    %540 = vector.broadcast %523 : vector<1x64xf32> to vector<16x64xf32>
    %541 = arith.mulf %539, %540 : vector<16x64xf32>
    %542 = vector.extract_strided_slice %522 {offsets = [0, 17], sizes = [16, 64], strides = [1, 1]} : vector<16x82xf32> to vector<16x64xf32>
    %543 = vector.extract_strided_slice %522 {offsets = [0, 18], sizes = [16, 64], strides = [1, 1]} : vector<16x82xf32> to vector<16x64xf32>
    %544 = vector.broadcast %524 : vector<1x64xf32> to vector<16x64xf32>
    %545 = arith.mulf %543, %544 : vector<16x64xf32>
    %546 = tpu.concatenate %527, %528, %531, %534, %535, %538, %541, %542, %545 in 0 : vector<16x64xf32>, vector<16x64xf32>, vector<16x64xf32>, vector<16x64xf32>, vector<16x64xf32>, vector<16x64xf32>, vector<16x64xf32>, vector<16x64xf32>, vector<16x64xf32> -> vector<144x64xf32>
    %547 = arith.truncf %546 : vector<144x64xf32> to vector<144x64xbf16>
    %cst_134 = arith.constant dense<0.000000e+00> : vector<16x64xf32>
    %548 = tpu.matmul %518, %547, %cst_134 {dimension_numbers = #tpu.dot_dimension_numbers<[1], [0], [0], [1], [0, 0, 1, 1], [], []>} : vector<16x144xbf16>, vector<144x64xbf16>, vector<16x64xf32> -> vector<16x64xf32>
    %549 = vector.broadcast %520 : vector<16x1xf32> to vector<16x64xf32>
    %550 = arith.addf %548, %549 : vector<16x64xf32>
    %cst_135 = arith.constant 0.000000e+00 : f32
    %551 = vector.broadcast %cst_135 : f32 to vector<16x64xf32>
    %552 = arith.maximumf %550, %551 : vector<16x64xf32>
    %c7_136 = arith.constant 7 : index
    %c0_137 = arith.constant 0 : index
    %c0_138 = arith.constant 0 : index
    %553 = vector.load %arg6[%c7_136, %c0_137, %c0_138] : memref<8x16x144xbf16, #tpu.memory_space<vmem>>, vector<1x16x144xbf16>
    %554 = vector.shape_cast %553 : vector<1x16x144xbf16> to vector<16x144xbf16>
    %c7_139 = arith.constant 7 : index
    %c0_140 = arith.constant 0 : index
    %c0_141 = arith.constant 0 : index
    %555 = vector.load %arg7[%c7_139, %c0_140, %c0_141] : memref<8x16x1xf32, #tpu.memory_space<vmem>>, vector<1x16x1xf32>
    %556 = vector.shape_cast %555 : vector<1x16x1xf32> to vector<16x1xf32>
    %cst_142 = arith.constant 0.000000e+00 : f32
    %557 = vector.broadcast %cst_142 : f32 to vector<16x9xf32>
    %558 = tpu.concatenate %557, %552, %557 in 1 : vector<16x9xf32>, vector<16x64xf32>, vector<16x9xf32> -> vector<16x82xf32>
    %559 = vector.extract_strided_slice %295 {offsets = [0, 0], sizes = [1, 64], strides = [1, 1]} : vector<2x64xf32> to vector<1x64xf32>
    %560 = vector.extract_strided_slice %295 {offsets = [1, 0], sizes = [1, 64], strides = [1, 1]} : vector<2x64xf32> to vector<1x64xf32>
    %561 = vector.extract_strided_slice %558 {offsets = [0, 0], sizes = [16, 64], strides = [1, 1]} : vector<16x82xf32> to vector<16x64xf32>
    %562 = vector.broadcast %559 : vector<1x64xf32> to vector<16x64xf32>
    %563 = arith.mulf %561, %562 : vector<16x64xf32>
    %564 = vector.extract_strided_slice %558 {offsets = [0, 1], sizes = [16, 64], strides = [1, 1]} : vector<16x82xf32> to vector<16x64xf32>
    %565 = vector.extract_strided_slice %558 {offsets = [0, 2], sizes = [16, 64], strides = [1, 1]} : vector<16x82xf32> to vector<16x64xf32>
    %566 = vector.broadcast %560 : vector<1x64xf32> to vector<16x64xf32>
    %567 = arith.mulf %565, %566 : vector<16x64xf32>
    %568 = vector.extract_strided_slice %558 {offsets = [0, 8], sizes = [16, 64], strides = [1, 1]} : vector<16x82xf32> to vector<16x64xf32>
    %569 = vector.broadcast %559 : vector<1x64xf32> to vector<16x64xf32>
    %570 = arith.mulf %568, %569 : vector<16x64xf32>
    %571 = vector.extract_strided_slice %558 {offsets = [0, 9], sizes = [16, 64], strides = [1, 1]} : vector<16x82xf32> to vector<16x64xf32>
    %572 = vector.extract_strided_slice %558 {offsets = [0, 10], sizes = [16, 64], strides = [1, 1]} : vector<16x82xf32> to vector<16x64xf32>
    %573 = vector.broadcast %560 : vector<1x64xf32> to vector<16x64xf32>
    %574 = arith.mulf %572, %573 : vector<16x64xf32>
    %575 = vector.extract_strided_slice %558 {offsets = [0, 16], sizes = [16, 64], strides = [1, 1]} : vector<16x82xf32> to vector<16x64xf32>
    %576 = vector.broadcast %559 : vector<1x64xf32> to vector<16x64xf32>
    %577 = arith.mulf %575, %576 : vector<16x64xf32>
    %578 = vector.extract_strided_slice %558 {offsets = [0, 17], sizes = [16, 64], strides = [1, 1]} : vector<16x82xf32> to vector<16x64xf32>
    %579 = vector.extract_strided_slice %558 {offsets = [0, 18], sizes = [16, 64], strides = [1, 1]} : vector<16x82xf32> to vector<16x64xf32>
    %580 = vector.broadcast %560 : vector<1x64xf32> to vector<16x64xf32>
    %581 = arith.mulf %579, %580 : vector<16x64xf32>
    %582 = tpu.concatenate %563, %564, %567, %570, %571, %574, %577, %578, %581 in 0 : vector<16x64xf32>, vector<16x64xf32>, vector<16x64xf32>, vector<16x64xf32>, vector<16x64xf32>, vector<16x64xf32>, vector<16x64xf32>, vector<16x64xf32>, vector<16x64xf32> -> vector<144x64xf32>
    %583 = arith.truncf %582 : vector<144x64xf32> to vector<144x64xbf16>
    %cst_143 = arith.constant dense<0.000000e+00> : vector<16x64xf32>
    %584 = tpu.matmul %554, %583, %cst_143 {dimension_numbers = #tpu.dot_dimension_numbers<[1], [0], [0], [1], [0, 0, 1, 1], [], []>} : vector<16x144xbf16>, vector<144x64xbf16>, vector<16x64xf32> -> vector<16x64xf32>
    %585 = vector.broadcast %556 : vector<16x1xf32> to vector<16x64xf32>
    %586 = arith.addf %584, %585 : vector<16x64xf32>
    %587 = arith.addf %586, %516 : vector<16x64xf32>
    %cst_144 = arith.constant 0.000000e+00 : f32
    %588 = vector.broadcast %cst_144 : f32 to vector<16x64xf32>
    %589 = arith.maximumf %587, %588 : vector<16x64xf32>
    %c0_145 = arith.constant 0 : index
    %c0_146 = arith.constant 0 : index
    %590 = vector.load %arg9[%c0_145, %c0_146] : memref<8x16xbf16, #tpu.memory_space<vmem>>, vector<8x16xbf16>
    %591 = arith.truncf %589 : vector<16x64xf32> to vector<16x64xbf16>
    %cst_147 = arith.constant dense<0.000000e+00> : vector<8x64xf32>
    %592 = tpu.matmul %590, %591, %cst_147 {dimension_numbers = #tpu.dot_dimension_numbers<[1], [0], [0], [1], [0, 0, 1, 1], [], []>} : vector<8x16xbf16>, vector<16x64xbf16>, vector<8x64xf32> -> vector<8x64xf32>
    %c0_148 = arith.constant 0 : index
    %c0_149 = arith.constant 0 : index
    %593 = vector.load %arg10[%c0_148, %c0_149] : memref<8x1xf32, #tpu.memory_space<vmem>>, vector<8x1xf32>
    %594 = vector.broadcast %593 : vector<8x1xf32> to vector<8x64xf32>
    %595 = arith.addf %592, %594 : vector<8x64xf32>
    %c0_150 = arith.constant 0 : index
    %c0_151 = arith.constant 0 : index
    %596 = vector.load %arg11[%c0_150, %c0_151] : memref<64x256xf32, #tpu.memory_space<vmem>>, vector<64x256xf32>
    %cst_152 = arith.constant dense<0.000000e+00> : vector<8x256xf32>
    %597 = tpu.matmul %595, %596, %cst_152 {dimension_numbers = #tpu.dot_dimension_numbers<[1], [0], [0], [1], [0, 0, 1, 1], [], []>} : vector<8x64xf32>, vector<64x256xf32>, vector<8x256xf32> -> vector<8x256xf32>
    %598 = arith.addf %294, %597 : vector<8x256xf32>
    %cst_153 = arith.constant 0.000000e+00 : f32
    %599 = vector.broadcast %cst_153 : f32 to vector<8x256xf32>
    %600 = arith.maximumf %598, %599 : vector<8x256xf32>
    %c0_154 = arith.constant 0 : index
    %c0_155 = arith.constant 0 : index
    %c0_156 = arith.constant 0 : index
    %601 = vector.load %arg15[%c0_154, %c0_155, %c0_156] : memref<1x8x256xf32, #tpu.memory_space<vmem>>, vector<1x8x256xf32>
    %602 = vector.shape_cast %601 : vector<1x8x256xf32> to vector<8x256xf32>
    %603 = vector.shape_cast %600 : vector<8x256xf32> to vector<1x8x256xf32>
    tpu.vector_store %arg15[%c0_154, %c0_155, %c0_156], %603 {strides = array<i32>} : memref<1x8x256xf32, #tpu.memory_space<vmem>>, vector<1x8x256xf32>,
    %c0_157 = arith.constant 0 : index
    %c0_158 = arith.constant 0 : index
    %604 = vector.load %arg12[%c0_157, %c0_158] : memref<16x72xbf16, #tpu.memory_space<vmem>>, vector<16x72xbf16>
    %c0_159 = arith.constant 0 : index
    %c0_160 = arith.constant 0 : index
    %605 = vector.load %arg13[%c0_159, %c0_160] : memref<16x1xf32, #tpu.memory_space<vmem>>, vector<16x1xf32>
    %c0_161 = arith.constant 0 : index
    %c0_162 = arith.constant 0 : index
    %606 = vector.load %arg5[%c0_161, %c0_162] : memref<2x256xf32, #tpu.memory_space<vmem>>, vector<2x256xf32>
    %c0_163 = arith.constant 0 : index
    %c0_164 = arith.constant 0 : index
    %607 = vector.load %arg14[%c0_163, %c0_164] : memref<256x64xf32, #tpu.memory_space<vmem>>, vector<256x64xf32>
    %cst_165 = arith.constant 0.000000e+00 : f32
    %608 = vector.broadcast %cst_165 : f32 to vector<8x17xf32>
    %609 = tpu.concatenate %608, %294, %608 in 1 : vector<8x17xf32>, vector<8x256xf32>, vector<8x17xf32> -> vector<8x290xf32>
    %610 = vector.extract_strided_slice %606 {offsets = [0, 0], sizes = [1, 256], strides = [1, 1]} : vector<2x256xf32> to vector<1x256xf32>
    %611 = vector.extract_strided_slice %606 {offsets = [1, 0], sizes = [1, 256], strides = [1, 1]} : vector<2x256xf32> to vector<1x256xf32>
    %612 = vector.extract_strided_slice %609 {offsets = [0, 0], sizes = [8, 256], strides = [1, 1]} : vector<8x290xf32> to vector<8x256xf32>
    %613 = vector.broadcast %610 : vector<1x256xf32> to vector<8x256xf32>
    %614 = arith.mulf %612, %613 : vector<8x256xf32>
    %615 = vector.extract_strided_slice %609 {offsets = [0, 1], sizes = [8, 256], strides = [1, 1]} : vector<8x290xf32> to vector<8x256xf32>
    %616 = vector.extract_strided_slice %609 {offsets = [0, 2], sizes = [8, 256], strides = [1, 1]} : vector<8x290xf32> to vector<8x256xf32>
    %617 = vector.broadcast %611 : vector<1x256xf32> to vector<8x256xf32>
    %618 = arith.mulf %616, %617 : vector<8x256xf32>
    %619 = vector.extract_strided_slice %609 {offsets = [0, 16], sizes = [8, 256], strides = [1, 1]} : vector<8x290xf32> to vector<8x256xf32>
    %620 = vector.broadcast %610 : vector<1x256xf32> to vector<8x256xf32>
    %621 = arith.mulf %619, %620 : vector<8x256xf32>
    %622 = vector.extract_strided_slice %609 {offsets = [0, 17], sizes = [8, 256], strides = [1, 1]} : vector<8x290xf32> to vector<8x256xf32>
    %623 = vector.extract_strided_slice %609 {offsets = [0, 18], sizes = [8, 256], strides = [1, 1]} : vector<8x290xf32> to vector<8x256xf32>
    %624 = vector.broadcast %611 : vector<1x256xf32> to vector<8x256xf32>
    %625 = arith.mulf %623, %624 : vector<8x256xf32>
    %626 = vector.extract_strided_slice %609 {offsets = [0, 32], sizes = [8, 256], strides = [1, 1]} : vector<8x290xf32> to vector<8x256xf32>
    %627 = vector.broadcast %610 : vector<1x256xf32> to vector<8x256xf32>
    %628 = arith.mulf %626, %627 : vector<8x256xf32>
    %629 = vector.extract_strided_slice %609 {offsets = [0, 33], sizes = [8, 256], strides = [1, 1]} : vector<8x290xf32> to vector<8x256xf32>
    %630 = vector.extract_strided_slice %609 {offsets = [0, 34], sizes = [8, 256], strides = [1, 1]} : vector<8x290xf32> to vector<8x256xf32>
    %631 = vector.broadcast %611 : vector<1x256xf32> to vector<8x256xf32>
    %632 = arith.mulf %630, %631 : vector<8x256xf32>
    %633 = tpu.concatenate %614, %615, %618, %621, %622, %625, %628, %629, %632 in 0 : vector<8x256xf32>, vector<8x256xf32>, vector<8x256xf32>, vector<8x256xf32>, vector<8x256xf32>, vector<8x256xf32>, vector<8x256xf32>, vector<8x256xf32>, vector<8x256xf32> -> vector<72x256xf32>
    %634 = arith.truncf %633 : vector<72x256xf32> to vector<72x256xbf16>
    %cst_166 = arith.constant dense<0.000000e+00> : vector<16x256xf32>
    %635 = tpu.matmul %604, %634, %cst_166 {dimension_numbers = #tpu.dot_dimension_numbers<[1], [0], [0], [1], [0, 0, 1, 1], [], []>} : vector<16x72xbf16>, vector<72x256xbf16>, vector<16x256xf32> -> vector<16x256xf32>
    %636 = vector.broadcast %605 : vector<16x1xf32> to vector<16x256xf32>
    %637 = arith.addf %635, %636 : vector<16x256xf32>
    %cst_167 = arith.constant dense<0.000000e+00> : vector<16x64xf32>
    %638 = tpu.matmul %637, %607, %cst_167 {dimension_numbers = #tpu.dot_dimension_numbers<[1], [0], [0], [1], [0, 0, 1, 1], [], []>} : vector<16x256xf32>, vector<256x64xf32>, vector<16x64xf32> -> vector<16x64xf32>
    %639 = arith.addf %638, %589 : vector<16x64xf32>
    %cst_168 = arith.constant 0.000000e+00 : f32
    %640 = vector.broadcast %cst_168 : f32 to vector<16x64xf32>
    %641 = arith.maximumf %639, %640 : vector<16x64xf32>
    %c0_169 = arith.constant 0 : index
    %c0_170 = arith.constant 0 : index
    %c0_171 = arith.constant 0 : index
    %642 = vector.load %arg16[%c0_169, %c0_170, %c0_171] : memref<1x16x64xf32, #tpu.memory_space<vmem>>, vector<1x16x64xf32>
    %643 = vector.shape_cast %642 : vector<1x16x64xf32> to vector<16x64xf32>
    %644 = vector.shape_cast %641 : vector<16x64xf32> to vector<1x16x64xf32>
    tpu.vector_store %arg16[%c0_169, %c0_170, %c0_171], %644 {strides = array<i32>} : memref<1x16x64xf32, #tpu.memory_space<vmem>>, vector<1x16x64xf32>,
    return
  }
  func.func @transform_0(%arg0: i32) -> (i32, i32, i32) {
    %c0_i32 = arith.constant 0 : i32
    %c0_i32_0 = arith.constant 0 : i32
    %c0_i32_1 = arith.constant 0 : i32
    return %arg0, %c0_i32, %c0_i32_0 : i32, i32, i32
  }
  func.func @transform_1(%arg0: i32) -> (i32, i32, i32) {
    %c0_i32 = arith.constant 0 : i32
    %c0_i32_0 = arith.constant 0 : i32
    %c0_i32_1 = arith.constant 0 : i32
    return %arg0, %c0_i32, %c0_i32_0 : i32, i32, i32
  }
  func.func @transform_2(%arg0: i32) -> (i32, i32, i32) {
    %c0_i32 = arith.constant 0 : i32
    %c0_i32_0 = arith.constant 0 : i32
    %c0_i32_1 = arith.constant 0 : i32
    %c0_i32_2 = arith.constant 0 : i32
    return %c0_i32, %c0_i32_0, %c0_i32_1 : i32, i32, i32
  }
  func.func @transform_3(%arg0: i32) -> (i32, i32, i32) {
    %c0_i32 = arith.constant 0 : i32
    %c0_i32_0 = arith.constant 0 : i32
    %c0_i32_1 = arith.constant 0 : i32
    %c0_i32_2 = arith.constant 0 : i32
    return %c0_i32, %c0_i32_0, %c0_i32_1 : i32, i32, i32
  }
  func.func @transform_4(%arg0: i32) -> (i32, i32) {
    %c0_i32 = arith.constant 0 : i32
    %c0_i32_0 = arith.constant 0 : i32
    %c0_i32_1 = arith.constant 0 : i32
    return %c0_i32, %c0_i32_0 : i32, i32
  }
  func.func @transform_5(%arg0: i32) -> (i32, i32, i32) {
    %c0_i32 = arith.constant 0 : i32
    %c0_i32_0 = arith.constant 0 : i32
    %c0_i32_1 = arith.constant 0 : i32
    %c0_i32_2 = arith.constant 0 : i32
    return %c0_i32, %c0_i32_0, %c0_i32_1 : i32, i32, i32
  }
  func.func @transform_6(%arg0: i32) -> (i32, i32, i32) {
    %c0_i32 = arith.constant 0 : i32
    %c0_i32_0 = arith.constant 0 : i32
    %c0_i32_1 = arith.constant 0 : i32
    %c0_i32_2 = arith.constant 0 : i32
    return %c0_i32, %c0_i32_0, %c0_i32_1 : i32, i32, i32
  }
  func.func @transform_7(%arg0: i32) -> (i32, i32) {
    %c0_i32 = arith.constant 0 : i32
    %c0_i32_0 = arith.constant 0 : i32
    %c0_i32_1 = arith.constant 0 : i32
    return %c0_i32, %c0_i32_0 : i32, i32
  }
  func.func @transform_8(%arg0: i32) -> (i32, i32) {
    %c0_i32 = arith.constant 0 : i32
    %c0_i32_0 = arith.constant 0 : i32
    %c0_i32_1 = arith.constant 0 : i32
    return %c0_i32, %c0_i32_0 : i32, i32
  }
  func.func @transform_9(%arg0: i32) -> (i32, i32) {
    %c0_i32 = arith.constant 0 : i32
    %c0_i32_0 = arith.constant 0 : i32
    %c0_i32_1 = arith.constant 0 : i32
    return %c0_i32, %c0_i32_0 : i32, i32
  }
  func.func @transform_10(%arg0: i32) -> (i32, i32) {
    %c0_i32 = arith.constant 0 : i32
    %c0_i32_0 = arith.constant 0 : i32
    %c0_i32_1 = arith.constant 0 : i32
    return %c0_i32, %c0_i32_0 : i32, i32
  }
  func.func @transform_11(%arg0: i32) -> (i32, i32) {
    %c0_i32 = arith.constant 0 : i32
    %c0_i32_0 = arith.constant 0 : i32
    %c0_i32_1 = arith.constant 0 : i32
    return %c0_i32, %c0_i32_0 : i32, i32
  }
  func.func @transform_12(%arg0: i32) -> (i32, i32) {
    %c0_i32 = arith.constant 0 : i32
    %c0_i32_0 = arith.constant 0 : i32
    %c0_i32_1 = arith.constant 0 : i32
    return %c0_i32, %c0_i32_0 : i32, i32
  }
  func.func @transform_13(%arg0: i32) -> (i32, i32) {
    %c0_i32 = arith.constant 0 : i32
    %c0_i32_0 = arith.constant 0 : i32
    %c0_i32_1 = arith.constant 0 : i32
    return %c0_i32, %c0_i32_0 : i32, i32
  }
  func.func @transform_14(%arg0: i32) -> (i32, i32, i32) {
    %c0_i32 = arith.constant 0 : i32
    %c0_i32_0 = arith.constant 0 : i32
    %c0_i32_1 = arith.constant 0 : i32
    return %arg0, %c0_i32, %c0_i32_0 : i32, i32, i32
  }
  func.func @transform_15(%arg0: i32) -> (i32, i32, i32) {
    %c0_i32 = arith.constant 0 : i32
    %c0_i32_0 = arith.constant 0 : i32
    %c0_i32_1 = arith.constant 0 : i32
    return %arg0, %c0_i32, %c0_i32_0 : i32, i32, i32
  }
}

</mosaic_0001>

<bundles_post_ra>
// kernel: _lambda_.1
= control target key start
LH: loop header
LB: loop body
LE: loop exit
PB: predicated region body
PF: predicated region fallthrough
CT: control target
= control target key end

     0   :  { %s6927_s0 = inlined_call_operand.vmem [shape: f32[2,8,256], index: 0, kind: input, shape index: {}]   ;;  %s6928_s1 = inlined_call_operand.vmem [shape: f32[2,16,64], index: 1, kind: input, shape index: {}]   ;;  %s6929_s2 = inlined_call_operand.vmem [shape: bf16[8,8,72], index: 2, kind: input, shape index: {}]   ;;  %s6930_s3 = inlined_call_operand.vmem [shape: f32[8,8,1], index: 3, kind: input, shape index: {}]   ;;  %s6931_s4 = inlined_call_operand.vmem [shape: f32[2,256], index: 4, kind: input, shape index: {}]   ;;  %s6932_s5 = inlined_call_operand.vmem [shape: bf16[8,16,144], index: 5, kind: input, shape index: {}]   ;;  %s6933_s6 = inlined_call_operand.hbm [shape: f32[8,16,1], index: 6, kind: input, shape index: {}]   ;;  %s6934_s7 = inlined_call_operand.vmem [shape: f32[2,64], index: 7, kind: input, shape index: {}]   ;;  %s6935_s8 = inlined_call_operand.hbm [shape: bf16[8,16], index: 8, kind: input, shape index: {}]   ;;  %s6936_s9 = inlined_call_operand.vmem [shape: f32[8,1], index: 9, kind: input, shape index: {}]   ;;  %s6937_s10 = inlined_call_operand.vmem [shape: f32[64,256], index: 10, kind: input, shape index: {}]   ;;  %s6938_s11 = inlined_call_operand.vmem [shape: bf16[16,72], index: 11, kind: input, shape index: {}]   ;;  %s6939_s12 = inlined_call_operand.vmem [shape: f32[16,1], index: 12, kind: input, shape index: {}]   ;;  %s6940_s13 = inlined_call_operand.vmem [shape: f32[256,64], index: 13, kind: input, shape index: {}]   ;;  %s6941_s14 = inlined_call_operand.vmem [shape: f32[2,8,256], index: 14, kind: output, shape index: {0}]   ;;  %s6942_s15 = inlined_call_operand.vmem [shape: f32[2,16,64], index: 15, kind: output, shape index: {1}]  }
   0x1   :  { %6976 = sst [smem:[#allocation9_spill]] %s6942_s15 }
   0x2   :  { %21 = vsyncpa [#allocation3], 0 }
   0x3   :  { %22 = vsyncpa [#allocation5], 0  ;;  %s5387_s18 = smov 0  }
   0x4 LB: > { %6977 = sst [smem:[#allocation8_spill]] %s5278_s18  ;;  %s5393_s19 = sadd.s32 4294967295, %s5278_s18   ;;  %s5278_s18 = sphi %s5387_s18, %s28_s18  }
   0x5   : > { %p4259_p0 = scmp.ge.s32.totalorder %s5278_s18, 1  ;;  %p389_p1 = scmp.lt.s32.totalorder %s5278_s18, 3 }
   0x6   : > { %s5280_s20 = smov [#allocation2]   ;;  %p6943_p3 = scmp.eq.s32.totalorder %s5393_s19, 0 }
   0x7   : > { %s413_s21 = sshll.u32 %s5280_s20, 4  ;;  %p5397_p2 = pnand %p4259_p0, %p389_p1  ;;  %s414_s21 = int_to_ptr.vmem [resolvable:$true] %s413_s21 }
   0x8   : > { %s5281_s23 = smov [#allocation4]   ;;  %s5208_s28 = scalar_lea.hbm %s6933_s6, 2048 }
   0x9   : > { %s6978_s22 = scalar_select %p5397_p2, 1, 0 }
   0xa   : > { %p4455_p4 = pneg %p5397_p2  ;;  %s430_s24 = sshll.u32 %s5281_s23, 4  ;;  %s5410_s24 = int_to_ptr.vmem [resolvable:$true] %s430_s24 }
   0xb   : > { %p5209_p6 = scmp.ne.s32.totalorder %s6933_s6, %s5208_s28  ;;  %p5215_p10 = scmp.lt.u32.totalorder %s5208_s28, %s6933_s6 }
   0xc   : > { %p5406_p5 = pnand %p6943_p3, %p4455_p4 }
   0xe   : > { %p5210_p7 = pneg %p5406_p5 }
  0x10   : > { %p5211_p8 = pnand %p5210_p7, %p5209_p6 }
  0x12   : > { %p5212_p9 = pneg %p5211_p8 }
  0x14   : > { %p5217_p11 = pnand %p5215_p10, %p5212_p9 }
  0x16   : > { %5220 = shalt.err (!%p5217_p11)
}
  0x17   : > { %s5221_s20 = scalar_lea.vmem %s414_s21, 2048  ;;  %p5229_p1 = scmp.lt.s32.totalorder %s414_s21, %s414_s21 }
  0x18   : > { %p5222_p12 = scmp.ne.s32.totalorder %s414_s21, %s5221_s20  ;;  %p5230_p4 = scmp.lt.s32.totalorder %s5221_s20, %s5221_s20 }
  0x1a   : > { %p5224_p13 = pnand %p5222_p12, %p5210_p7  ;;  %p5231_p3 = por %p5230_p4, %p5229_p1 }
  0x1c   : > { %p5225_p0 = pneg %p5224_p13 }
  0x1e   : > { %p5232_p2 = pnand %p5231_p3, %p5225_p0 }
  0x20   : > { %5235 = shalt.err (!%p5232_p2)
}
  0x21   : > { %s5282_s23 = smov 128   ;;  %s5283_s26 = smov 8  }
  0x22   : > { %4458 = dma.hbm_to_vmem [thread:$0]  (!%p5406_p5), %s6933_s6, 2048, %s414_s21, [#allocation3], %s5282_s23, %s5282_s23, %s5283_s26  }
  0x23   : > { %s5236_s16 = scalar_lea.hbm %s6935_s8, 64 }
  0x24   : > { %p5237_p6 = scmp.ne.s32.totalorder %s6935_s8, %s5236_s16  ;;  %p5243_p8 = scmp.lt.u32.totalorder %s5236_s16, %s6935_s8 }
  0x26   : > { %p5239_p2 = pnand %p5237_p6, %p5210_p7 }
  0x28   : > { %p5240_p3 = pneg %p5239_p2 }
  0x2a   : > { %p5245_p9 = pnand %p5243_p8, %p5240_p3 }
  0x2c   : > { %5248 = shalt.err (!%p5245_p9)
}
  0x2d   : > { %s5249_s21 = scalar_lea.vmem %s5410_s24, 64  ;;  %p5257_p13 = scmp.lt.s32.totalorder %s5410_s24, %s5410_s24 }
  0x2e   : > { %p5250_p10 = scmp.ne.s32.totalorder %s5410_s24, %s5249_s21  ;;  %p5258_p0 = scmp.lt.s32.totalorder %s5249_s21, %s5249_s21 }
  0x30   : > { %p5252_p11 = pnand %p5250_p10, %p5210_p7  ;;  %p5259_p1 = por %p5258_p0, %p5257_p13 }
  0x32   : > { %p5253_p12 = pneg %p5252_p11 }
  0x34   : > { %p5260_p4 = pnand %p5259_p1, %p5253_p12 }
  0x36   : > { %5263 = shalt.err (!%p5260_p4)
}
  0x37   : > { %4461 = dma.hbm_to_vmem [thread:$0]  (!%p5406_p5), %s6935_s8, 64, %s5410_s24, [#allocation5]  }
  0x38   : > { %p6980_p6 = scmp.ne.s32.totalorder %s6978_s22, 0 }
  0x39   : > { %p6981_p2 = scmp.eq.s32.totalorder (!%p6980_p6), %s5393_s19, 0 }
  0x3a   : > { %474 = sbr.rel (%p6980_p6) target bundleno = 7611 (0x1dbb), region = 76 }
  0x41   : > { %5269 = dma.done.wait (%p6981_p2), [#allocation3], 2048   ;;  %p6982_p7 = pmov %p6981_p2 }
  0x42   : > { %p6983_p3 = pmov %p6981_p2 }
  0x43   : > { %5271 = vsyncadd (%p6982_p7), [#allocation3], 4294965248 }
  0x44   : > { %5273 = dma.done.wait (%p6983_p3), [#allocation5], 64   ;;  %p6984_p8 = pmov %p6981_p2 }
  0x45   : > { %p536_p9 = scmp.lt.s32.totalorder %s5393_s19, 1  ;;  %v576_v0 = vlaneseq  ;;  %v557_v7 = vld [vmem:[%s6931_s4] sm:$0xf]  ;;  %s6968_s27 = smov 17   ;;  %vm568_vm0 = vcmask 138240   ;;  %vm634_vm1 = vcmask 130048  }
  0x46   : > { %5275 = vsyncadd (%p6984_p8), [#allocation5], 4294967232  ;;  %s6960_s28 = smov 2   ;;  %s6958_s29 = smov 16   ;;  %vm620_vm2 = vcmask 15360   ;;  %vm646_vm3 = vcmask 146432  }
  0x47   : > { %s7004_s19 = smov (!%p536_p9, %s5393_s19), 1  ;;  %v5471_v1 = vshrl.u32 %v576_v0, 7  ;;  %s6956_s30 = smov 18   ;;  %vm6955_vm4 = vcmask 261120   ;;  %vm6954_vm5 = vcmask 277504   ;;  %v5297_v56 = vmov 0  }
  0x48   : > { %s5473_s22 = sshll.u32 %s7004_s19, 4  ;;  %s6948_s16 = smov 32   ;;  %841 = vmatprep.mubr.bf16.mxu0 %v5297_v56  ;;  %4541 = vset.pattern.permute.xlu0 %v5297_v56  ;;  %v561_v59 = vld [vmem:[%s6930_s3] sm:$0xff]  ;;  %vm686_vm6 = vcmask 1039360   ;;  %vm714_vm7 = vcmask 916480   ;;  %vm700_vm8 = vcmask 1031168  }
  0x49   : > { %v5476_v2 = vsub.s32 0, %v5471_v1  ;;  %v5479_v3 = vsub.s32 1, %v5471_v1  ;;  %v602_v4 = vsub.s32 3, %v5471_v1  ;;  %s540_s23 = scalar_lea.vmem %s6927_s0, %s5473_s22  ;;  %v582_v8 = vsub.s32 2, %v5471_v1  ;;  %s6946_s17 = smov 34   ;;  %1038 = vmatprep.mubr.bf16.mxu1 %v5297_v56  ;;  %4622 = vset.pattern.permute.xlu1 %v5297_v56  ;;  %v3589_v1 = vld [vmem:[%s6936_s9] sm:$0xff] }
  0x4a   : > { %v5486_v5 = vld [vmem:[%s540_s23] sm:$0xff]  ;;  %v5488_v6 = vld [vmem:[%s540_s23 + $0x8] sm:$0xff]  ;;  %s5290_s20 = smov 127   ;;  %s6966_s21 = smov 95   ;;  %vm739_vm9 = vcmask 900096   ;;  %vm725_vm10 = vcmask 908288  }
  0x4b   : > { %564 = vrot.lane.b32.xlu0 %v5486_v5, %s6968_s27  ;;  %v599_v9 = vrot.slane %v557_v7, %v5479_v3  ;;  %v579_v10 = vrot.slane %v557_v7, %v5476_v2  ;;  %v603_v11 = vrot.slane %v557_v7, %v602_v4  ;;  %v583_v13 = vrot.slane %v557_v7, %v582_v8  ;;  %s6972_s15 = smov 111   ;;  %s6974_s18 = smov 112  }
  0x4c   : > { %s6970_s24 = smov 110   ;;  %s5295_s25 = smov 126   ;;  %vm764_vm11 = vcmask 777216   ;;  %vm753_vm12 = vcmask 785408   ;;  %vm778_vm13 = vcmask 769024   ;;  %vm802_vm14 = vcmask 1043456  }
  0x4d   : > { %v609_v12 = vrot.slane %v599_v9, %v5479_v3  ;;  %v5507_v14 = vrot.slane %v579_v10, %v5476_v2  ;;  %v613_v15 = vrot.slane %v603_v11, %v5479_v3  ;;  %v5511_v16 = vrot.slane %v583_v13, %v5476_v2  ;;  %s6952_s23 = smov 96   ;;  %s6950_s26 = smov 94  }
  0x4e   : > { %vm798_vm15 = vcmask 588800   ;;  %s5300_s19 = smov 8  }
  0x4f   : > { %566 = vrot.lane.b32.xlu0 %v5488_v6, %s6968_s27  ;;  %616 = vrot.lane.b32.xlu1 %v609_v12, %s6960_s28 }
  0x53   : > { %618 = vrot.lane.b32.xlu1 %v613_v15, %s6960_s28  ;;  %630 = vrot.lane.b32.xlu0 %v5507_v14, %s6958_s29 }
  0x57   : > { %632 = vrot.lane.b32.xlu1 %v5511_v16, %s6958_s29  ;;  %642 = vrot.lane.b32.xlu0 %v609_v12, %s6956_s30 }
  0x5b   : > { %644 = vrot.lane.b32.xlu1 %v613_v15, %s6956_s30  ;;  %654 = vrot.lane.b32.xlu0 %v5507_v14, %s6948_s16 }
  0x5f   : > { %656 = vrot.lane.b32.xlu1 %v5511_v16, %s6948_s16  ;;  %666 = vrot.lane.b32.xlu0 %v609_v12, %s6946_s17  ;;  %s545_s16 = scalar_lea.vmem %s6928_s1, %s5473_s22 }
  0x63   : > { %668 = vrot.lane.b32.xlu1 %v613_v15, %s6946_s17  ;;  %s5299_s17 = smov 9  }
  0xbd   : > { %v565_v17 = vpop.permute.xlu0 %564 }
  0xbe   : > { %v5527_v18 = vsel %vm568_vm0, 0.0, %v565_v17 }
  0xbf   : > { %680 = vrot.lane.b32.xlu1 %v5527_v18, %s5290_s20  ;;  %v594_v9 = vmul.f32 %v5507_v14, %v5527_v18 }
  0xc1   : > { %v567_v19 = vpop.permute.xlu0 %566  ;;  %v5531_v20 = vpop.permute.xlu1 %616 }
  0xc2   : > { %v5534_v21 = vsel %vm568_vm0, %v565_v17, %v567_v19  ;;  %v574_v22 = vsel %vm568_vm0, %v567_v19, 0.0  ;;  %v625_v35 = vmul.f32 %v5531_v20, %v5527_v18 }
  0xc3   : > { %v4511_v23 = vpack.i.bf16 %v574_v22, %v5534_v21  ;;  %v595_v7 = vmul.f32 %v5511_v16, %v5534_v21 }
  0xc5   : > { %v5538_v24 = vpop.permute.xlu1 %618  ;;  %4512 = vrot.lane.b32.xlu1 %v4511_v23, %s6966_s21  ;;  %4502 = vrot.lane.b32.xlu0 %v4511_v23, %s5290_s20  ;;  %v5542_v25 = vpop.permute.xlu0 %630 }
  0xc6   : > { %v639_v26 = vmul.f32 %v5542_v25, %v5527_v18  ;;  %v5565_v33 = vsel %vm620_vm2, %v5531_v20, %v5538_v24  ;;  %v627_v36 = vmul.f32 %v5538_v24, %v574_v22 }
  0xc7   : > { %v626_v39 = vmul.f32 %v5565_v33, %v5534_v21 }
  0xc9   : > { %v5546_v27 = vpop.permute.xlu1 %632  ;;  %4507 = vrot.lane.b32.xlu0 %v4511_v23, %s6972_s15  ;;  %708 = vrot.lane.b32.xlu1 %v639_v26, %s6974_s18  ;;  %v5550_v28 = vpop.permute.xlu0 %642  ;;  %v4516_v44 = vpack.i.bf16 %v627_v36, %v626_v39 }
  0xca   : > { %v651_v29 = vmul.f32 %v5550_v28, %v5527_v18  ;;  %v5557_v30 = vsel %vm634_vm1, %v5542_v25, %v5546_v27  ;;  %v641_v32 = vmul.f32 %v5546_v27, %v574_v22 }
  0xcb   : > { %v640_v31 = vmul.f32 %v5557_v30, %v5534_v21 }
  0xcd   : > { %v5567_v34 = vpop.permute.xlu1 %644  ;;  %719 = vrot.lane.b32.xlu0 %v5527_v18, %s6972_s15  ;;  %733 = vrot.lane.b32.xlu1 %v651_v29, %s6970_s24  ;;  %v4521_v38 = vpack.i.bf16 %v641_v32, %v640_v31  ;;  %v5585_v42 = vpop.permute.xlu0 %654 }
  0xce   : > { %v5578_v37 = vsel %vm646_vm3, %v5550_v28, %v5567_v34  ;;  %v653_v41 = vmul.f32 %v5567_v34, %v574_v22  ;;  %v663_v49 = vmul.f32 %v5585_v42, %v5527_v18 }
  0xcf   : > { %v652_v40 = vmul.f32 %v5578_v37, %v5534_v21 }
  0xd1   : > { %v5587_v43 = vpop.permute.xlu1 %656  ;;  %694 = vrot.lane.b32.xlu0 %v625_v35, %s5295_s25  ;;  %4522 = vrot.lane.b32.xlu1 %v4521_v38, %s6974_s18  ;;  %v4526_v45 = vpack.i.bf16 %v653_v41, %v652_v40  ;;  %v5600_v48 = vpop.permute.xlu0 %666 }
  0xd2   : > { %v5594_v46 = vsel %vm6955_vm4, %v5585_v42, %v5587_v43  ;;  %v665_v51 = vmul.f32 %v5587_v43, %v574_v22  ;;  %v675_v57 = vmul.f32 %v5600_v48, %v5527_v18  ;;  %vm2257_vm4 = vcmask 596992  }
  0xd3   : > { %v664_v50 = vmul.f32 %v5594_v46, %v5534_v21 }
  0xd5   : > { %v5596_v47 = vpop.permute.xlu1 %668  ;;  %4517 = vrot.lane.b32.xlu0 %v4516_v44, %s5295_s25  ;;  %4527 = vrot.lane.b32.xlu1 %v4526_v45, %s6970_s24  ;;  %v4531_v54 = vpack.i.bf16 %v665_v51, %v664_v50 }
  0xd6   : > { %v5610_v52 = vsel %vm6954_vm5, %v5600_v48, %v5596_v47  ;;  %v677_v53 = vmul.f32 %v5596_v47, %v574_v22  ;;  %vm2254_vm5 = vcmask 72704  }
  0xd7   : > { %v676_v55 = vmul.f32 %v5610_v52, %v5534_v21 }
  0xd9   : > { %758 = vrot.lane.b32.xlu1 %v5527_v18, %s6966_s21  ;;  %747 = vrot.lane.b32.xlu0 %v663_v49, %s6952_s23  ;;  %v4536_v58 = vpack.i.bf16 %v676_v55, %v675_v57 }
  0xdd   : > { %776 = vrot.lane.b32.xlu1 %v677_v53, %s6950_s26  ;;  %4532 = vrot.lane.b32.xlu0 %v4531_v54, %s6952_s23 }
  0xe1   : > { %4537 = vrot.lane.b32.xlu0 %v4536_v58, %s6950_s26 }
  0xe5   : > { %795 = vperm.xlu0 %4541, %v561_v59  }
 0x131   : > { %v681_v60 = vpop.permute.xlu1 %680 }
 0x137   : > { %v4513_v61 = vpop.permute.xlu1 %4512  ;;  %v4503_v62 = vpop.permute.xlu0 %4502 }
 0x138   : > { %v4505_v63 = vunpack.i.h.bf16 %v4503_v62  ;;  %v4504_v0 = vunpack.i.l.bf16 %v4503_v62  ;;  %v4515_v59 = vunpack.i.h.bf16 %v4513_v61 }
 0x13a   : > { %v688_v10 = vsel %vm686_vm6, %v4504_v0, %v4505_v63  ;;  %v687_v11 = vsel %vm686_vm6, %v681_v60, %v4504_v0  ;;  %v4514_v60 = vunpack.i.l.bf16 %v4513_v61 }
 0x13b   : > { %v709_v12 = vpop.permute.xlu1 %708  ;;  %v4508_v13 = vpop.permute.xlu0 %4507  ;;  %v784_v15 = vpack.c.bf16 %v688_v10, %v595_v7  ;;  %v783_v17 = vpack.c.bf16 %v687_v11, %v594_v9 }
 0x13c   : > { %v4510_v21 = vunpack.i.h.bf16 %v4508_v13  ;;  %v4509_v32 = vunpack.i.l.bf16 %v4508_v13  ;;  %v766_v13 = vsel %vm764_vm11, %v4514_v60, %v4515_v59 }
 0x13d   : > { %809 = vmatprep.subr.bf16.mxu0 %v784_v15 }
 0x13e   : > { %810 = vmatpush1.bf16.msra.mxu0 %v783_v17  ;;  %v727_v55 = vsel %vm725_vm10, %v4509_v32, %v4510_v21 }
 0x13f   : > { %v734_v19 = vpop.permute.xlu1 %733  ;;  %v720_v22 = vpop.permute.xlu0 %719 }
 0x140   : > { %v726_v62 = vsel %vm725_vm10, %v720_v22, %v4509_v32 }
 0x143   : > { %v4523_v23 = vpop.permute.xlu1 %4522  ;;  %v695_v26 = vpop.permute.xlu0 %694 }
 0x144   : > { %v4525_v29 = vunpack.i.h.bf16 %v4523_v23  ;;  %v4524_v31 = vunpack.i.l.bf16 %v4523_v23 }
 0x146   : > { %v716_v41 = vsel %vm714_vm7, %v4524_v31, %v4525_v29  ;;  %v715_v49 = vsel %vm714_vm7, %v709_v12, %v4524_v31 }
 0x147   : > { %v4528_v18 = vpop.permute.xlu1 %4527  ;;  %v4518_v35 = vpop.permute.xlu0 %4517 }
 0x148   : > { %v4530_v36 = vunpack.i.h.bf16 %v4528_v18  ;;  %v4529_v38 = vunpack.i.l.bf16 %v4528_v18  ;;  %v4520_v39 = vunpack.i.h.bf16 %v4518_v35  ;;  %v4519_v40 = vunpack.i.l.bf16 %v4518_v35  ;;  %v560_v35 = vld [vmem:[%s6929_s2] sm:$0xf] }
 0x14a   : > { %v702_v44 = vsel %vm700_vm8, %v4519_v40, %v4520_v39  ;;  %v701_v45 = vsel %vm700_vm8, %v695_v26, %v4519_v40  ;;  %v741_v50 = vsel %vm739_vm9, %v4529_v38, %v4530_v36  ;;  %v740_v58 = vsel %vm739_vm9, %v734_v19, %v4529_v38 }
 0x14b   : > { %v748_v51 = vpop.permute.xlu0 %747  ;;  %v786_v53 = vpack.c.bf16 %v716_v41, %v702_v44  ;;  %v785_v54 = vpack.c.bf16 %v715_v49, %v701_v45  ;;  %v788_v57 = vpack.c.bf16 %v741_v50, %v727_v55  ;;  %v759_v63 = vpop.permute.xlu1 %758  ;;  %v787_v10 = vpack.c.bf16 %v740_v58, %v726_v62 }
 0x14c   : > { %v765_v11 = vsel %vm764_vm11, %v759_v63, %v4514_v60 }
 0x14d   : > { %811 = vmatprep.subr.bf16.mxu0 %v786_v53 }
 0x14e   : > { %812 = vmatpush1.bf16.msra.mxu0 %v785_v54 }
 0x14f   : > { %v4533_v0 = vpop.permute.xlu0 %4532  ;;  %813 = vmatprep.subr.bf16.mxu0 %v788_v57  ;;  %v777_v26 = vpop.permute.xlu1 %776 }
 0x150   : > { %v4535_v7 = vunpack.i.h.bf16 %v4533_v0  ;;  %v4534_v9 = vunpack.i.l.bf16 %v4533_v0 }
 0x152   : > { %814 = vmatpush1.bf16.msra.mxu0 %v787_v10  ;;  %v755_v12 = vsel %vm753_vm12, %v4534_v9, %v4535_v7  ;;  %v754_v61 = vsel %vm753_vm12, %v748_v51, %v4534_v9 }
 0x153   : > { %v4538_v15 = vpop.permute.xlu0 %4537  ;;  %v790_v17 = vpack.c.bf16 %v766_v13, %v755_v12  ;;  %v789_v19 = vpack.c.bf16 %v765_v11, %v754_v61 }
 0x154   : > { %v4540_v22 = vunpack.i.h.bf16 %v4538_v15  ;;  %v4539_v23 = vunpack.i.l.bf16 %v4538_v15 }
 0x155   : > { %815 = vmatprep.subr.bf16.mxu0 %v790_v17 }
 0x156   : > { %816 = vmatpush1.bf16.msra.mxu0 %v789_v19  ;;  %v780_v29 = vsel %vm778_vm13, %v4540_v22, %v777_v26  ;;  %v779_v31 = vsel %vm778_vm13, %v4539_v23, %v4540_v22 }
 0x157   : > { %v792_v21 = vpack.c.bf16 %v780_v29, %v780_v29  ;;  %v791_v32 = vpack.c.bf16 %v779_v31, %v779_v31 }
 0x159   : > { %4274 = vmatprep.subr.msk.bf16.mxu0 %vm802_vm14, %v792_v21  ;;  %v804_v18 = vsel %vm802_vm14, %v791_v32, 0  ;;  %v4277_v21 = vld [vmem:[%s6930_s3 + $0x8] sm:$0xff] }
 0x15a   : > { %818 = vmatpush1.bf16.msra.mxu0 %v804_v18 }
 0x15d   : > { %4275 = vmatmul.mubr.msk.bf16.vlgmr.msra.gmra.mrb[0].mxu0 %vm798_vm15, %v560_v35 }
 0x15e   : > { %1237 = vmatprep.mubr.bf16.mxu0 %v5297_v56 }
 0x164   : > { %v796_v36 = vpop.permute.xlu0 %795 }
 0x230   : > { %v843_v38 = vpop.f32.mrb[0].mxu0 }
 0x231   : > { %v844_v39 = vadd.f32 %v843_v38, %v796_v36  ;;  %v845_v40 = vpop.f32.mrb[1].mxu0 }
 0x232   : > { %v847_v41 = vpop.f32.mrb[2].mxu0  ;;  %v846_v45 = vadd.f32 %v845_v40, %v796_v36 }
 0x233   : > { %v850_v44 = vmax.f32 %v844_v39, 0.0  ;;  %v848_v49 = vpop.f32.mrb[3].mxu0 }
 0x234   : > { %v851_v50 = vmax.f32 %v846_v45, 0.0 }
 0x235   : > { %858 = vrot.lane.b32.xlu1 %v850_v44, %s6968_s27 }
 0x239   : > { %860 = vrot.lane.b32.xlu1 %v851_v50, %s6968_s27 }
 0x2a7   : > { %v859_v51 = vpop.permute.xlu1 %858 }
 0x2a8   : > { %v866_v53 = vsel %vm568_vm0, 0.0, %v859_v51 }
 0x2a9   : > { %923 = vrot.lane.b32.xlu0 %v866_v53, %s6972_s15  ;;  %887 = vrot.lane.b32.xlu1 %v866_v53, %s5290_s20  ;;  %v873_v59 = vmul.f32 %v866_v53, %v5542_v25  ;;  %v876_v60 = vmul.f32 %v866_v53, %v5550_v28  ;;  %v870_v62 = vmul.f32 %v866_v53, %v5531_v20 }
 0x2aa   : > { %v879_v15 = vmul.f32 %v866_v53, %v5585_v42  ;;  %v882_v26 = vmul.f32 %v866_v53, %v5600_v48  ;;  %v868_v41 = vmul.f32 %v866_v53, %v5507_v14 }
 0x2ab   : > { %v861_v54 = vpop.permute.xlu1 %860 }
 0x2ac   : > { %v862_v55 = vsel %vm568_vm0, %v859_v51, %v861_v54  ;;  %v867_v57 = vsel %vm568_vm0, %v861_v54, 0.0 }
 0x2ad   : > { %v4552_v58 = vpack.i.bf16 %v867_v57, %v862_v55  ;;  %v874_v63 = vmul.f32 %v862_v55, %v5557_v30  ;;  %v875_v0 = vmul.f32 %v867_v57, %v5546_v27  ;;  %v871_v7 = vmul.f32 %v862_v55, %v5565_v33 }
 0x2ae   : > { %v872_v9 = vmul.f32 %v867_v57, %v5538_v24  ;;  %v877_v12 = vmul.f32 %v862_v55, %v5578_v37  ;;  %v878_v13 = vmul.f32 %v867_v57, %v5567_v34  ;;  %v880_v17 = vmul.f32 %v862_v55, %v5594_v46 }
 0x2af   : > { %4553 = vrot.lane.b32.xlu1 %v4552_v58, %s6966_s21  ;;  %4543 = vrot.lane.b32.xlu0 %v4552_v58, %s5290_s20  ;;  %v4562_v10 = vpack.i.bf16 %v875_v0, %v874_v63  ;;  %v881_v19 = vmul.f32 %v867_v57, %v5587_v43  ;;  %v883_v23 = vmul.f32 %v862_v55, %v5610_v52 }
 0x2b0   : > { %v4557_v11 = vpack.i.bf16 %v872_v9, %v871_v7  ;;  %v4567_v61 = vpack.i.bf16 %v878_v13, %v877_v12  ;;  %v884_v29 = vmul.f32 %v867_v57, %v5596_v47  ;;  %v869_v40 = vmul.f32 %v862_v55, %v5511_v16 }
 0x2b1   : > { %v4572_v22 = vpack.i.bf16 %v881_v19, %v880_v17  ;;  %v4577_v31 = vpack.i.bf16 %v883_v23, %v882_v26 }
 0x2b3   : > { %913 = vrot.lane.b32.xlu1 %v873_v59, %s6974_s18  ;;  %4548 = vrot.lane.b32.xlu0 %v4552_v58, %s6972_s15 }
 0x2b7   : > { %936 = vrot.lane.b32.xlu1 %v876_v60, %s6970_s24  ;;  %900 = vrot.lane.b32.xlu0 %v870_v62, %s5295_s25 }
 0x2bb   : > { %4563 = vrot.lane.b32.xlu1 %v4562_v10, %s6974_s18  ;;  %4558 = vrot.lane.b32.xlu0 %v4557_v11, %s5295_s25 }
 0x2bf   : > { %4568 = vrot.lane.b32.xlu1 %v4567_v61, %s6970_s24  ;;  %949 = vrot.lane.b32.xlu0 %v879_v15, %s6952_s23 }
 0x2c3   : > { %959 = vrot.lane.b32.xlu1 %v866_v53, %s6966_s21  ;;  %4573 = vrot.lane.b32.xlu0 %v4572_v22, %s6952_s23 }
 0x2c7   : > { %976 = vrot.lane.b32.xlu1 %v884_v29, %s6950_s26  ;;  %4578 = vrot.lane.b32.xlu0 %v4577_v31, %s6950_s26 }
 0x2cb   : > { %994 = vperm.xlu0 %4541, %v4277_v21  }
 0x31b   : > { %v924_v32 = vpop.permute.xlu0 %923  ;;  %v888_v18 = vpop.permute.xlu1 %887 }
 0x321   : > { %v4544_v35 = vpop.permute.xlu0 %4543  ;;  %v4554_v36 = vpop.permute.xlu1 %4553 }
 0x322   : > { %v4546_v38 = vunpack.i.h.bf16 %v4544_v35  ;;  %v4545_v39 = vunpack.i.l.bf16 %v4544_v35  ;;  %v4556_v23 = vunpack.i.h.bf16 %v4554_v36  ;;  %v4555_v26 = vunpack.i.l.bf16 %v4554_v36 }
 0x324   : > { %v894_v44 = vsel %vm686_vm6, %v4545_v39, %v4546_v38  ;;  %v893_v45 = vsel %vm686_vm6, %v888_v18, %v4545_v39 }
 0x325   : > { %v4549_v49 = vpop.permute.xlu0 %4548  ;;  %v914_v50 = vpop.permute.xlu1 %913  ;;  %v983_v51 = vpack.c.bf16 %v894_v44, %v869_v40  ;;  %v982_v54 = vpack.c.bf16 %v893_v45, %v868_v41 }
 0x326   : > { %v4551_v7 = vunpack.i.h.bf16 %v4549_v49  ;;  %v4550_v53 = vunpack.i.l.bf16 %v4549_v49 }
 0x327   : > { %1006 = vmatprep.subr.bf16.mxu1 %v983_v51 }
 0x328   : > { %1007 = vmatpush1.bf16.msra.mxu1 %v982_v54  ;;  %v930_v29 = vsel %vm725_vm10, %v4550_v53, %v4551_v7  ;;  %v929_v21 = vsel %vm725_vm10, %v924_v32, %v4550_v53  ;;  %v4276_v7 = vld [vmem:[%s6929_s2 + $0x4] sm:$0xf] }
 0x329   : > { %v901_v57 = vpop.permute.xlu0 %900  ;;  %v937_v58 = vpop.permute.xlu1 %936 }
 0x32d   : > { %v4559_v59 = vpop.permute.xlu0 %4558  ;;  %v4564_v60 = vpop.permute.xlu1 %4563 }
 0x32e   : > { %v4561_v62 = vunpack.i.h.bf16 %v4559_v59  ;;  %v4560_v63 = vunpack.i.l.bf16 %v4559_v59  ;;  %v4566_v0 = vunpack.i.h.bf16 %v4564_v60  ;;  %v4565_v55 = vunpack.i.l.bf16 %v4564_v60 }
 0x330   : > { %v907_v9 = vsel %vm700_vm8, %v4560_v63, %v4561_v62  ;;  %v920_v10 = vsel %vm714_vm7, %v4565_v55, %v4566_v0  ;;  %v906_v11 = vsel %vm700_vm8, %v901_v57, %v4560_v63  ;;  %v919_v12 = vsel %vm714_vm7, %v914_v50, %v4565_v55 }
 0x331   : > { %v950_v13 = vpop.permute.xlu0 %949  ;;  %v4569_v61 = vpop.permute.xlu1 %4568  ;;  %v985_v15 = vpack.c.bf16 %v920_v10, %v907_v9  ;;  %v984_v17 = vpack.c.bf16 %v919_v12, %v906_v11  ;;  %v966_v50 = vsel %vm764_vm11, %v4555_v26, %v4556_v23 }
 0x332   : > { %v4571_v19 = vunpack.i.h.bf16 %v4569_v61  ;;  %v4570_v22 = vunpack.i.l.bf16 %v4569_v61 }
 0x333   : > { %1008 = vmatprep.subr.bf16.mxu1 %v985_v15 }
 0x334   : > { %1009 = vmatpush1.bf16.msra.mxu1 %v984_v17  ;;  %v943_v31 = vsel %vm739_vm9, %v4570_v22, %v4571_v19  ;;  %v942_v18 = vsel %vm739_vm9, %v937_v58, %v4570_v22 }
 0x335   : > { %v4574_v35 = vpop.permute.xlu0 %4573  ;;  %v960_v38 = vpop.permute.xlu1 %959  ;;  %v987_v39 = vpack.c.bf16 %v943_v31, %v930_v29  ;;  %v986_v40 = vpack.c.bf16 %v942_v18, %v929_v21 }
 0x336   : > { %v4576_v41 = vunpack.i.h.bf16 %v4574_v35  ;;  %v4575_v44 = vunpack.i.l.bf16 %v4574_v35  ;;  %v965_v36 = vsel %vm764_vm11, %v960_v38, %v4555_v26 }
 0x337   : > { %1010 = vmatprep.subr.bf16.mxu1 %v987_v39 }
 0x338   : > { %v955_v45 = vsel %vm753_vm12, %v950_v13, %v4575_v44  ;;  %1011 = vmatpush1.bf16.msra.mxu1 %v986_v40  ;;  %v956_v49 = vsel %vm753_vm12, %v4575_v44, %v4576_v41 }
 0x339   : > { %v988_v51 = vpack.c.bf16 %v965_v36, %v955_v45  ;;  %v4579_v32 = vpop.permute.xlu0 %4578  ;;  %v989_v54 = vpack.c.bf16 %v966_v50, %v956_v49  ;;  %v977_v59 = vpop.permute.xlu1 %976 }
 0x33a   : > { %v4581_v57 = vunpack.i.h.bf16 %v4579_v32  ;;  %v4580_v58 = vunpack.i.l.bf16 %v4579_v32 }
 0x33b   : > { %1012 = vmatprep.subr.bf16.mxu1 %v989_v54 }
 0x33c   : > { %v979_v60 = vsel %vm778_vm13, %v4581_v57, %v977_v59  ;;  %1013 = vmatpush1.bf16.msra.mxu1 %v988_v51  ;;  %v978_v62 = vsel %vm778_vm13, %v4580_v58, %v4581_v57 }
 0x33d   : > { %v991_v63 = vpack.c.bf16 %v979_v60, %v979_v60  ;;  %v990_v0 = vpack.c.bf16 %v978_v62, %v978_v62 }
 0x33f   : > { %4278 = vmatprep.subr.msk.bf16.mxu1 %vm802_vm14, %v991_v63  ;;  %v1001_v55 = vsel %vm802_vm14, %v990_v0, 0  ;;  %v4281_v63 = vld [vmem:[%s6930_s3 + $0x10] sm:$0xff] }
 0x340   : > { %1015 = vmatpush1.bf16.msra.mxu1 %v1001_v55 }
 0x343   : > { %4279 = vmatmul.mubr.msk.bf16.vlgmr.msra.gmra.mrb[0].mxu1 %vm798_vm15, %v4276_v7 }
 0x344   : > { %1434 = vmatprep.mubr.bf16.mxu1 %v5297_v56 }
 0x34a   : > { %v995_v53 = vpop.permute.xlu0 %994 }
 0x416   : > { %v1040_v9 = vpop.f32.mrb[0].mxu1 }
 0x417   : > { %v1041_v10 = vadd.f32 %v1040_v9, %v995_v53  ;;  %v1042_v11 = vpop.f32.mrb[1].mxu1 }
 0x418   : > { %v1043_v12 = vadd.f32 %v1042_v11, %v995_v53  ;;  %v1044_v13 = vpop.f32.mrb[2].mxu1 }
 0x419   : > { %v5722_v61 = vadd.f32 %v1041_v10, %v5486_v5  ;;  %v1045_v15 = vpop.f32.mrb[3].mxu1 }
 0x41a   : > { %v5725_v17 = vadd.f32 %v1043_v12, %v5488_v6 }
 0x41b   : > { %v1049_v19 = vmax.f32 %v5722_v61, 0.0 }
 0x41c   : > { %v1050_v22 = vmax.f32 %v5725_v17, 0.0 }
 0x41d   : > { %1057 = vrot.lane.b32.xlu1 %v1049_v19, %s6968_s27 }
 0x41e   : > { %1059 = vrot.lane.b32.xlu0 %v1050_v22, %s6968_s27 }
 0x48f   : > { %v1058_v23 = vpop.permute.xlu1 %1057 }
 0x490   : > { %v1065_v5 = vsel %vm568_vm0, 0.0, %v1058_v23  ;;  %v1060_v26 = vpop.permute.xlu0 %1059 }
 0x491   : > { %v1061_v29 = vsel %vm568_vm0, %v1058_v23, %v1060_v26  ;;  %v1066_v6 = vsel %vm568_vm0, %v1060_v26, 0.0  ;;  %1122 = vrot.lane.b32.xlu1 %v1065_v5, %s6972_s15  ;;  %1086 = vrot.lane.b32.xlu0 %v1065_v5, %s5290_s20  ;;  %v1072_v21 = vmul.f32 %v1065_v5, %v5542_v25  ;;  %v1075_v18 = vmul.f32 %v1065_v5, %v5550_v28 }
 0x492   : > { %v4592_v31 = vpack.i.bf16 %v1066_v6, %v1061_v29  ;;  %v1069_v35 = vmul.f32 %v1065_v5, %v5531_v20  ;;  %v1073_v38 = vmul.f32 %v1061_v29, %v5557_v30  ;;  %v1074_v39 = vmul.f32 %v1066_v6, %v5546_v27 }
 0x493   : > { %v1070_v40 = vmul.f32 %v1061_v29, %v5565_v33  ;;  %v1071_v41 = vmul.f32 %v1066_v6, %v5538_v24  ;;  %v1076_v36 = vmul.f32 %v1061_v29, %v5578_v37  ;;  %v1077_v49 = vmul.f32 %v1066_v6, %v5567_v34 }
 0x494   : > { %v4602_v44 = vpack.i.bf16 %v1074_v39, %v1073_v38  ;;  %v1078_v51 = vmul.f32 %v1065_v5, %v5585_v42  ;;  %v1079_v32 = vmul.f32 %v1061_v29, %v5594_v46  ;;  %v1080_v54 = vmul.f32 %v1066_v6, %v5587_v43 }
 0x495   : > { %4593 = vrot.lane.b32.xlu0 %v4592_v31, %s6966_s21  ;;  %4583 = vrot.lane.b32.xlu1 %v4592_v31, %s5290_s20  ;;  %v4597_v45 = vpack.i.bf16 %v1071_v41, %v1070_v40  ;;  %v4607_v50 = vpack.i.bf16 %v1077_v49, %v1076_v36  ;;  %v1081_v58 = vmul.f32 %v1065_v5, %v5600_v48 }
 0x496   : > { %v4612_v57 = vpack.i.bf16 %v1080_v54, %v1079_v32  ;;  %v1082_v59 = vmul.f32 %v1061_v29, %v5610_v52  ;;  %v1083_v60 = vmul.f32 %v1066_v6, %v5596_v47  ;;  %v1068_v11 = vmul.f32 %v1061_v29, %v5511_v16 }
 0x497   : > { %v1067_v12 = vmul.f32 %v1065_v5, %v5507_v14 }
 0x498   : > { %v4617_v62 = vpack.i.bf16 %v1082_v59, %v1081_v58 }
 0x499   : > { %1112 = vrot.lane.b32.xlu0 %v1072_v21, %s6974_s18  ;;  %4588 = vrot.lane.b32.xlu1 %v4592_v31, %s6972_s15 }
 0x49d   : > { %1135 = vrot.lane.b32.xlu0 %v1075_v18, %s6970_s24  ;;  %1099 = vrot.lane.b32.xlu1 %v1069_v35, %s5295_s25 }
 0x4a1   : > { %4603 = vrot.lane.b32.xlu0 %v4602_v44, %s6974_s18  ;;  %4598 = vrot.lane.b32.xlu1 %v4597_v45, %s5295_s25 }
 0x4a5   : > { %4608 = vrot.lane.b32.xlu0 %v4607_v50, %s6970_s24  ;;  %1148 = vrot.lane.b32.xlu1 %v1078_v51, %s6952_s23 }
 0x4a9   : > { %1158 = vrot.lane.b32.xlu0 %v1065_v5, %s6966_s21  ;;  %4613 = vrot.lane.b32.xlu1 %v4612_v57, %s6952_s23 }
 0x4ad   : > { %1175 = vrot.lane.b32.xlu0 %v1083_v60, %s6950_s26  ;;  %4618 = vrot.lane.b32.xlu1 %v4617_v62, %s6950_s26 }
 0x4b1   : > { %1193 = vperm.xlu1 %4622, %v4281_v63  }
 0x503   : > { %v1123_v0 = vpop.permute.xlu1 %1122  ;;  %v1087_v55 = vpop.permute.xlu0 %1086 }
 0x507   : > { %v4594_v7 = vpop.permute.xlu0 %4593  ;;  %v4584_v53 = vpop.permute.xlu1 %4583 }
 0x508   : > { %v4586_v9 = vunpack.i.h.bf16 %v4584_v53  ;;  %v4585_v10 = vunpack.i.l.bf16 %v4584_v53  ;;  %v4596_v60 = vunpack.i.h.bf16 %v4594_v7  ;;  %v4595_v62 = vunpack.i.l.bf16 %v4594_v7 }
 0x50a   : > { %v1092_v13 = vsel %vm686_vm6, %v1087_v55, %v4585_v10  ;;  %v1093_v15 = vsel %vm686_vm6, %v4585_v10, %v4586_v9 }
 0x50b   : > { %v1113_v23 = vpop.permute.xlu0 %1112  ;;  %v4589_v26 = vpop.permute.xlu1 %4588  ;;  %v1182_v6 = vpack.c.bf16 %v1093_v15, %v1068_v11  ;;  %v1181_v31 = vpack.c.bf16 %v1092_v13, %v1067_v12 }
 0x50c   : > { %v4591_v44 = vunpack.i.h.bf16 %v4589_v26  ;;  %v4590_v5 = vunpack.i.l.bf16 %v4589_v26 }
 0x50d   : > { %1205 = vmatprep.subr.bf16.mxu0 %v1182_v6  ;;  %v1165_v6 = vsel %vm764_vm11, %v4595_v62, %v4596_v60 }
 0x50e   : > { %1206 = vmatpush1.bf16.msra.mxu0 %v1181_v31  ;;  %v1128_v63 = vsel %vm725_vm10, %v1123_v0, %v4590_v5  ;;  %v1129_v53 = vsel %vm725_vm10, %v4590_v5, %v4591_v44 }
 0x50f   : > { %v1136_v21 = vpop.permute.xlu0 %1135  ;;  %v1100_v18 = vpop.permute.xlu1 %1099 }
 0x513   : > { %v4604_v35 = vpop.permute.xlu0 %4603  ;;  %v4599_v38 = vpop.permute.xlu1 %4598 }
 0x514   : > { %v4606_v39 = vunpack.i.h.bf16 %v4604_v35  ;;  %v4605_v40 = vunpack.i.l.bf16 %v4604_v35  ;;  %v4601_v41 = vunpack.i.h.bf16 %v4599_v38  ;;  %v4600_v29 = vunpack.i.l.bf16 %v4599_v38 }
 0x516   : > { %v1118_v45 = vsel %vm714_vm7, %v1113_v23, %v4605_v40  ;;  %v1105_v36 = vsel %vm700_vm8, %v1100_v18, %v4600_v29  ;;  %v1106_v49 = vsel %vm700_vm8, %v4600_v29, %v4601_v41  ;;  %v1119_v50 = vsel %vm714_vm7, %v4605_v40, %v4606_v39 }
 0x517   : > { %v4609_v51 = vpop.permute.xlu0 %4608  ;;  %v1149_v32 = vpop.permute.xlu1 %1148  ;;  %v1184_v54 = vpack.c.bf16 %v1119_v50, %v1106_v49  ;;  %v1183_v57 = vpack.c.bf16 %v1118_v45, %v1105_v36  ;;  %v4280_v45 = vld [vmem:[%s6929_s2 + $0x8] sm:$0xf] }
 0x518   : > { %v4611_v58 = vunpack.i.h.bf16 %v4609_v51  ;;  %v4610_v59 = vunpack.i.l.bf16 %v4609_v51 }
 0x519   : > { %1207 = vmatprep.subr.bf16.mxu0 %v1184_v54 }
 0x51a   : > { %v1141_v55 = vsel %vm739_vm9, %v1136_v21, %v4610_v59  ;;  %1208 = vmatpush1.bf16.msra.mxu0 %v1183_v57  ;;  %v1142_v9 = vsel %vm739_vm9, %v4610_v59, %v4611_v58 }
 0x51b   : > { %v1159_v10 = vpop.permute.xlu0 %1158  ;;  %v4614_v11 = vpop.permute.xlu1 %4613  ;;  %v1186_v12 = vpack.c.bf16 %v1142_v9, %v1129_v53  ;;  %v1185_v13 = vpack.c.bf16 %v1141_v55, %v1128_v63 }
 0x51c   : > { %v4616_v15 = vunpack.i.h.bf16 %v4614_v11  ;;  %v4615_v23 = vunpack.i.l.bf16 %v4614_v11  ;;  %v1164_v26 = vsel %vm764_vm11, %v1159_v10, %v4595_v62 }
 0x51d   : > { %1209 = vmatprep.subr.bf16.mxu0 %v1186_v12 }
 0x51e   : > { %v1154_v7 = vsel %vm753_vm12, %v1149_v32, %v4615_v23  ;;  %1210 = vmatpush1.bf16.msra.mxu0 %v1185_v13  ;;  %v1155_v0 = vsel %vm753_vm12, %v4615_v23, %v4616_v15 }
 0x51f   : > { %v4619_v31 = vpop.permute.xlu1 %4618  ;;  %v1188_v21 = vpack.c.bf16 %v1165_v6, %v1155_v0  ;;  %v1187_v18 = vpack.c.bf16 %v1164_v26, %v1154_v7  ;;  %v1176_v39 = vpop.permute.xlu0 %1175 }
 0x520   : > { %v4621_v35 = vunpack.i.h.bf16 %v4619_v31  ;;  %v4620_v38 = vunpack.i.l.bf16 %v4619_v31 }
 0x521   : > { %1211 = vmatprep.subr.bf16.mxu0 %v1188_v21 }
 0x522   : > { %1212 = vmatpush1.bf16.msra.mxu0 %v1187_v18  ;;  %v1178_v40 = vsel %vm778_vm13, %v4621_v35, %v1176_v39  ;;  %v1177_v41 = vsel %vm778_vm13, %v4620_v38, %v4621_v35 }
 0x523   : > { %v1190_v29 = vpack.c.bf16 %v1178_v40, %v1178_v40  ;;  %v1189_v44 = vpack.c.bf16 %v1177_v41, %v1177_v41 }
 0x525   : > { %4282 = vmatprep.subr.msk.bf16.mxu0 %vm802_vm14, %v1190_v29  ;;  %v1200_v5 = vsel %vm802_vm14, %v1189_v44, 0 }
 0x526   : > { %1214 = vmatpush1.bf16.msra.mxu0 %v1200_v5  ;;  %v4285_v5 = vld [vmem:[%s6930_s3 + $0x18] sm:$0xff] }
 0x529   : > { %4283 = vmatmul.mubr.msk.bf16.vlgmr.msra.gmra.mrb[4].mxu0 %vm798_vm15, %v4280_v45 }
 0x52a   : > { %1633 = vmatprep.mubr.bf16.mxu0 %v5297_v56 }
 0x530   : > { %v1194_v36 = vpop.permute.xlu1 %1193 }
 0x5fc   : > { %v1239_v49 = vpop.f32.mrb[4].mxu0 }
 0x5fd   : > { %v1240_v50 = vadd.f32 %v1239_v49, %v1194_v36  ;;  %v1241_v51 = vpop.f32.mrb[5].mxu0 }
 0x5fe   : > { %v1242_v32 = vadd.f32 %v1241_v51, %v1194_v36  ;;  %v1243_v54 = vpop.f32.mrb[6].mxu0 }
 0x5ff   : > { %v1246_v57 = vmax.f32 %v1240_v50, 0.0  ;;  %v1244_v58 = vpop.f32.mrb[7].mxu0 }
 0x600   : > { %v1247_v59 = vmax.f32 %v1242_v32, 0.0 }
 0x601   : > { %1254 = vrot.lane.b32.xlu0 %v1246_v57, %s6968_s27 }
 0x602   : > { %1256 = vrot.lane.b32.xlu1 %v1247_v59, %s6968_s27 }
 0x673   : > { %v1255_v60 = vpop.permute.xlu0 %1254 }
 0x674   : > { %v1262_v62 = vsel %vm568_vm0, 0.0, %v1255_v60  ;;  %v1257_v63 = vpop.permute.xlu1 %1256 }
 0x675   : > { %v1258_v55 = vsel %vm568_vm0, %v1255_v60, %v1257_v63  ;;  %v1263_v53 = vsel %vm568_vm0, %v1257_v63, 0.0  ;;  %1319 = vrot.lane.b32.xlu0 %v1262_v62, %s6972_s15  ;;  %1283 = vrot.lane.b32.xlu1 %v1262_v62, %s5290_s20  ;;  %v1269_v10 = vmul.f32 %v1262_v62, %v5542_v25  ;;  %v1272_v11 = vmul.f32 %v1262_v62, %v5550_v28 }
 0x676   : > { %v4633_v9 = vpack.i.bf16 %v1263_v53, %v1258_v55  ;;  %v1266_v12 = vmul.f32 %v1262_v62, %v5531_v20  ;;  %v1270_v13 = vmul.f32 %v1258_v55, %v5557_v30  ;;  %v1271_v15 = vmul.f32 %v1263_v53, %v5546_v27 }
 0x677   : > { %v1267_v23 = vmul.f32 %v1258_v55, %v5565_v33  ;;  %v1268_v26 = vmul.f32 %v1263_v53, %v5538_v24  ;;  %v1273_v6 = vmul.f32 %v1258_v55, %v5578_v37  ;;  %v1274_v31 = vmul.f32 %v1263_v53, %v5567_v34 }
 0x678   : > { %v4643_v7 = vpack.i.bf16 %v1271_v15, %v1270_v13  ;;  %v1275_v18 = vmul.f32 %v1262_v62, %v5585_v42  ;;  %v1276_v35 = vmul.f32 %v1258_v55, %v5594_v46  ;;  %v1277_v38 = vmul.f32 %v1263_v53, %v5587_v43 }
 0x679   : > { %4634 = vrot.lane.b32.xlu1 %v4633_v9, %s6966_s21  ;;  %4624 = vrot.lane.b32.xlu0 %v4633_v9, %s5290_s20  ;;  %v4638_v0 = vpack.i.bf16 %v1268_v26, %v1267_v23  ;;  %v4648_v21 = vpack.i.bf16 %v1274_v31, %v1273_v6  ;;  %v1278_v40 = vmul.f32 %v1262_v62, %v5600_v48 }
 0x67a   : > { %v4653_v39 = vpack.i.bf16 %v1277_v38, %v1276_v35  ;;  %v1279_v41 = vmul.f32 %v1258_v55, %v5610_v52  ;;  %v1280_v29 = vmul.f32 %v1263_v53, %v5596_v47  ;;  %v1265_v54 = vmul.f32 %v1258_v55, %v5511_v16 }
 0x67b   : > { %v1264_v57 = vmul.f32 %v1262_v62, %v5507_v14 }
 0x67c   : > { %v4658_v44 = vpack.i.bf16 %v1279_v41, %v1278_v40 }
 0x67d   : > { %1309 = vrot.lane.b32.xlu1 %v1269_v10, %s6974_s18  ;;  %4629 = vrot.lane.b32.xlu0 %v4633_v9, %s6972_s15 }
 0x681   : > { %1332 = vrot.lane.b32.xlu1 %v1272_v11, %s6970_s24  ;;  %1296 = vrot.lane.b32.xlu0 %v1266_v12, %s5295_s25 }
 0x685   : > { %4644 = vrot.lane.b32.xlu1 %v4643_v7, %s6974_s18  ;;  %4639 = vrot.lane.b32.xlu0 %v4638_v0, %s5295_s25 }
 0x689   : > { %4649 = vrot.lane.b32.xlu1 %v4648_v21, %s6970_s24  ;;  %1345 = vrot.lane.b32.xlu0 %v1275_v18, %s6952_s23 }
 0x68d   : > { %1355 = vrot.lane.b32.xlu1 %v1262_v62, %s6966_s21  ;;  %4654 = vrot.lane.b32.xlu0 %v4653_v39, %s6952_s23 }
 0x691   : > { %1372 = vrot.lane.b32.xlu1 %v1280_v29, %s6950_s26  ;;  %4659 = vrot.lane.b32.xlu0 %v4658_v44, %s6950_s26 }
 0x695   : > { %1390 = vperm.xlu0 %4541, %v4285_v5  }
 0x6e7   : > { %v1320_v45 = vpop.permute.xlu0 %1319  ;;  %v1284_v36 = vpop.permute.xlu1 %1283 }
 0x6eb   : > { %v4635_v49 = vpop.permute.xlu1 %4634  ;;  %v4625_v50 = vpop.permute.xlu0 %4624 }
 0x6ec   : > { %v4627_v51 = vunpack.i.h.bf16 %v4625_v50  ;;  %v4626_v32 = vunpack.i.l.bf16 %v4625_v50  ;;  %v4637_v29 = vunpack.i.h.bf16 %v4635_v49  ;;  %v4636_v44 = vunpack.i.l.bf16 %v4635_v49 }
 0x6ee   : > { %v1289_v58 = vsel %vm686_vm6, %v1284_v36, %v4626_v32  ;;  %v1290_v59 = vsel %vm686_vm6, %v4626_v32, %v4627_v51 }
 0x6ef   : > { %v1310_v60 = vpop.permute.xlu1 %1309  ;;  %v4630_v63 = vpop.permute.xlu0 %4629  ;;  %v1379_v53 = vpack.c.bf16 %v1290_v59, %v1265_v54  ;;  %v1378_v9 = vpack.c.bf16 %v1289_v58, %v1264_v57 }
 0x6f0   : > { %v4632_v7 = vunpack.i.h.bf16 %v4630_v63  ;;  %v4631_v62 = vunpack.i.l.bf16 %v4630_v63 }
 0x6f1   : > { %1402 = vmatprep.subr.bf16.mxu1 %v1379_v53  ;;  %v1362_v53 = vsel %vm764_vm11, %v4636_v44, %v4637_v29 }
 0x6f2   : > { %1403 = vmatpush1.bf16.msra.mxu1 %v1378_v9  ;;  %v1325_v5 = vsel %vm725_vm10, %v1320_v45, %v4631_v62  ;;  %v1326_v50 = vsel %vm725_vm10, %v4631_v62, %v4632_v7 }
 0x6f3   : > { %v1333_v10 = vpop.permute.xlu1 %1332  ;;  %v1297_v11 = vpop.permute.xlu0 %1296 }
 0x6f7   : > { %v4645_v12 = vpop.permute.xlu1 %4644  ;;  %v4640_v13 = vpop.permute.xlu0 %4639 }
 0x6f8   : > { %v4647_v15 = vunpack.i.h.bf16 %v4645_v12  ;;  %v4646_v23 = vunpack.i.l.bf16 %v4645_v12  ;;  %v4642_v26 = vunpack.i.h.bf16 %v4640_v13  ;;  %v4641_v55 = vunpack.i.l.bf16 %v4640_v13 }
 0x6fa   : > { %v1315_v0 = vsel %vm714_vm7, %v1310_v60, %v4646_v23  ;;  %v1302_v6 = vsel %vm700_vm8, %v1297_v11, %v4641_v55  ;;  %v1303_v31 = vsel %vm700_vm8, %v4641_v55, %v4642_v26  ;;  %v1316_v21 = vsel %vm714_vm7, %v4646_v23, %v4647_v15 }
 0x6fb   : > { %v4650_v18 = vpop.permute.xlu1 %4649  ;;  %v1346_v35 = vpop.permute.xlu0 %1345  ;;  %v1381_v38 = vpack.c.bf16 %v1316_v21, %v1303_v31  ;;  %v1380_v39 = vpack.c.bf16 %v1315_v0, %v1302_v6  ;;  %v4284_v0 = vld [vmem:[%s6929_s2 + $0xc] sm:$0xf] }
 0x6fc   : > { %v4652_v40 = vunpack.i.h.bf16 %v4650_v18  ;;  %v4651_v41 = vunpack.i.l.bf16 %v4650_v18 }
 0x6fd   : > { %1404 = vmatprep.subr.bf16.mxu1 %v1381_v38 }
 0x6fe   : > { %v1338_v36 = vsel %vm739_vm9, %v1333_v10, %v4651_v41  ;;  %1405 = vmatpush1.bf16.msra.mxu1 %v1380_v39  ;;  %v1339_v51 = vsel %vm739_vm9, %v4651_v41, %v4652_v40 }
 0x6ff   : > { %v1356_v32 = vpop.permute.xlu1 %1355  ;;  %v4655_v54 = vpop.permute.xlu0 %4654  ;;  %v1383_v57 = vpack.c.bf16 %v1339_v51, %v1326_v50  ;;  %v1382_v58 = vpack.c.bf16 %v1338_v36, %v1325_v5 }
 0x700   : > { %v4657_v59 = vunpack.i.h.bf16 %v4655_v54  ;;  %v4656_v60 = vunpack.i.l.bf16 %v4655_v54  ;;  %v1361_v63 = vsel %vm764_vm11, %v1356_v32, %v4636_v44 }
 0x701   : > { %1406 = vmatprep.subr.bf16.mxu1 %v1383_v57 }
 0x702   : > { %v1351_v49 = vsel %vm753_vm12, %v1346_v35, %v4656_v60  ;;  %1407 = vmatpush1.bf16.msra.mxu1 %v1382_v58  ;;  %v1352_v45 = vsel %vm753_vm12, %v4656_v60, %v4657_v59 }
 0x703   : > { %v4660_v9 = vpop.permute.xlu0 %4659  ;;  %v1385_v10 = vpack.c.bf16 %v1362_v53, %v1352_v45  ;;  %v1384_v11 = vpack.c.bf16 %v1361_v63, %v1351_v49  ;;  %v1373_v15 = vpop.permute.xlu1 %1372 }
 0x704   : > { %v4662_v12 = vunpack.i.h.bf16 %v4660_v9  ;;  %v4661_v13 = vunpack.i.l.bf16 %v4660_v9 }
 0x705   : > { %1408 = vmatprep.subr.bf16.mxu1 %v1385_v10 }
 0x706   : > { %1409 = vmatpush1.bf16.msra.mxu1 %v1384_v11  ;;  %v1375_v23 = vsel %vm778_vm13, %v4662_v12, %v1373_v15  ;;  %v1374_v26 = vsel %vm778_vm13, %v4661_v13, %v4662_v12 }
 0x707   : > { %v1387_v55 = vpack.c.bf16 %v1375_v23, %v1375_v23  ;;  %v1386_v7 = vpack.c.bf16 %v1374_v26, %v1374_v26 }
 0x709   : > { %4286 = vmatprep.subr.msk.bf16.mxu1 %vm802_vm14, %v1387_v55  ;;  %v1397_v62 = vsel %vm802_vm14, %v1386_v7, 0  ;;  %v4289_v55 = vld [vmem:[%s6930_s3 + $0x20] sm:$0xff] }
 0x70a   : > { %1411 = vmatpush1.bf16.msra.mxu1 %v1397_v62 }
 0x70d   : > { %4287 = vmatmul.mubr.msk.bf16.vlgmr.msra.gmra.mrb[4].mxu1 %vm798_vm15, %v4284_v0 }
 0x70e   : > { %1830 = vmatprep.mubr.bf16.mxu1 %v5297_v56 }
 0x714   : > { %v1391_v6 = vpop.permute.xlu0 %1390 }
 0x7e0   : > { %v1436_v31 = vpop.f32.mrb[4].mxu1 }
 0x7e1   : > { %v1437_v21 = vadd.f32 %v1436_v31, %v1391_v6  ;;  %v1438_v18 = vpop.f32.mrb[5].mxu1 }
 0x7e2   : > { %v1439_v35 = vadd.f32 %v1438_v18, %v1391_v6  ;;  %v1440_v38 = vpop.f32.mrb[6].mxu1 }
 0x7e3   : > { %v5863_v39 = vadd.f32 %v1437_v21, %v1049_v19  ;;  %v1441_v40 = vpop.f32.mrb[7].mxu1 }
 0x7e4   : > { %v5867_v41 = vadd.f32 %v1439_v35, %v1050_v22 }
 0x7e5   : > { %v1445_v29 = vmax.f32 %v5863_v39, 0.0  ;;  %v6023_v39 = vld [vmem:[%s545_s16] sm:$0xff] }
 0x7e6   : > { %v1446_v44 = vmax.f32 %v5867_v41, 0.0  ;;  %v2239_v41 = vld [vmem:[%s6934_s7] sm:$0x3] }
 0x7e7   : > { %1453 = vrot.lane.b32.xlu1 %v1445_v29, %s6968_s27 }
 0x7e8   : > { %1455 = vrot.lane.b32.xlu0 %v1446_v44, %s6968_s27 }
 0x859   : > { %v1454_v61 = vpop.permute.xlu1 %1453 }
 0x85a   : > { %v1461_v19 = vsel %vm568_vm0, 0.0, %v1454_v61  ;;  %v1456_v5 = vpop.permute.xlu0 %1455 }
 0x85b   : > { %v1457_v17 = vsel %vm568_vm0, %v1454_v61, %v1456_v5  ;;  %v1462_v22 = vsel %vm568_vm0, %v1456_v5, 0.0  ;;  %1518 = vrot.lane.b32.xlu1 %v1461_v19, %s6972_s15  ;;  %1482 = vrot.lane.b32.xlu0 %v1461_v19, %s5290_s20  ;;  %v1468_v50 = vmul.f32 %v1461_v19, %v5542_v25  ;;  %v1471_v51 = vmul.f32 %v1461_v19, %v5550_v28 }
 0x85c   : > { %v4673_v36 = vpack.i.bf16 %v1462_v22, %v1457_v17  ;;  %v1465_v32 = vmul.f32 %v1461_v19, %v5531_v20  ;;  %v1469_v54 = vmul.f32 %v1457_v17, %v5557_v30  ;;  %v1470_v57 = vmul.f32 %v1462_v22, %v5546_v27 }
 0x85d   : > { %v1466_v58 = vmul.f32 %v1457_v17, %v5565_v33  ;;  %v1467_v59 = vmul.f32 %v1462_v22, %v5538_v24  ;;  %v1472_v49 = vmul.f32 %v1457_v17, %v5578_v37  ;;  %v1473_v45 = vmul.f32 %v1462_v22, %v5567_v34 }
 0x85e   : > { %v4683_v60 = vpack.i.bf16 %v1470_v57, %v1469_v54  ;;  %v1474_v9 = vmul.f32 %v1461_v19, %v5585_v42  ;;  %v1475_v10 = vmul.f32 %v1457_v17, %v5594_v46  ;;  %v1476_v11 = vmul.f32 %v1462_v22, %v5587_v43 }
 0x85f   : > { %4674 = vrot.lane.b32.xlu0 %v4673_v36, %s6966_s21  ;;  %4664 = vrot.lane.b32.xlu1 %v4673_v36, %s5290_s20  ;;  %v4678_v63 = vpack.i.bf16 %v1467_v59, %v1466_v58  ;;  %v4688_v53 = vpack.i.bf16 %v1473_v45, %v1472_v49  ;;  %v1477_v13 = vmul.f32 %v1461_v19, %v5600_v48 }
 0x860   : > { %v4693_v12 = vpack.i.bf16 %v1476_v11, %v1475_v10  ;;  %v1478_v15 = vmul.f32 %v1457_v17, %v5610_v52  ;;  %v1479_v23 = vmul.f32 %v1462_v22, %v5596_v47  ;;  %v1464_v18 = vmul.f32 %v1457_v17, %v5511_v16 }
 0x861   : > { %v1463_v35 = vmul.f32 %v1461_v19, %v5507_v14 }
 0x862   : > { %v4698_v26 = vpack.i.bf16 %v1478_v15, %v1477_v13 }
 0x863   : > { %1508 = vrot.lane.b32.xlu0 %v1468_v50, %s6974_s18  ;;  %4669 = vrot.lane.b32.xlu1 %v4673_v36, %s6972_s15 }
 0x867   : > { %1531 = vrot.lane.b32.xlu0 %v1471_v51, %s6970_s24  ;;  %1495 = vrot.lane.b32.xlu1 %v1465_v32, %s5295_s25 }
 0x86b   : > { %4684 = vrot.lane.b32.xlu0 %v4683_v60, %s6974_s18  ;;  %4679 = vrot.lane.b32.xlu1 %v4678_v63, %s5295_s25 }
 0x86f   : > { %4689 = vrot.lane.b32.xlu0 %v4688_v53, %s6970_s24  ;;  %1544 = vrot.lane.b32.xlu1 %v1474_v9, %s6952_s23 }
 0x873   : > { %1554 = vrot.lane.b32.xlu0 %v1461_v19, %s6966_s21  ;;  %4694 = vrot.lane.b32.xlu1 %v4693_v12, %s6952_s23 }
 0x877   : > { %1571 = vrot.lane.b32.xlu0 %v1479_v23, %s6950_s26  ;;  %4699 = vrot.lane.b32.xlu1 %v4698_v26, %s6950_s26 }
 0x87b   : > { %1589 = vperm.xlu1 %4622, %v4289_v55  }
 0x8cd   : > { %v1519_v7 = vpop.permute.xlu1 %1518  ;;  %v1483_v62 = vpop.permute.xlu0 %1482 }
 0x8d1   : > { %v4675_v0 = vpop.permute.xlu0 %4674  ;;  %v4665_v6 = vpop.permute.xlu1 %4664 }
 0x8d2   : > { %v4667_v31 = vunpack.i.h.bf16 %v4665_v6  ;;  %v4666_v21 = vunpack.i.l.bf16 %v4665_v6  ;;  %v4677_v23 = vunpack.i.h.bf16 %v4675_v0  ;;  %v4676_v26 = vunpack.i.l.bf16 %v4675_v0 }
 0x8d4   : > { %v1488_v38 = vsel %vm686_vm6, %v1483_v62, %v4666_v21  ;;  %v1489_v40 = vsel %vm686_vm6, %v4666_v21, %v4667_v31 }
 0x8d5   : > { %v1509_v61 = vpop.permute.xlu0 %1508  ;;  %v4670_v5 = vpop.permute.xlu1 %4669  ;;  %v1578_v22 = vpack.c.bf16 %v1489_v40, %v1464_v18  ;;  %v1577_v36 = vpack.c.bf16 %v1488_v38, %v1463_v35 }
 0x8d6   : > { %v4672_v60 = vunpack.i.h.bf16 %v4670_v5  ;;  %v4671_v19 = vunpack.i.l.bf16 %v4670_v5 }
 0x8d7   : > { %1601 = vmatprep.subr.bf16.mxu0 %v1578_v22  ;;  %v1561_v22 = vsel %vm764_vm11, %v4676_v26, %v4677_v23 }
 0x8d8   : > { %1602 = vmatpush1.bf16.msra.mxu0 %v1577_v36  ;;  %v1524_v55 = vsel %vm725_vm10, %v1519_v7, %v4671_v19  ;;  %v1525_v6 = vsel %vm725_vm10, %v4671_v19, %v4672_v60 }
 0x8d9   : > { %v1532_v50 = vpop.permute.xlu0 %1531  ;;  %v1496_v51 = vpop.permute.xlu1 %1495 }
 0x8dd   : > { %v4685_v32 = vpop.permute.xlu0 %4684  ;;  %v4680_v54 = vpop.permute.xlu1 %4679 }
 0x8de   : > { %v4687_v57 = vunpack.i.h.bf16 %v4685_v32  ;;  %v4686_v58 = vunpack.i.l.bf16 %v4685_v32  ;;  %v4682_v59 = vunpack.i.h.bf16 %v4680_v54  ;;  %v4681_v17 = vunpack.i.l.bf16 %v4680_v54 }
 0x8e0   : > { %v1514_v63 = vsel %vm714_vm7, %v1509_v61, %v4686_v58  ;;  %v1501_v49 = vsel %vm700_vm8, %v1496_v51, %v4681_v17  ;;  %v1502_v45 = vsel %vm700_vm8, %v4681_v17, %v4682_v59  ;;  %v1515_v53 = vsel %vm714_vm7, %v4686_v58, %v4687_v57 }
 0x8e1   : > { %v4690_v9 = vpop.permute.xlu0 %4689  ;;  %v1545_v10 = vpop.permute.xlu1 %1544  ;;  %v1580_v11 = vpack.c.bf16 %v1515_v53, %v1502_v45  ;;  %v1579_v12 = vpack.c.bf16 %v1514_v63, %v1501_v49  ;;  %v4288_v63 = vld [vmem:[%s6929_s2 + $0x10] sm:$0xf] }
 0x8e2   : > { %v4692_v13 = vunpack.i.h.bf16 %v4690_v9  ;;  %v4691_v15 = vunpack.i.l.bf16 %v4690_v9 }
 0x8e3   : > { %1603 = vmatprep.subr.bf16.mxu0 %v1580_v11 }
 0x8e4   : > { %v1537_v62 = vsel %vm739_vm9, %v1532_v50, %v4691_v15  ;;  %1604 = vmatpush1.bf16.msra.mxu0 %v1579_v12  ;;  %v1538_v31 = vsel %vm739_vm9, %v4691_v15, %v4692_v13 }
 0x8e5   : > { %v1555_v21 = vpop.permute.xlu0 %1554  ;;  %v4695_v18 = vpop.permute.xlu1 %4694  ;;  %v1582_v35 = vpack.c.bf16 %v1538_v31, %v1525_v6  ;;  %v1581_v38 = vpack.c.bf16 %v1537_v62, %v1524_v55 }
 0x8e6   : > { %v4697_v40 = vunpack.i.h.bf16 %v4695_v18  ;;  %v4696_v61 = vunpack.i.l.bf16 %v4695_v18  ;;  %v1560_v5 = vsel %vm764_vm11, %v1555_v21, %v4676_v26 }
 0x8e7   : > { %1605 = vmatprep.subr.bf16.mxu0 %v1582_v35 }
 0x8e8   : > { %v1550_v0 = vsel %vm753_vm12, %v1545_v10, %v4696_v61  ;;  %1606 = vmatpush1.bf16.msra.mxu0 %v1581_v38  ;;  %v1551_v7 = vsel %vm753_vm12, %v4696_v61, %v4697_v40 }
 0x8e9   : > { %v4700_v36 = vpop.permute.xlu1 %4699  ;;  %v1584_v50 = vpack.c.bf16 %v1561_v22, %v1551_v7  ;;  %v1583_v51 = vpack.c.bf16 %v1560_v5, %v1550_v0  ;;  %v1572_v57 = vpop.permute.xlu0 %1571 }
 0x8ea   : > { %v4702_v32 = vunpack.i.h.bf16 %v4700_v36  ;;  %v4701_v54 = vunpack.i.l.bf16 %v4700_v36 }
 0x8eb   : > { %1607 = vmatprep.subr.bf16.mxu0 %v1584_v50 }
 0x8ec   : > { %1608 = vmatpush1.bf16.msra.mxu0 %v1583_v51  ;;  %v1574_v58 = vsel %vm778_vm13, %v4702_v32, %v1572_v57  ;;  %v1573_v59 = vsel %vm778_vm13, %v4701_v54, %v4702_v32 }
 0x8ed   : > { %v1586_v17 = vpack.c.bf16 %v1574_v58, %v1574_v58  ;;  %v1585_v60 = vpack.c.bf16 %v1573_v59, %v1573_v59 }
 0x8ef   : > { %4290 = vmatprep.subr.msk.bf16.mxu0 %vm802_vm14, %v1586_v17  ;;  %v1596_v19 = vsel %vm802_vm14, %v1585_v60, 0 }
 0x8f0   : > { %1610 = vmatpush1.bf16.msra.mxu0 %v1596_v19  ;;  %v4293_v19 = vld [vmem:[%s6930_s3 + $0x28] sm:$0xff] }
 0x8f3   : > { %4291 = vmatmul.mubr.msk.bf16.vlgmr.msra.gmra.mrb[8].mxu0 %vm798_vm15, %v4288_v63 }
 0x8f4   : > { %2029 = vmatprep.mubr.bf16.mxu0 %v5297_v56 }
 0x8fa   : > { %v1590_v49 = vpop.permute.xlu1 %1589 }
 0x9c6   : > { %v1635_v45 = vpop.f32.mrb[8].mxu0 }
 0x9c7   : > { %v1636_v53 = vadd.f32 %v1635_v45, %v1590_v49  ;;  %v1637_v9 = vpop.f32.mrb[9].mxu0 }
 0x9c8   : > { %v1638_v10 = vadd.f32 %v1637_v9, %v1590_v49  ;;  %v1639_v11 = vpop.f32.mrb[10].mxu0 }
 0x9c9   : > { %v1642_v12 = vmax.f32 %v1636_v53, 0.0  ;;  %v1640_v13 = vpop.f32.mrb[11].mxu0 }
 0x9ca   : > { %v1643_v15 = vmax.f32 %v1638_v10, 0.0 }
 0x9cb   : > { %1650 = vrot.lane.b32.xlu0 %v1642_v12, %s6968_s27 }
 0x9cc   : > { %1652 = vrot.lane.b32.xlu1 %v1643_v15, %s6968_s27 }
 0xa3d   : > { %v1651_v23 = vpop.permute.xlu0 %1650 }
 0xa3e   : > { %v1658_v26 = vsel %vm568_vm0, 0.0, %v1651_v23  ;;  %v1653_v55 = vpop.permute.xlu1 %1652 }
 0xa3f   : > { %v1654_v62 = vsel %vm568_vm0, %v1651_v23, %v1653_v55  ;;  %v1659_v6 = vsel %vm568_vm0, %v1653_v55, 0.0  ;;  %1715 = vrot.lane.b32.xlu0 %v1658_v26, %s6972_s15  ;;  %1679 = vrot.lane.b32.xlu1 %v1658_v26, %s5290_s20  ;;  %v1665_v21 = vmul.f32 %v1658_v26, %v5542_v25  ;;  %v1668_v18 = vmul.f32 %v1658_v26, %v5550_v28 }
 0xa40   : > { %v4713_v31 = vpack.i.bf16 %v1659_v6, %v1654_v62  ;;  %v1662_v35 = vmul.f32 %v1658_v26, %v5531_v20  ;;  %v1666_v38 = vmul.f32 %v1654_v62, %v5557_v30  ;;  %v1667_v40 = vmul.f32 %v1659_v6, %v5546_v27 }
 0xa41   : > { %v1663_v61 = vmul.f32 %v1654_v62, %v5565_v33  ;;  %v1664_v5 = vmul.f32 %v1659_v6, %v5538_v24  ;;  %v1669_v22 = vmul.f32 %v1654_v62, %v5578_v37  ;;  %v1670_v36 = vmul.f32 %v1659_v6, %v5567_v34 }
 0xa42   : > { %v4723_v0 = vpack.i.bf16 %v1667_v40, %v1666_v38  ;;  %v1671_v51 = vmul.f32 %v1658_v26, %v5585_v42  ;;  %v1672_v32 = vmul.f32 %v1654_v62, %v5594_v46  ;;  %v1673_v54 = vmul.f32 %v1659_v6, %v5587_v43 }
 0xa43   : > { %4714 = vrot.lane.b32.xlu1 %v4713_v31, %s6966_s21  ;;  %4704 = vrot.lane.b32.xlu0 %v4713_v31, %s5290_s20  ;;  %v4718_v7 = vpack.i.bf16 %v1664_v5, %v1663_v61  ;;  %v4728_v50 = vpack.i.bf16 %v1670_v36, %v1669_v22  ;;  %v1674_v58 = vmul.f32 %v1658_v26, %v5600_v48 }
 0xa44   : > { %v4733_v57 = vpack.i.bf16 %v1673_v54, %v1672_v32  ;;  %v1675_v59 = vmul.f32 %v1654_v62, %v5610_v52  ;;  %v1676_v17 = vmul.f32 %v1659_v6, %v5596_v47  ;;  %v1661_v11 = vmul.f32 %v1654_v62, %v5511_v16 }
 0xa45   : > { %v1660_v12 = vmul.f32 %v1658_v26, %v5507_v14 }
 0xa46   : > { %v4738_v60 = vpack.i.bf16 %v1675_v59, %v1674_v58 }
 0xa47   : > { %1705 = vrot.lane.b32.xlu1 %v1665_v21, %s6974_s18  ;;  %4709 = vrot.lane.b32.xlu0 %v4713_v31, %s6972_s15 }
 0xa4b   : > { %1728 = vrot.lane.b32.xlu1 %v1668_v18, %s6970_s24  ;;  %1692 = vrot.lane.b32.xlu0 %v1662_v35, %s5295_s25 }
 0xa4f   : > { %4724 = vrot.lane.b32.xlu1 %v4723_v0, %s6974_s18  ;;  %4719 = vrot.lane.b32.xlu0 %v4718_v7, %s5295_s25 }
 0xa53   : > { %4729 = vrot.lane.b32.xlu1 %v4728_v50, %s6970_s24  ;;  %1741 = vrot.lane.b32.xlu0 %v1671_v51, %s6952_s23 }
 0xa57   : > { %1751 = vrot.lane.b32.xlu1 %v1658_v26, %s6966_s21  ;;  %4734 = vrot.lane.b32.xlu0 %v4733_v57, %s6952_s23  ;;  %s5301_s23 = smov 10  }
 0xa5b   : > { %1768 = vrot.lane.b32.xlu1 %v1676_v17, %s6950_s26  ;;  %4739 = vrot.lane.b32.xlu0 %v4738_v60, %s6950_s26  ;;  %s6986_s26 = smov 94  }
 0xa5f   : > { %1786 = vperm.xlu0 %4541, %v4293_v19  }
 0xab1   : > { %v1716_v63 = vpop.permute.xlu0 %1715  ;;  %v1680_v49 = vpop.permute.xlu1 %1679 }
 0xab5   : > { %v4715_v45 = vpop.permute.xlu1 %4714  ;;  %v4705_v53 = vpop.permute.xlu0 %4704 }
 0xab6   : > { %v4707_v9 = vunpack.i.h.bf16 %v4705_v53  ;;  %v4706_v10 = vunpack.i.l.bf16 %v4705_v53  ;;  %v4717_v17 = vunpack.i.h.bf16 %v4715_v45  ;;  %v4716_v60 = vunpack.i.l.bf16 %v4715_v45 }
 0xab8   : > { %v1685_v13 = vsel %vm686_vm6, %v1680_v49, %v4706_v10  ;;  %v1686_v15 = vsel %vm686_vm6, %v4706_v10, %v4707_v9 }
 0xab9   : > { %v1706_v23 = vpop.permute.xlu1 %1705  ;;  %v4710_v55 = vpop.permute.xlu0 %4709  ;;  %v1775_v6 = vpack.c.bf16 %v1686_v15, %v1661_v11  ;;  %v1774_v31 = vpack.c.bf16 %v1685_v13, %v1660_v12 }
 0xaba   : > { %v4712_v0 = vunpack.i.h.bf16 %v4710_v55  ;;  %v4711_v26 = vunpack.i.l.bf16 %v4710_v55 }
 0xabb   : > { %1798 = vmatprep.subr.bf16.mxu1 %v1775_v6  ;;  %v1758_v6 = vsel %vm764_vm11, %v4716_v60, %v4717_v17 }
 0xabc   : > { %1799 = vmatpush1.bf16.msra.mxu1 %v1774_v31  ;;  %v1721_v19 = vsel %vm725_vm10, %v1716_v63, %v4711_v26  ;;  %v1722_v53 = vsel %vm725_vm10, %v4711_v26, %v4712_v0 }
 0xabd   : > { %v1729_v21 = vpop.permute.xlu1 %1728  ;;  %v1693_v18 = vpop.permute.xlu0 %1692 }
 0xac1   : > { %v4725_v35 = vpop.permute.xlu1 %4724  ;;  %v4720_v38 = vpop.permute.xlu0 %4719 }
 0xac2   : > { %v4727_v40 = vunpack.i.h.bf16 %v4725_v35  ;;  %v4726_v61 = vunpack.i.l.bf16 %v4725_v35  ;;  %v4722_v5 = vunpack.i.h.bf16 %v4720_v38  ;;  %v4721_v62 = vunpack.i.l.bf16 %v4720_v38 }
 0xac4   : > { %v1711_v7 = vsel %vm714_vm7, %v1706_v23, %v4726_v61  ;;  %v1698_v22 = vsel %vm700_vm8, %v1693_v18, %v4721_v62  ;;  %v1699_v36 = vsel %vm700_vm8, %v4721_v62, %v4722_v5  ;;  %v1712_v50 = vsel %vm714_vm7, %v4726_v61, %v4727_v40 }
 0xac5   : > { %v4730_v51 = vpop.permute.xlu1 %4729  ;;  %v1742_v32 = vpop.permute.xlu0 %1741  ;;  %v1777_v54 = vpack.c.bf16 %v1712_v50, %v1699_v36  ;;  %v1776_v57 = vpack.c.bf16 %v1711_v7, %v1698_v22  ;;  %v4292_v7 = vld [vmem:[%s6929_s2 + $0x14] sm:$0xf] }
 0xac6   : > { %v4732_v58 = vunpack.i.h.bf16 %v4730_v51  ;;  %v4731_v59 = vunpack.i.l.bf16 %v4730_v51 }
 0xac7   : > { %1800 = vmatprep.subr.bf16.mxu1 %v1777_v54 }
 0xac8   : > { %v1734_v49 = vsel %vm739_vm9, %v1729_v21, %v4731_v59  ;;  %1801 = vmatpush1.bf16.msra.mxu1 %v1776_v57  ;;  %v1735_v9 = vsel %vm739_vm9, %v4731_v59, %v4732_v58 }
 0xac9   : > { %v1752_v10 = vpop.permute.xlu1 %1751  ;;  %v4735_v11 = vpop.permute.xlu0 %4734  ;;  %v1779_v12 = vpack.c.bf16 %v1735_v9, %v1722_v53  ;;  %v1778_v13 = vpack.c.bf16 %v1734_v49, %v1721_v19  ;;  %v6036_v19 = vrot.slane %v2239_v41, %v5476_v2 }
 0xaca   : > { %v4737_v15 = vunpack.i.h.bf16 %v4735_v11  ;;  %v4736_v23 = vunpack.i.l.bf16 %v4735_v11  ;;  %v1757_v55 = vsel %vm764_vm11, %v1752_v10, %v4716_v60 }
 0xacb   : > { %1802 = vmatprep.subr.bf16.mxu1 %v1779_v12 }
 0xacc   : > { %v1747_v45 = vsel %vm753_vm12, %v1742_v32, %v4736_v23  ;;  %1803 = vmatpush1.bf16.msra.mxu1 %v1778_v13  ;;  %v1748_v63 = vsel %vm753_vm12, %v4736_v23, %v4737_v15 }
 0xacd   : > { %v4740_v31 = vpop.permute.xlu0 %4739  ;;  %v1781_v21 = vpack.c.bf16 %v1758_v6, %v1748_v63  ;;  %v1780_v18 = vpack.c.bf16 %v1757_v55, %v1747_v45  ;;  %v1769_v40 = vpop.permute.xlu1 %1768 }
 0xace   : > { %v4742_v35 = vunpack.i.h.bf16 %v4740_v31  ;;  %v4741_v38 = vunpack.i.l.bf16 %v4740_v31 }
 0xacf   : > { %1804 = vmatprep.subr.bf16.mxu1 %v1781_v21 }
 0xad0   : > { %1805 = vmatpush1.bf16.msra.mxu1 %v1780_v18  ;;  %v1771_v61 = vsel %vm778_vm13, %v4742_v35, %v1769_v40  ;;  %v1770_v5 = vsel %vm778_vm13, %v4741_v38, %v4742_v35 }
 0xad1   : > { %v1783_v62 = vpack.c.bf16 %v1771_v61, %v1771_v61  ;;  %v1782_v0 = vpack.c.bf16 %v1770_v5, %v1770_v5 }
 0xad3   : > { %4294 = vmatprep.subr.msk.bf16.mxu1 %vm802_vm14, %v1783_v62  ;;  %v1793_v26 = vsel %vm802_vm14, %v1782_v0, 0 }
 0xad4   : > { %1807 = vmatpush1.bf16.msra.mxu1 %v1793_v26 }
 0xad7   : > { %4295 = vmatmul.mubr.msk.bf16.vlgmr.msra.gmra.mrb[8].mxu1 %vm798_vm15, %v4292_v7 }
 0xad8   : > { %2226 = vmatprep.mubr.bf16.mxu1 %v5297_v56 }
 0xade   : > { %v1787_v22 = vpop.permute.xlu0 %1786 }
 0xbaa   : > { %v1832_v36 = vpop.f32.mrb[8].mxu1 }
 0xbab   : > { %v1833_v50 = vadd.f32 %v1832_v36, %v1787_v22  ;;  %v1834_v51 = vpop.f32.mrb[9].mxu1 }
 0xbac   : > { %v1835_v32 = vadd.f32 %v1834_v51, %v1787_v22  ;;  %v1836_v54 = vpop.f32.mrb[10].mxu1 }
 0xbad   : > { %v6005_v57 = vadd.f32 %v1833_v50, %v1445_v29  ;;  %v1837_v58 = vpop.f32.mrb[11].mxu1  ;;  %v6028_v29 = vld [vmem:[%s545_s16 + $0x8] sm:$0xff]  ;;  %s6985_s16 = smov 96  }
 0xbae   : > { %v6009_v59 = vadd.f32 %v1835_v32, %v1446_v44  ;;  %v2269_v44 = vrot.slane %v2239_v41, %v5479_v3 }
 0xbaf   : > { %v1841_v17 = vmax.f32 %v6005_v57, 0.0 }
 0xbb0   : > { %v1842_v60 = vmax.f32 %v6009_v59, 0.0 }
 0xbb1   : > { %1849 = vrot.lane.b32.xlu1 %v1841_v17, %s6968_s27 }
 0xbb2   : > { %1851 = vrot.lane.b32.xlu0 %v1842_v60, %s6968_s27 }
 0xbb5   : > { %2248 = vrot.lane.b32.xlu1 %v6023_v39, %s5299_s17 }
 0xbb6   : > { %2250 = vrot.lane.b32.xlu0 %v6028_v29, %s5299_s17 }
 0xbb9   : > { %2271 = vrot.lane.b32.xlu1 %v2269_v44, %s6960_s28  ;;  %s6987_s28 = smov 119  }
 0xbba   : > { %2277 = vrot.lane.b32.xlu0 %v6036_v19, %s5300_s19  ;;  %s5302_s19 = smov 120  }
 0xbbd   : > { %2282 = vrot.lane.b32.xlu1 %v2269_v44, %s5301_s23  ;;  %s6964_s23 = smov 119  }
 0xbbe   : > { %2287 = vrot.lane.b32.xlu0 %v6036_v19, %s6958_s29  ;;  %s6988_s29 = smov 118  }
 0xbc1   : > { %2292 = vrot.lane.b32.xlu1 %v2269_v44, %s6956_s30  ;;  %s6962_s30 = smov 118  }
 0xc23   : > { %v1850_v49 = vpop.permute.xlu1 %1849 }
 0xc24   : > { %v6044_v53 = vsel %vm568_vm0, 0.0, %v1850_v49  ;;  %v1852_v9 = vpop.permute.xlu0 %1851 }
 0xc25   : > { %v6047_v10 = vsel %vm568_vm0, %v1850_v49, %v1852_v9  ;;  %v1858_v11 = vsel %vm568_vm0, %v1852_v9, 0.0  ;;  %1914 = vrot.lane.b32.xlu0 %v6044_v53, %s6972_s15  ;;  %1878 = vrot.lane.b32.xlu1 %v6044_v53, %s5290_s20  ;;  %v1864_v23 = vmul.f32 %v6044_v53, %v5542_v25  ;;  %v1867_v63 = vmul.f32 %v6044_v53, %v5550_v28 }
 0xc26   : > { %v4753_v12 = vpack.i.bf16 %v1858_v11, %v6047_v10  ;;  %v1861_v6 = vmul.f32 %v6044_v53, %v5531_v20  ;;  %v1865_v31 = vmul.f32 %v6047_v10, %v5557_v30  ;;  %v1866_v21 = vmul.f32 %v1858_v11, %v5546_v27 }
 0xc27   : > { %v2249_v15 = vpop.permute.xlu1 %2248  ;;  %v1862_v38 = vmul.f32 %v6047_v10, %v5565_v33  ;;  %v1863_v40 = vmul.f32 %v1858_v11, %v5538_v24  ;;  %v1868_v7 = vmul.f32 %v6047_v10, %v5578_v37  ;;  %v1869_v22 = vmul.f32 %v1858_v11, %v5567_v34 }
 0xc28   : > { %v2251_v13 = vpop.permute.xlu0 %2250  ;;  %v2255_v55 = vsel %vm2254_vm5, 0.0, %v2249_v15  ;;  %v4763_v0 = vpack.i.bf16 %v1866_v21, %v1865_v31  ;;  %v1870_v50 = vmul.f32 %v6044_v53, %v5585_v42  ;;  %v1871_v51 = vmul.f32 %v6047_v10, %v5594_v46 }
 0xc29   : > { %4754 = vrot.lane.b32.xlu1 %v4753_v12, %s6966_s21  ;;  %4744 = vrot.lane.b32.xlu0 %v4753_v12, %s5290_s20  ;;  %v2256_v45 = vsel %vm2254_vm5, 0.0, %v2251_v13  ;;  %v2258_v18 = vsel %vm2257_vm4, %v2255_v55, 0.0  ;;  %v4758_v26 = vpack.i.bf16 %v1863_v40, %v1862_v38  ;;  %v4768_v36 = vpack.i.bf16 %v1869_v22, %v1868_v7 }
 0xc2a   : > { %v2259_v35 = vsel %vm2257_vm4, %v2256_v45, 0.0  ;;  %v6076_v61 = vmul.f32 %v6036_v19, %v2258_v18  ;;  %v1872_v32 = vmul.f32 %v1858_v11, %v5587_v43  ;;  %v1873_v41 = vmul.f32 %v6044_v53, %v5600_v48 }
 0xc2b   : > { %v6079_v5 = vmul.f32 %v6036_v19, %v2259_v35  ;;  %v6097_v54 = vpop.permute.xlu1 %2271  ;;  %v1874_v44 = vmul.f32 %v6047_v10, %v5610_v52  ;;  %v1875_v13 = vmul.f32 %v1858_v11, %v5596_v47  ;;  %v4783_v45 = vpack.i.bf16 %v2259_v35, %v2258_v18 }
 0xc2c   : > { %v4773_v58 = vpack.i.bf16 %v1872_v32, %v1871_v51  ;;  %v6103_v49 = vpop.permute.xlu0 %2277  ;;  %v2274_v9 = vmul.f32 %v6097_v54, %v2258_v18  ;;  %v4297_v32 = vld [vmem:[%s6930_s3 + $0x30] sm:$0xff] }
 0xc2d   : > { %1904 = vrot.lane.b32.xlu1 %v1864_v23, %s6974_s18  ;;  %4749 = vrot.lane.b32.xlu0 %v4753_v12, %s6972_s15  ;;  %v2357_v62 = vpack.c.bf16 %v6079_v5, %v6076_v61  ;;  %v2275_v12 = vmul.f32 %v6097_v54, %v2259_v35  ;;  %v4778_v15 = vpack.i.bf16 %v1874_v44, %v1873_v41 }
 0xc2e   : > { %v2280_v23 = vmul.f32 %v6103_v49, %v2258_v18  ;;  %v2281_v55 = vmul.f32 %v6103_v49, %v2259_v35 }
 0xc30   : > { %v6117_v31 = vpop.permute.xlu0 %2287  ;;  %v4793_v21 = vpack.i.bf16 %v2281_v55, %v2280_v23  ;;  %v1859_v23 = vmul.f32 %v6044_v53, %v5507_v14 }
 0xc31   : > { %1927 = vrot.lane.b32.xlu1 %v1867_v63, %s6970_s24  ;;  %1891 = vrot.lane.b32.xlu0 %v1861_v6, %s5295_s25  ;;  %v4788_v63 = vpack.i.bf16 %v2275_v12, %v2274_v9  ;;  %v6115_v6 = vpop.permute.xlu1 %2282  ;;  %v2290_v11 = vmul.f32 %v6117_v31, %v2258_v18  ;;  %v2291_v40 = vmul.f32 %v6117_v31, %v2259_v35 }
 0xc32   : > { %v2285_v38 = vmul.f32 %v6115_v6, %v2258_v18 }
 0xc33   : > { %v4808_v7 = vpack.i.bf16 %v2291_v40, %v2290_v11 }
 0xc35   : > { %4764 = vrot.lane.b32.xlu1 %v4763_v0, %s6974_s18  ;;  %4759 = vrot.lane.b32.xlu0 %v4758_v26, %s5295_s25  ;;  %v2286_v0 = vmul.f32 %v6115_v6, %v2259_v35  ;;  %v6125_v26 = vpop.permute.xlu1 %2292 }
 0xc37   : > { %v4803_v22 = vpack.i.bf16 %v2286_v0, %v2285_v38 }
 0xc39   : > { %4769 = vrot.lane.b32.xlu1 %v4768_v36, %s6970_s24  ;;  %1940 = vrot.lane.b32.xlu0 %v1870_v50, %s6985_s16  ;;  %v2295_v36 = vmul.f32 %v6125_v26, %v2258_v18  ;;  %v2296_v50 = vmul.f32 %v6125_v26, %v2259_v35  ;;  %v2245_v18 = vld [vmem:[#allocation2 + $0x8] sm:$0xff] }
 0xc3b   : > { %v4818_v51 = vpack.i.bf16 %v2296_v50, %v2295_v36 }
 0xc3d   : > { %1950 = vrot.lane.b32.xlu1 %v6044_v53, %s6966_s21  ;;  %4774 = vrot.lane.b32.xlu0 %v4773_v58, %s6985_s16  ;;  %v2244_v58 = vld [vmem:[#allocation2] sm:$0xff] }
 0xc41   : > { %1967 = vrot.lane.b32.xlu1 %v1875_v13, %s6986_s26  ;;  %4779 = vrot.lane.b32.xlu0 %v4778_v15, %s6986_s26  ;;  %v1860_v15 = vmul.f32 %v6047_v10, %v5511_v16 }
 0xc45   : > { %4784 = vrot.lane.b32.xlu0 %v4783_v45, %s5290_s20  ;;  %4789 = vrot.lane.b32.xlu1 %v4788_v63, %s5295_s25 }
 0xc49   : > { %4794 = vrot.lane.b32.xlu0 %v4793_v21, %s5302_s19  ;;  %4799 = vrot.lane.b32.xlu1 %v4783_v45, %s6964_s23  ;;  %s6994_s23 = smov 34  }
 0xc4d   : > { %4809 = vrot.lane.b32.xlu1 %v4808_v7, %s6974_s18  ;;  %4804 = vrot.lane.b32.xlu0 %v4803_v22, %s6962_s30  ;;  %s6993_s30 = smov 32  }
 0xc51   : > { %4814 = vrot.lane.b32.xlu0 %v4783_v45, %s6972_s15  ;;  %4819 = vrot.lane.b32.xlu1 %v4818_v51, %s6970_s24 }
 0xc55   : > { %1985 = vperm.xlu0 %4541, %v4297_v32   ;;  %2368 = vperm.xlu1 %4622, %v2244_v58  }
 0xc59   : > { %2373 = vperm.xlu0 %4541, %v2245_v18  }
 0xc97   : > { %v1915_v35 = vpop.permute.xlu0 %1914  ;;  %v1879_v41 = vpop.permute.xlu1 %1878 }
 0xc9b   : > { %v4745_v44 = vpop.permute.xlu0 %4744  ;;  %v4755_v9 = vpop.permute.xlu1 %4754 }
 0xc9c   : > { %v4747_v12 = vunpack.i.h.bf16 %v4745_v44  ;;  %v4746_v13 = vunpack.i.l.bf16 %v4745_v44 }
 0xc9e   : > { %v1884_v55 = vsel %vm686_vm6, %v1879_v41, %v4746_v13  ;;  %v1885_v45 = vsel %vm686_vm6, %v4746_v13, %v4747_v12 }
 0xc9f   : > { %v4750_v63 = vpop.permute.xlu0 %4749  ;;  %v1905_v21 = vpop.permute.xlu1 %1904  ;;  %v1974_v38 = vpack.c.bf16 %v1885_v45, %v1860_v15  ;;  %v1973_v11 = vpack.c.bf16 %v1884_v55, %v1859_v23 }
 0xca0   : > { %v4752_v32 = vunpack.i.h.bf16 %v4750_v63  ;;  %v4751_v53 = vunpack.i.l.bf16 %v4750_v63 }
 0xca1   : > { %1997 = vmatprep.subr.bf16.mxu0 %v1974_v38  ;;  %v4757_v38 = vunpack.i.h.bf16 %v4755_v9 }
 0xca2   : > { %1998 = vmatpush1.bf16.msra.mxu0 %v1973_v11  ;;  %v4756_v11 = vunpack.i.l.bf16 %v4755_v9 }
 0xca3   : > { %v1892_v40 = vpop.permute.xlu0 %1891  ;;  %v1928_v0 = vpop.permute.xlu1 %1927 }
 0xca7   : > { %v4760_v7 = vpop.permute.xlu0 %4759  ;;  %v4765_v22 = vpop.permute.xlu1 %4764 }
 0xca8   : > { %v4762_v36 = vunpack.i.h.bf16 %v4760_v7  ;;  %v4761_v50 = vunpack.i.l.bf16 %v4760_v7  ;;  %v4767_v10 = vunpack.i.h.bf16 %v4765_v22  ;;  %v4766_v51 = vunpack.i.l.bf16 %v4765_v22 }
 0xca9   : > { %v1920_v7 = vsel %vm725_vm10, %v1915_v35, %v4751_v53 }
 0xcaa   : > { %v1897_v58 = vsel %vm700_vm8, %v1892_v40, %v4761_v50  ;;  %v1910_v18 = vsel %vm714_vm7, %v1905_v21, %v4766_v51  ;;  %v1898_v41 = vsel %vm700_vm8, %v4761_v50, %v4762_v36  ;;  %v1911_v44 = vsel %vm714_vm7, %v4766_v51, %v4767_v10 }
 0xcab   : > { %v1941_v12 = vpop.permute.xlu0 %1940  ;;  %v4770_v13 = vpop.permute.xlu1 %4769  ;;  %v1976_v15 = vpack.c.bf16 %v1911_v44, %v1898_v41  ;;  %v1975_v23 = vpack.c.bf16 %v1910_v18, %v1897_v58  ;;  %v1921_v21 = vsel %vm725_vm10, %v4751_v53, %v4752_v32 }
 0xcac   : > { %v4772_v55 = vunpack.i.h.bf16 %v4770_v13  ;;  %v4771_v45 = vunpack.i.l.bf16 %v4770_v13 }
 0xcad   : > { %1999 = vmatprep.subr.bf16.mxu0 %v1976_v15 }
 0xcae   : > { %v1933_v63 = vsel %vm739_vm9, %v1928_v0, %v4771_v45  ;;  %2000 = vmatpush1.bf16.msra.mxu0 %v1975_v23  ;;  %v1934_v40 = vsel %vm739_vm9, %v4771_v45, %v4772_v55  ;;  %v1957_v0 = vsel %vm764_vm11, %v4756_v11, %v4757_v38 }
 0xcaf   : > { %v4775_v22 = vpop.permute.xlu0 %4774  ;;  %v1951_v36 = vpop.permute.xlu1 %1950  ;;  %v1978_v50 = vpack.c.bf16 %v1934_v40, %v1921_v21  ;;  %v1977_v10 = vpack.c.bf16 %v1933_v63, %v1920_v7  ;;  %v4296_v21 = vld [vmem:[%s6929_s2 + $0x18] sm:$0xf]  ;;  %v5183_v40 = vld [vmem:[%s6932_s5 + $0x4] ss:$8 sps:$4 sm:$0xff]  }
 0xcb0   : > { %v4777_v51 = vunpack.i.h.bf16 %v4775_v22  ;;  %v4776_v58 = vunpack.i.l.bf16 %v4775_v22  ;;  %v1956_v9 = vsel %vm764_vm11, %v1951_v36, %v4756_v11 }
 0xcb1   : > { %2001 = vmatprep.subr.bf16.mxu0 %v1978_v50 }
 0xcb2   : > { %v1946_v18 = vsel %vm753_vm12, %v1941_v12, %v4776_v58  ;;  %2002 = vmatpush1.bf16.msra.mxu0 %v1977_v10  ;;  %v1947_v35 = vsel %vm753_vm12, %v4776_v58, %v4777_v51 }
 0xcb3   : > { %v1979_v41 = vpack.c.bf16 %v1956_v9, %v1946_v18  ;;  %v4780_v32 = vpop.permute.xlu0 %4779  ;;  %v1980_v53 = vpack.c.bf16 %v1957_v0, %v1947_v35  ;;  %v1968_v15 = vpop.permute.xlu1 %1967 }
 0xcb4   : > { %v4782_v44 = vunpack.i.h.bf16 %v4780_v32  ;;  %v4781_v13 = vunpack.i.l.bf16 %v4780_v32 }
 0xcb5   : > { %2003 = vmatprep.subr.bf16.mxu0 %v1980_v53 }
 0xcb6   : > { %v1970_v23 = vsel %vm778_vm13, %v4782_v44, %v1968_v15  ;;  %2004 = vmatpush1.bf16.msra.mxu0 %v1979_v41  ;;  %v1969_v55 = vsel %vm778_vm13, %v4781_v13, %v4782_v44 }
 0xcb7   : > { %v1982_v12 = vpack.c.bf16 %v1970_v23, %v1970_v23  ;;  %v1981_v45 = vpack.c.bf16 %v1969_v55, %v1969_v55  ;;  %v4785_v7 = vpop.permute.xlu0 %4784  ;;  %v4790_v36 = vpop.permute.xlu1 %4789 }
 0xcb8   : > { %v4787_v38 = vunpack.i.h.bf16 %v4785_v7  ;;  %v4786_v11 = vunpack.i.l.bf16 %v4785_v7  ;;  %v4792_v50 = vunpack.i.h.bf16 %v4790_v36  ;;  %v4791_v10 = vunpack.i.l.bf16 %v4790_v36 }
 0xcb9   : > { %4298 = vmatprep.subr.msk.bf16.mxu0 %vm802_vm14, %v1982_v12  ;;  %v1992_v63 = vsel %vm802_vm14, %v1981_v45, 0 }
 0xcba   : > { %2006 = vmatpush1.bf16.msra.mxu0 %v1992_v63  ;;  %v2358_v22 = vpack.c.bf16 %v4787_v38, %v4786_v11  ;;  %v2359_v58 = vpack.c.bf16 %v4792_v50, %v4791_v10 }
 0xcbb   : > { %2388 = vmatprep.subr.bf16.mxu0 %v5297_v56  ;;  %v4795_v51 = vpop.permute.xlu0 %4794  ;;  %v4800_v35 = vpop.permute.xlu1 %4799 }
 0xcbc   : > { %v4797_v18 = vunpack.i.h.bf16 %v4795_v51  ;;  %v4796_v9 = vunpack.i.l.bf16 %v4795_v51  ;;  %v4802_v5 = vunpack.i.h.bf16 %v4800_v35 }
 0xcbd   : > { %4299 = vmatmul.mubr.msk.bf16.vlgmr.msra.gmra.mrb[12].mxu0 %vm798_vm15, %v4296_v21 }
 0xcbe   : > { %2389 = vmatpush1.bf16.msra.mxu0 %v2357_v62  ;;  %4306 = vmatprep.mubr.msk.bf16.mxu0 %vm634_vm1, %v5183_v40  ;;  %v2360_v61 = vpack.c.bf16 %v4797_v18, %v4796_v9  ;;  %v4801_v62 = vunpack.i.l.bf16 %v4800_v35 }
 0xcbf   : > { %2390 = vmatprep.subr.bf16.mxu0 %v5297_v56  ;;  %v4805_v0 = vpop.permute.xlu0 %4804  ;;  %v4810_v44 = vpop.permute.xlu1 %4809 }
 0xcc0   : > { %v2361_v41 = vpack.c.bf16 %v4802_v5, %v4801_v62  ;;  %v4807_v32 = vunpack.i.h.bf16 %v4805_v0  ;;  %v4806_v53 = vunpack.i.l.bf16 %v4805_v0  ;;  %v4812_v15 = vunpack.i.h.bf16 %v4810_v44 }
 0xcc1   : > { %v4811_v23 = vunpack.i.l.bf16 %v4810_v44 }
 0xcc2   : > { %2391 = vmatpush1.bf16.msra.mxu0 %v2358_v22  ;;  %v2362_v13 = vpack.c.bf16 %v4807_v32, %v4806_v53  ;;  %v5185_v22 = vld [vmem:[%s6932_s5] ss:$8 sps:$4 sm:$0xff]  }
 0xcc3   : > { %2392 = vmatprep.subr.bf16.mxu0 %v5297_v56  ;;  %v4815_v55 = vpop.permute.xlu0 %4814  ;;  %v2363_v12 = vpack.c.bf16 %v4812_v15, %v4811_v23  ;;  %v4820_v63 = vpop.permute.xlu1 %4819 }
 0xcc4   : > { %v4817_v45 = vunpack.i.h.bf16 %v4815_v55  ;;  %v4816_v7 = vunpack.i.l.bf16 %v4815_v55  ;;  %v4822_v11 = vunpack.i.h.bf16 %v4820_v63  ;;  %v4821_v21 = vunpack.i.l.bf16 %v4820_v63 }
 0xcc6   : > { %2393 = vmatpush1.bf16.msra.mxu0 %v2359_v58  ;;  %v2364_v38 = vpack.c.bf16 %v4817_v45, %v4816_v7  ;;  %v2365_v40 = vpack.c.bf16 %v4822_v11, %v4821_v21 }
 0xcc7   : > { %2394 = vmatprep.subr.bf16.mxu0 %v5297_v56 }
 0xcca   : > { %2395 = vmatpush1.bf16.msra.mxu0 %v2360_v61 }
 0xccb   : > { %2396 = vmatprep.subr.bf16.mxu0 %v5297_v56 }
 0xcce   : > { %2397 = vmatpush1.bf16.msra.mxu0 %v2361_v41 }
 0xccf   : > { %2398 = vmatprep.subr.bf16.mxu0 %v5297_v56 }
 0xcd2   : > { %2399 = vmatpush1.bf16.msra.mxu0 %v2362_v13 }
 0xcd3   : > { %2400 = vmatprep.subr.bf16.mxu0 %v5297_v56 }
 0xcd4   : > { %v1986_v36 = vpop.permute.xlu0 %1985  ;;  %v2369_v5 = vpop.permute.xlu1 %2368 }
 0xcd6   : > { %2401 = vmatpush1.bf16.msra.mxu0 %v2363_v12 }
 0xcd7   : > { %2402 = vmatprep.subr.bf16.mxu0 %v5297_v56 }
 0xcd8   : > { %v2374_v32 = vpop.permute.xlu0 %2373 }
 0xcda   : > { %2403 = vmatpush1.bf16.msra.mxu0 %v2364_v38 }
 0xcdb   : > { %2404 = vmatprep.subr.bf16.mxu0 %v5297_v56 }
 0xcde   : > { %2405 = vmatpush1.bf16.msra.mxu0 %v2365_v40 }
 0xcdf   : > { %2718 = vmatprep.subr.bf16.mxu0 %v5297_v56 }
 0xce1   : > { %2421 = vmatmul.mubr.bf16.vlgmr.msra.gmra.mrb[16].mxu0 %v5185_v22 }
 0xd90   : > { %v2031_v50 = vpop.f32.mrb[12].mxu0 }
 0xd91   : > { %v2032_v10 = vadd.f32 %v2031_v50, %v1986_v36  ;;  %v2033_v51 = vpop.f32.mrb[13].mxu0 }
 0xd92   : > { %v2034_v58 = vadd.f32 %v2033_v51, %v1986_v36  ;;  %v2035_v18 = vpop.f32.mrb[14].mxu0 }
 0xd93   : > { %v2038_v9 = vmax.f32 %v2032_v10, 0.0  ;;  %v2036_v35 = vpop.f32.mrb[15].mxu0 }
 0xd94   : > { %v2039_v61 = vmax.f32 %v2034_v58, 0.0 }
 0xd95   : > { %2046 = vrot.lane.b32.xlu1 %v2038_v9, %s6968_s27 }
 0xd96   : > { %2048 = vrot.lane.b32.xlu0 %v2039_v61, %s6968_s27 }
 0xdb4   : > { %v2422_v62 = vpop.f32.mrb[16].mxu0 }
 0xdb5   : > { %v2423_v0 = vadd.f32 %v2422_v62, %v2369_v5  ;;  %v2424_v41 = vpop.f32.mrb[17].mxu0 }
 0xdb6   : > { %v2425_v53 = vpop.f32.mrb[18].mxu0 }
 0xdb7   : > { %v2429_v44 = vmax.f32 %v2423_v0, 0.0  ;;  %v2426_v13 = vadd.f32 %v2425_v53, %v2374_v32  ;;  %v2427_v15 = vpop.f32.mrb[19].mxu0 }
 0xdb9   : > { %v2430_v23 = vmax.f32 %v2426_v13, 0.0  ;;  %2439 = vrot.lane.b32.xlu1 %v2429_v44, %s5299_s17 }
 0xdbb   : > { %2441 = vrot.lane.b32.xlu0 %v2430_v23, %s5299_s17 }
 0xe07   : > { %v2047_v55 = vpop.permute.xlu1 %2046 }
 0xe08   : > { %v6189_v12 = vsel %vm568_vm0, 0.0, %v2047_v55  ;;  %v2049_v45 = vpop.permute.xlu0 %2048 }
 0xe09   : > { %v6192_v7 = vsel %vm568_vm0, %v2047_v55, %v2049_v45  ;;  %v2055_v63 = vsel %vm568_vm0, %v2049_v45, 0.0  ;;  %2111 = vrot.lane.b32.xlu1 %v6189_v12, %s6972_s15  ;;  %2075 = vrot.lane.b32.xlu0 %v6189_v12, %s5290_s20  ;;  %v2061_v11 = vmul.f32 %v6189_v12, %v5542_v25  ;;  %v2064_v21 = vmul.f32 %v6189_v12, %v5550_v28 }
 0xe0a   : > { %v4833_v38 = vpack.i.bf16 %v2055_v63, %v6192_v7  ;;  %v2058_v40 = vmul.f32 %v6189_v12, %v5531_v20  ;;  %v2062_v22 = vmul.f32 %v6192_v7, %v5557_v30  ;;  %v2063_v36 = vmul.f32 %v2055_v63, %v5546_v27 }
 0xe0b   : > { %v2059_v50 = vmul.f32 %v6192_v7, %v5565_v33  ;;  %v2060_v25 = vmul.f32 %v2055_v63, %v5538_v24  ;;  %v2065_v28 = vmul.f32 %v6192_v7, %v5578_v37  ;;  %v2066_v20 = vmul.f32 %v2055_v63, %v5567_v34 }
 0xe0c   : > { %v4843_v10 = vpack.i.bf16 %v2063_v36, %v2062_v22  ;;  %v2067_v30 = vmul.f32 %v6189_v12, %v5585_v42  ;;  %v2068_v24 = vmul.f32 %v6192_v7, %v5594_v46  ;;  %v2069_v33 = vmul.f32 %v2055_v63, %v5587_v43  ;;  %v2435_v22 = vld [vmem:[#allocation2 + $0x10] sm:$0xff]  ;;  %v2436_v36 = vld [vmem:[#allocation2 + $0x18] sm:$0xff] }
 0xe0d   : > { %4834 = vrot.lane.b32.xlu0 %v4833_v38, %s6966_s21  ;;  %4824 = vrot.lane.b32.xlu1 %v4833_v38, %s5290_s20  ;;  %v4838_v51 = vpack.i.bf16 %v2060_v25, %v2059_v50  ;;  %v4848_v27 = vpack.i.bf16 %v2066_v20, %v2065_v28  ;;  %v2070_v34 = vmul.f32 %v6189_v12, %v5600_v48 }
 0xe0e   : > { %v4853_v37 = vpack.i.bf16 %v2069_v33, %v2068_v24  ;;  %v2071_v58 = vmul.f32 %v6192_v7, %v5610_v52  ;;  %v2072_v42 = vmul.f32 %v2055_v63, %v5596_v47 }
 0xe10   : > { %v4858_v46 = vpack.i.bf16 %v2071_v58, %v2070_v34 }
 0xe11   : > { %2101 = vrot.lane.b32.xlu0 %v2061_v11, %s6974_s18  ;;  %4829 = vrot.lane.b32.xlu1 %v4833_v38, %s6972_s15 }
 0xe15   : > { %2124 = vrot.lane.b32.xlu0 %v2064_v21, %s6970_s24  ;;  %2088 = vrot.lane.b32.xlu1 %v2058_v40, %s5295_s25 }
 0xe19   : > { %4844 = vrot.lane.b32.xlu0 %v4843_v10, %s6974_s18  ;;  %4839 = vrot.lane.b32.xlu1 %v4838_v51, %s5295_s25 }
 0xe1d   : > { %4849 = vrot.lane.b32.xlu0 %v4848_v27, %s6970_s24  ;;  %2137 = vrot.lane.b32.xlu1 %v2067_v30, %s6985_s16  ;;  %v2057_v27 = vmul.f32 %v6192_v7, %v5511_v16  ;;  %v2056_v30 = vmul.f32 %v6189_v12, %v5507_v14 }
 0xe21   : > { %2147 = vrot.lane.b32.xlu0 %v6189_v12, %s6966_s21  ;;  %4854 = vrot.lane.b32.xlu1 %v4853_v37, %s6985_s16  ;;  %s6997_s21 = smov 111  }
 0xe25   : > { %2164 = vrot.lane.b32.xlu0 %v2072_v42, %s6986_s26  ;;  %4859 = vrot.lane.b32.xlu1 %v4858_v46, %s6986_s26 }
 0xe2b   : > { %v2440_v43 = vpop.permute.xlu1 %2439 }
 0xe2c   : > { %v2445_v18 = vsel %vm2254_vm5, 0.0, %v2440_v43 }
 0xe2d   : > { %v2447_v48 = vsel %vm2257_vm4, %v2445_v18, 0.0  ;;  %v2442_v9 = vpop.permute.xlu0 %2441 }
 0xe2e   : > { %v2446_v52 = vsel %vm2254_vm5, 0.0, %v2442_v9  ;;  %v2451_v5 = vmul.f32 %v2447_v48, %v6097_v54  ;;  %v2453_v41 = vmul.f32 %v2447_v48, %v6103_v49  ;;  %v6250_v32 = vmul.f32 %v2447_v48, %v6036_v19 }
 0xe2f   : > { %v2448_v35 = vsel %vm2257_vm4, %v2446_v52, 0.0  ;;  %v2455_v23 = vmul.f32 %v2447_v48, %v6115_v6  ;;  %v2457_v63 = vmul.f32 %v2447_v48, %v6117_v31  ;;  %v2459_v21 = vmul.f32 %v2447_v48, %v6125_v26 }
 0xe30   : > { %v4863_v61 = vpack.i.bf16 %v2448_v35, %v2447_v48  ;;  %v2452_v47 = vmul.f32 %v2448_v35, %v6097_v54  ;;  %v2454_v62 = vmul.f32 %v2448_v35, %v6103_v49  ;;  %v6253_v53 = vmul.f32 %v2448_v35, %v6036_v19 }
 0xe31   : > { %v2456_v13 = vmul.f32 %v2448_v35, %v6115_v6  ;;  %v2458_v55 = vmul.f32 %v2448_v35, %v6117_v31  ;;  %v2460_v11 = vmul.f32 %v2448_v35, %v6125_v26 }
 0xe32   : > { %4864 = vrot.lane.b32.xlu1 %v4863_v61, %s5290_s20  ;;  %v4868_v0 = vpack.i.bf16 %v2452_v47, %v2451_v5  ;;  %v4873_v44 = vpack.i.bf16 %v2454_v62, %v2453_v41  ;;  %v2521_v15 = vpack.c.bf16 %v6253_v53, %v6250_v32 }
 0xe33   : > { %v4883_v45 = vpack.i.bf16 %v2456_v13, %v2455_v23  ;;  %v4888_v38 = vpack.i.bf16 %v2458_v55, %v2457_v63  ;;  %v4898_v40 = vpack.i.bf16 %v2460_v11, %v2459_v21 }
 0xe34   : > { %4869 = vrot.lane.b32.xlu0 %v4868_v0, %s5295_s25 }
 0xe36   : > { %4874 = vrot.lane.b32.xlu1 %v4873_v44, %s5302_s19 }
 0xe38   : > { %4879 = vrot.lane.b32.xlu0 %v4863_v61, %s6987_s28 }
 0xe3a   : > { %4884 = vrot.lane.b32.xlu1 %v4883_v45, %s6988_s29 }
 0xe3c   : > { %4889 = vrot.lane.b32.xlu0 %v4888_v38, %s6974_s18 }
 0xe3e   : > { %4894 = vrot.lane.b32.xlu1 %v4863_v61, %s6972_s15 }
 0xe40   : > { %4899 = vrot.lane.b32.xlu0 %v4898_v40, %s6970_s24 }
 0xe42   : > { %2532 = vperm.xlu1 %4622, %v2435_v22  }
 0xe44   : > { %2537 = vperm.xlu0 %4541, %v2436_v36  }
 0xe7b   : > { %v2076_v50 = vpop.permute.xlu0 %2075  ;;  %v2112_v25 = vpop.permute.xlu1 %2111 }
 0xe7f   : > { %v4835_v10 = vpop.permute.xlu0 %4834  ;;  %v4825_v51 = vpop.permute.xlu1 %4824 }
 0xe80   : > { %v4827_v28 = vunpack.i.h.bf16 %v4825_v51  ;;  %v4826_v20 = vunpack.i.l.bf16 %v4825_v51  ;;  %v4837_v55 = vunpack.i.h.bf16 %v4835_v10  ;;  %v4836_v45 = vunpack.i.l.bf16 %v4835_v10 }
 0xe82   : > { %v2081_v24 = vsel %vm686_vm6, %v2076_v50, %v4826_v20  ;;  %v2082_v33 = vsel %vm686_vm6, %v4826_v20, %v4827_v28 }
 0xe83   : > { %v2102_v37 = vpop.permute.xlu0 %2101  ;;  %v4830_v34 = vpop.permute.xlu1 %4829  ;;  %v2171_v58 = vpack.c.bf16 %v2082_v33, %v2057_v27  ;;  %v2170_v42 = vpack.c.bf16 %v2081_v24, %v2056_v30  ;;  %v2154_v27 = vsel %vm764_vm11, %v4836_v45, %v4837_v55 }
 0xe84   : > { %v4832_v35 = vunpack.i.h.bf16 %v4830_v34  ;;  %v4831_v14 = vunpack.i.l.bf16 %v4830_v34 }
 0xe85   : > { %2194 = vmatprep.subr.bf16.mxu1 %v2171_v58 }
 0xe86   : > { %2195 = vmatpush1.bf16.msra.mxu1 %v2170_v42  ;;  %v2117_v63 = vsel %vm725_vm10, %v2112_v25, %v4831_v14  ;;  %v2118_v11 = vsel %vm725_vm10, %v4831_v14, %v4832_v35 }
 0xe87   : > { %v2125_v46 = vpop.permute.xlu0 %2124  ;;  %v2089_v43 = vpop.permute.xlu1 %2088 }
 0xe8b   : > { %v4845_v18 = vpop.permute.xlu0 %4844  ;;  %v4840_v48 = vpop.permute.xlu1 %4839 }
 0xe8c   : > { %v4847_v9 = vunpack.i.h.bf16 %v4845_v18  ;;  %v4846_v52 = vunpack.i.l.bf16 %v4845_v18  ;;  %v4842_v16 = vunpack.i.h.bf16 %v4840_v48  ;;  %v4841_v7 = vunpack.i.l.bf16 %v4840_v48 }
 0xe8e   : > { %v2107_v12 = vsel %vm714_vm7, %v2102_v37, %v4846_v52  ;;  %v2094_v61 = vsel %vm700_vm8, %v2089_v43, %v4841_v7  ;;  %v2095_v5 = vsel %vm700_vm8, %v4841_v7, %v4842_v16  ;;  %v2108_v47 = vsel %vm714_vm7, %v4846_v52, %v4847_v9  ;;  %v4300_v9 = vld [vmem:[%s6929_s2 + $0x1c] sm:$0xf] }
 0xe8f   : > { %v4850_v62 = vpop.permute.xlu0 %4849  ;;  %v2138_v0 = vpop.permute.xlu1 %2137  ;;  %v2173_v41 = vpack.c.bf16 %v2108_v47, %v2095_v5  ;;  %v2172_v44 = vpack.c.bf16 %v2107_v12, %v2094_v61  ;;  %v5186_v52 = vld [vmem:[%s6932_s5 + $0x14] ss:$8 sps:$4 sm:$0xff]  }
 0xe90   : > { %v4852_v13 = vunpack.i.h.bf16 %v4850_v62  ;;  %v4851_v23 = vunpack.i.l.bf16 %v4850_v62 }
 0xe91   : > { %2196 = vmatprep.subr.bf16.mxu1 %v2173_v41 }
 0xe92   : > { %v2130_v38 = vsel %vm739_vm9, %v2125_v46, %v4851_v23  ;;  %2197 = vmatpush1.bf16.msra.mxu1 %v2172_v44  ;;  %v2131_v21 = vsel %vm739_vm9, %v4851_v23, %v4852_v13 }
 0xe93   : > { %v2148_v40 = vpop.permute.xlu0 %2147  ;;  %v4855_v22 = vpop.permute.xlu1 %4854  ;;  %v2175_v36 = vpack.c.bf16 %v2131_v21, %v2118_v11  ;;  %v2174_v50 = vpack.c.bf16 %v2130_v38, %v2117_v63 }
 0xe94   : > { %v4857_v51 = vunpack.i.h.bf16 %v4855_v22  ;;  %v4856_v28 = vunpack.i.l.bf16 %v4855_v22  ;;  %v2153_v20 = vsel %vm764_vm11, %v2148_v40, %v4836_v45 }
 0xe95   : > { %2198 = vmatprep.subr.bf16.mxu1 %v2175_v36 }
 0xe96   : > { %v2143_v10 = vsel %vm753_vm12, %v2138_v0, %v4856_v28  ;;  %2199 = vmatpush1.bf16.msra.mxu1 %v2174_v50  ;;  %v2144_v25 = vsel %vm753_vm12, %v4856_v28, %v4857_v51 }
 0xe97   : > { %v4860_v30 = vpop.permute.xlu1 %4859  ;;  %v2177_v24 = vpack.c.bf16 %v2154_v27, %v2144_v25  ;;  %v2176_v33 = vpack.c.bf16 %v2153_v20, %v2143_v10  ;;  %v2165_v58 = vpop.permute.xlu0 %2164  ;;  %v5188_v27 = vld [vmem:[%s6932_s5 + $0x10] ss:$8 sps:$4 sm:$0xff]  }
 0xe98   : > { %v4862_v37 = vunpack.i.h.bf16 %v4860_v30  ;;  %v4861_v34 = vunpack.i.l.bf16 %v4860_v30 }
 0xe99   : > { %2200 = vmatprep.subr.bf16.mxu1 %v2177_v24 }
 0xe9a   : > { %2201 = vmatpush1.bf16.msra.mxu1 %v2176_v33  ;;  %v2167_v42 = vsel %vm778_vm13, %v4862_v37, %v2165_v58  ;;  %v2166_v46 = vsel %vm778_vm13, %v4861_v34, %v4862_v37 }
 0xe9b   : > { %v2179_v43 = vpack.c.bf16 %v2167_v42, %v2167_v42  ;;  %v2178_v18 = vpack.c.bf16 %v2166_v46, %v2166_v46 }
 0xe9d   : > { %4302 = vmatprep.subr.msk.bf16.mxu1 %vm802_vm14, %v2179_v43  ;;  %v2189_v48 = vsel %vm802_vm14, %v2178_v18, 0 }
 0xe9e   : > { %2203 = vmatpush1.bf16.msra.mxu1 %v2189_v48 }
 0xe9f   : > { %2552 = vmatprep.subr.bf16.mxu1 %v5297_v56 }
 0xea1   : > { %4303 = vmatmul.mubr.msk.bf16.vlgmr.msra.gmra.mrb[12].mxu1 %vm798_vm15, %v4300_v9 }
 0xea2   : > { %2553 = vmatpush1.bf16.msra.mxu1 %v2521_v15  ;;  %4311 = vmatprep.mubr.msk.bf16.mxu1 %vm634_vm1, %v5186_v52 }
 0xea3   : > { %2554 = vmatprep.subr.bf16.mxu1 %v5297_v56 }
 0xea4   : > { %v4865_v16 = vpop.permute.xlu1 %4864 }
 0xea5   : > { %v4867_v7 = vunpack.i.h.bf16 %v4865_v16  ;;  %v4866_v35 = vunpack.i.l.bf16 %v4865_v16 }
 0xea6   : > { %v4870_v14 = vpop.permute.xlu0 %4869 }
 0xea7   : > { %v2522_v12 = vpack.c.bf16 %v4867_v7, %v4866_v35  ;;  %v4872_v61 = vunpack.i.h.bf16 %v4870_v14  ;;  %v4871_v5 = vunpack.i.l.bf16 %v4870_v14 }
 0xea8   : > { %v4875_v47 = vpop.permute.xlu1 %4874 }
 0xea9   : > { %2555 = vmatpush1.bf16.msra.mxu1 %v2522_v12  ;;  %v2523_v62 = vpack.c.bf16 %v4872_v61, %v4871_v5  ;;  %v4877_v0 = vunpack.i.h.bf16 %v4875_v47  ;;  %v4876_v41 = vunpack.i.l.bf16 %v4875_v47 }
 0xeaa   : > { %2556 = vmatprep.subr.bf16.mxu1 %v5297_v56  ;;  %v4880_v32 = vpop.permute.xlu0 %4879 }
 0xeab   : > { %v2524_v53 = vpack.c.bf16 %v4877_v0, %v4876_v41  ;;  %v4882_v15 = vunpack.i.h.bf16 %v4880_v32  ;;  %v4881_v44 = vunpack.i.l.bf16 %v4880_v32 }
 0xeac   : > { %v4885_v13 = vpop.permute.xlu1 %4884 }
 0xead   : > { %2557 = vmatpush1.bf16.msra.mxu1 %v2523_v62  ;;  %v2525_v23 = vpack.c.bf16 %v4882_v15, %v4881_v44  ;;  %v4887_v55 = vunpack.i.h.bf16 %v4885_v13  ;;  %v4886_v45 = vunpack.i.l.bf16 %v4885_v13 }
 0xeae   : > { %2558 = vmatprep.subr.bf16.mxu1 %v5297_v56  ;;  %v4890_v63 = vpop.permute.xlu0 %4889 }
 0xeaf   : > { %v2526_v38 = vpack.c.bf16 %v4887_v55, %v4886_v45  ;;  %v4892_v11 = vunpack.i.h.bf16 %v4890_v63  ;;  %v4891_v21 = vunpack.i.l.bf16 %v4890_v63 }
 0xeb0   : > { %v4895_v40 = vpop.permute.xlu1 %4894 }
 0xeb1   : > { %2559 = vmatpush1.bf16.msra.mxu1 %v2524_v53  ;;  %v2527_v22 = vpack.c.bf16 %v4892_v11, %v4891_v21  ;;  %v4897_v36 = vunpack.i.h.bf16 %v4895_v40  ;;  %v4896_v50 = vunpack.i.l.bf16 %v4895_v40 }
 0xeb2   : > { %2560 = vmatprep.subr.bf16.mxu1 %v5297_v56  ;;  %v4900_v51 = vpop.permute.xlu0 %4899 }
 0xeb3   : > { %v2528_v28 = vpack.c.bf16 %v4897_v36, %v4896_v50  ;;  %v4902_v20 = vunpack.i.h.bf16 %v4900_v51  ;;  %v4901_v10 = vunpack.i.l.bf16 %v4900_v51  ;;  %v2601_v50 = vld [vmem:[#allocation2 + $0x20] sm:$0xff]  ;;  %v2602_v51 = vld [vmem:[#allocation2 + $0x28] sm:$0xff] }
 0xeb5   : > { %2561 = vmatpush1.bf16.msra.mxu1 %v2525_v23  ;;  %v2529_v25 = vpack.c.bf16 %v4902_v20, %v4901_v10 }
 0xeb6   : > { %2562 = vmatprep.subr.bf16.mxu1 %v5297_v56 }
 0xeb9   : > { %2563 = vmatpush1.bf16.msra.mxu1 %v2526_v38 }
 0xeba   : > { %2564 = vmatprep.subr.bf16.mxu1 %v5297_v56 }
 0xebd   : > { %2565 = vmatpush1.bf16.msra.mxu1 %v2527_v22 }
 0xebe   : > { %2566 = vmatprep.subr.bf16.mxu1 %v5297_v56 }
 0xec1   : > { %2567 = vmatpush1.bf16.msra.mxu1 %v2528_v28  ;;  %v2533_v34 = vpop.permute.xlu1 %2532  ;;  %v5189_v28 = vld [vmem:[%s6932_s5 + $0x24] ss:$8 sps:$4 sm:$0xff]  }
 0xec2   : > { %2568 = vmatprep.subr.bf16.mxu1 %v5297_v56  ;;  %4316 = vmatprep.mubr.msk.bf16.mxu0 %vm634_vm1, %v5189_v28 }
 0xec3   : > { %v2538_v43 = vpop.permute.xlu0 %2537 }
 0xec5   : > { %2569 = vmatpush1.bf16.msra.mxu1 %v2529_v25 }
 0xec6   : > { %2882 = vmatprep.subr.bf16.mxu1 %v5297_v56 }
 0xec8   : > { %2585 = vmatmul.mubr.bf16.vlgmr.msra.gmra.mrb[16].mxu1 %v5188_v27 }
 0xf74   : > { %v6316_v30 = vpop.f32.mrb[12].mxu1 }
 0xf75   : > { %v6318_v24 = vpop.f32.mrb[13].mxu1 }
 0xf76   : > { %v2232_v33 = vpop.f32.mrb[14].mxu1 }
 0xf77   : > { %v2233_v37 = vpop.f32.mrb[15].mxu1 }
 0xf9b   : > { %v2586_v58 = vpop.f32.mrb[16].mxu1 }
 0xf9c   : > { %v2587_v42 = vadd.f32 %v2586_v58, %v2533_v34  ;;  %v2588_v46 = vpop.f32.mrb[17].mxu1 }
 0xf9d   : > { %v2589_v18 = vpop.f32.mrb[18].mxu1 }
 0xf9e   : > { %v6321_v48 = vadd.f32 %v2587_v42, %v6023_v39  ;;  %v2590_v9 = vadd.f32 %v2589_v18, %v2538_v43  ;;  %v2591_v52 = vpop.f32.mrb[19].mxu1 }
 0xfa0   : > { %v2595_v16 = vmax.f32 %v6321_v48, 0.0  ;;  %v6325_v7 = vadd.f32 %v2590_v9, %v6028_v29 }
 0xfa2   : > { %v2596_v35 = vmax.f32 %v6325_v7, 0.0  ;;  %2605 = vrot.lane.b32.xlu1 %v2595_v16, %s5299_s17 }
 0xfa4   : > { %2607 = vrot.lane.b32.xlu0 %v2596_v35, %s5299_s17 }
0x1014   : > { %v2606_v14 = vpop.permute.xlu1 %2605 }
0x1015   : > { %v2611_v39 = vsel %vm2254_vm5, 0.0, %v2606_v14 }
0x1016   : > { %v2613_v12 = vsel %vm2257_vm4, %v2611_v39, 0.0  ;;  %v2608_v61 = vpop.permute.xlu0 %2607 }
0x1017   : > { %v2612_v5 = vsel %vm2254_vm5, 0.0, %v2608_v61  ;;  %v2617_v47 = vmul.f32 %v2613_v12, %v6097_v54  ;;  %v2615_v62 = vmul.f32 %v2613_v12, %v6036_v19  ;;  %v2619_v13 = vmul.f32 %v2613_v12, %v6103_v49 }
0x1018   : > { %v2614_v29 = vsel %vm2257_vm4, %v2612_v5, 0.0  ;;  %v2621_v45 = vmul.f32 %v2613_v12, %v6115_v6  ;;  %v2623_v11 = vmul.f32 %v2613_v12, %v6117_v31  ;;  %v2625_v22 = vmul.f32 %v2613_v12, %v6125_v26 }
0x1019   : > { %v4903_v0 = vpack.i.bf16 %v2614_v29, %v2613_v12  ;;  %v2618_v41 = vmul.f32 %v2614_v29, %v6097_v54  ;;  %v2616_v32 = vmul.f32 %v2614_v29, %v6036_v19  ;;  %v2620_v53 = vmul.f32 %v2614_v29, %v6103_v49 }
0x101a   : > { %v2622_v55 = vmul.f32 %v2614_v29, %v6115_v6  ;;  %v2624_v63 = vmul.f32 %v2614_v29, %v6117_v31  ;;  %v2626_v40 = vmul.f32 %v2614_v29, %v6125_v26 }
0x101b   : > { %4904 = vrot.lane.b32.xlu1 %v4903_v0, %s5290_s20  ;;  %v4908_v15 = vpack.i.bf16 %v2618_v41, %v2617_v47  ;;  %v2687_v44 = vpack.c.bf16 %v2616_v32, %v2615_v62  ;;  %v4913_v23 = vpack.i.bf16 %v2620_v53, %v2619_v13 }
0x101c   : > { %v4923_v38 = vpack.i.bf16 %v2622_v55, %v2621_v45  ;;  %v4928_v21 = vpack.i.bf16 %v2624_v63, %v2623_v11  ;;  %v4938_v36 = vpack.i.bf16 %v2626_v40, %v2625_v22  ;;  %v5191_v63 = vld [vmem:[%s6932_s5 + $0x20] ss:$8 sps:$4 sm:$0xff]  }
0x101d   : > { %4909 = vrot.lane.b32.xlu0 %v4908_v15, %s5295_s25  ;;  %2719 = vmatpush1.bf16.msra.mxu0 %v2687_v44 }
0x101e   : > { %2720 = vmatprep.subr.bf16.mxu0 %v5297_v56 }
0x101f   : > { %4914 = vrot.lane.b32.xlu1 %v4913_v23, %s5302_s19 }
0x1021   : > { %4919 = vrot.lane.b32.xlu0 %v4903_v0, %s6987_s28 }
0x1023   : > { %4924 = vrot.lane.b32.xlu1 %v4923_v38, %s6988_s29 }
0x1025   : > { %4929 = vrot.lane.b32.xlu0 %v4928_v21, %s6974_s18 }
0x1027   : > { %4934 = vrot.lane.b32.xlu1 %v4903_v0, %s6972_s15 }
0x1029   : > { %4939 = vrot.lane.b32.xlu0 %v4938_v36, %s6970_s24 }
0x102b   : > { %2698 = vperm.xlu1 %4622, %v2601_v50  }
0x102d   : > { %2703 = vperm.xlu0 %4541, %v2602_v51  }
0x108d   : > { %v4905_v20 = vpop.permute.xlu1 %4904 }
0x108e   : > { %v4907_v10 = vunpack.i.h.bf16 %v4905_v20  ;;  %v4906_v25 = vunpack.i.l.bf16 %v4905_v20 }
0x108f   : > { %v4910_v27 = vpop.permute.xlu0 %4909 }
0x1090   : > { %v2688_v33 = vpack.c.bf16 %v4907_v10, %v4906_v25  ;;  %v4912_v37 = vunpack.i.h.bf16 %v4910_v27  ;;  %v4911_v34 = vunpack.i.l.bf16 %v4910_v27 }
0x1091   : > { %v4915_v58 = vpop.permute.xlu1 %4914 }
0x1092   : > { %2721 = vmatpush1.bf16.msra.mxu0 %v2688_v33  ;;  %v2689_v42 = vpack.c.bf16 %v4912_v37, %v4911_v34  ;;  %v4917_v46 = vunpack.i.h.bf16 %v4915_v58  ;;  %v4916_v43 = vunpack.i.l.bf16 %v4915_v58 }
0x1093   : > { %2722 = vmatprep.subr.bf16.mxu0 %v5297_v56  ;;  %v4920_v18 = vpop.permute.xlu0 %4919 }
0x1094   : > { %v2690_v9 = vpack.c.bf16 %v4917_v46, %v4916_v43  ;;  %v4922_v52 = vunpack.i.h.bf16 %v4920_v18  ;;  %v4921_v14 = vunpack.i.l.bf16 %v4920_v18 }
0x1095   : > { %v4925_v39 = vpop.permute.xlu1 %4924 }
0x1096   : > { %2723 = vmatpush1.bf16.msra.mxu0 %v2689_v42  ;;  %v2691_v12 = vpack.c.bf16 %v4922_v52, %v4921_v14  ;;  %v4927_v61 = vunpack.i.h.bf16 %v4925_v39  ;;  %v4926_v5 = vunpack.i.l.bf16 %v4925_v39 }
0x1097   : > { %2724 = vmatprep.subr.bf16.mxu0 %v5297_v56  ;;  %v4930_v29 = vpop.permute.xlu0 %4929 }
0x1098   : > { %v2692_v47 = vpack.c.bf16 %v4927_v61, %v4926_v5  ;;  %v4932_v62 = vunpack.i.h.bf16 %v4930_v29  ;;  %v4931_v0 = vunpack.i.l.bf16 %v4930_v29 }
0x1099   : > { %v4935_v41 = vpop.permute.xlu1 %4934 }
0x109a   : > { %2725 = vmatpush1.bf16.msra.mxu0 %v2690_v9  ;;  %v2693_v32 = vpack.c.bf16 %v4932_v62, %v4931_v0  ;;  %v4937_v53 = vunpack.i.h.bf16 %v4935_v41  ;;  %v4936_v15 = vunpack.i.l.bf16 %v4935_v41 }
0x109b   : > { %2726 = vmatprep.subr.bf16.mxu0 %v5297_v56  ;;  %v4940_v44 = vpop.permute.xlu0 %4939 }
0x109c   : > { %v2694_v13 = vpack.c.bf16 %v4937_v53, %v4936_v15  ;;  %v4942_v23 = vunpack.i.h.bf16 %v4940_v44  ;;  %v4941_v55 = vunpack.i.l.bf16 %v4940_v44  ;;  %v2765_v15 = vld [vmem:[#allocation2 + $0x30] sm:$0xff]  ;;  %v2766_v44 = vld [vmem:[#allocation2 + $0x38] sm:$0xff] }
0x109e   : > { %2727 = vmatpush1.bf16.msra.mxu0 %v2691_v12  ;;  %v2695_v45 = vpack.c.bf16 %v4942_v23, %v4941_v55 }
0x109f   : > { %2728 = vmatprep.subr.bf16.mxu0 %v5297_v56 }
0x10a2   : > { %2729 = vmatpush1.bf16.msra.mxu0 %v2692_v47 }
0x10a3   : > { %2730 = vmatprep.subr.bf16.mxu0 %v5297_v56 }
0x10a6   : > { %2731 = vmatpush1.bf16.msra.mxu0 %v2693_v32 }
0x10a7   : > { %2732 = vmatprep.subr.bf16.mxu0 %v5297_v56 }
0x10aa   : > { %2733 = vmatpush1.bf16.msra.mxu0 %v2694_v13  ;;  %v2699_v38 = vpop.permute.xlu1 %2698  ;;  %v5192_v13 = vld [vmem:[%s6932_s5 + $0x34] ss:$8 sps:$4 sm:$0xff]  }
0x10ab   : > { %2734 = vmatprep.subr.bf16.mxu0 %v5297_v56  ;;  %4321 = vmatprep.mubr.msk.bf16.mxu1 %vm634_vm1, %v5192_v13 }
0x10ac   : > { %v2704_v22 = vpop.permute.xlu0 %2703 }
0x10ae   : > { %2735 = vmatpush1.bf16.msra.mxu0 %v2695_v45 }
0x10af   : > { %3048 = vmatprep.subr.bf16.mxu0 %v5297_v56 }
0x10b1   : > { %2751 = vmatmul.mubr.bf16.vlgmr.msra.gmra.mrb[20].mxu0 %v5191_v63 }
0x1184   : > { %v2752_v11 = vpop.f32.mrb[20].mxu0 }
0x1185   : > { %v2753_v21 = vadd.f32 %v2752_v11, %v2699_v38  ;;  %v2754_v40 = vpop.f32.mrb[21].mxu0 }
0x1186   : > { %v2755_v36 = vpop.f32.mrb[22].mxu0 }
0x1187   : > { %v2759_v50 = vmax.f32 %v2753_v21, 0.0  ;;  %v2756_v51 = vadd.f32 %v2755_v36, %v2704_v22  ;;  %v2757_v28 = vpop.f32.mrb[23].mxu0 }
0x1189   : > { %v2760_v20 = vmax.f32 %v2756_v51, 0.0  ;;  %2769 = vrot.lane.b32.xlu1 %v2759_v50, %s5299_s17 }
0x118b   : > { %2771 = vrot.lane.b32.xlu0 %v2760_v20, %s5299_s17 }
0x11fb   : > { %v2770_v10 = vpop.permute.xlu1 %2769 }
0x11fc   : > { %v2775_v25 = vsel %vm2254_vm5, 0.0, %v2770_v10 }
0x11fd   : > { %v2777_v27 = vsel %vm2257_vm4, %v2775_v25, 0.0  ;;  %v2772_v33 = vpop.permute.xlu0 %2771 }
0x11fe   : > { %v2776_v37 = vsel %vm2254_vm5, 0.0, %v2772_v33  ;;  %v2781_v58 = vmul.f32 %v2777_v27, %v6097_v54  ;;  %v2779_v42 = vmul.f32 %v2777_v27, %v6036_v19  ;;  %v2783_v39 = vmul.f32 %v2777_v27, %v6103_v49 }
0x11ff   : > { %v2778_v34 = vsel %vm2257_vm4, %v2776_v37, 0.0  ;;  %v2785_v5 = vmul.f32 %v2777_v27, %v6115_v6  ;;  %v2787_v62 = vmul.f32 %v2777_v27, %v6117_v31  ;;  %v2789_v32 = vmul.f32 %v2777_v27, %v6125_v26 }
0x1200   : > { %v4943_v46 = vpack.i.bf16 %v2778_v34, %v2777_v27  ;;  %v2782_v43 = vmul.f32 %v2778_v34, %v6097_v54  ;;  %v2780_v18 = vmul.f32 %v2778_v34, %v6036_v19  ;;  %v2784_v9 = vmul.f32 %v2778_v34, %v6103_v49 }
0x1201   : > { %v2786_v61 = vmul.f32 %v2778_v34, %v6115_v6  ;;  %v2788_v29 = vmul.f32 %v2778_v34, %v6117_v31  ;;  %v2790_v41 = vmul.f32 %v2778_v34, %v6125_v26 }
0x1202   : > { %4944 = vrot.lane.b32.xlu1 %v4943_v46, %s5290_s20  ;;  %v4948_v52 = vpack.i.bf16 %v2782_v43, %v2781_v58  ;;  %v2851_v14 = vpack.c.bf16 %v2780_v18, %v2779_v42  ;;  %v4953_v12 = vpack.i.bf16 %v2784_v9, %v2783_v39 }
0x1203   : > { %v4963_v47 = vpack.i.bf16 %v2786_v61, %v2785_v5  ;;  %v4968_v0 = vpack.i.bf16 %v2788_v29, %v2787_v62  ;;  %v4978_v53 = vpack.i.bf16 %v2790_v41, %v2789_v32  ;;  %v5194_v29 = vld [vmem:[%s6932_s5 + $0x30] ss:$8 sps:$4 sm:$0xff]  }
0x1204   : > { %4949 = vrot.lane.b32.xlu0 %v4948_v52, %s5295_s25  ;;  %2883 = vmatpush1.bf16.msra.mxu1 %v2851_v14 }
0x1205   : > { %2884 = vmatprep.subr.bf16.mxu1 %v5297_v56 }
0x1206   : > { %4954 = vrot.lane.b32.xlu1 %v4953_v12, %s5302_s19 }
0x1208   : > { %4959 = vrot.lane.b32.xlu0 %v4943_v46, %s6987_s28 }
0x120a   : > { %4964 = vrot.lane.b32.xlu1 %v4963_v47, %s6988_s29 }
0x120c   : > { %4969 = vrot.lane.b32.xlu0 %v4968_v0, %s6974_s18 }
0x120e   : > { %4974 = vrot.lane.b32.xlu1 %v4943_v46, %s6972_s15 }
0x1210   : > { %4979 = vrot.lane.b32.xlu0 %v4978_v53, %s6970_s24 }
0x1212   : > { %2862 = vperm.xlu1 %4622, %v2765_v15  }
0x1214   : > { %2867 = vperm.xlu0 %4541, %v2766_v44  }
0x1274   : > { %v4945_v23 = vpop.permute.xlu1 %4944 }
0x1275   : > { %v4947_v55 = vunpack.i.h.bf16 %v4945_v23  ;;  %v4946_v45 = vunpack.i.l.bf16 %v4945_v23 }
0x1276   : > { %v4950_v63 = vpop.permute.xlu0 %4949 }
0x1277   : > { %v2852_v38 = vpack.c.bf16 %v4947_v55, %v4946_v45  ;;  %v4952_v11 = vunpack.i.h.bf16 %v4950_v63  ;;  %v4951_v21 = vunpack.i.l.bf16 %v4950_v63 }
0x1278   : > { %v4955_v40 = vpop.permute.xlu1 %4954 }
0x1279   : > { %2885 = vmatpush1.bf16.msra.mxu1 %v2852_v38  ;;  %v2853_v22 = vpack.c.bf16 %v4952_v11, %v4951_v21  ;;  %v4957_v36 = vunpack.i.h.bf16 %v4955_v40  ;;  %v4956_v50 = vunpack.i.l.bf16 %v4955_v40 }
0x127a   : > { %2886 = vmatprep.subr.bf16.mxu1 %v5297_v56  ;;  %v4960_v51 = vpop.permute.xlu0 %4959 }
0x127b   : > { %v2854_v28 = vpack.c.bf16 %v4957_v36, %v4956_v50  ;;  %v4962_v20 = vunpack.i.h.bf16 %v4960_v51  ;;  %v4961_v10 = vunpack.i.l.bf16 %v4960_v51 }
0x127c   : > { %v4965_v25 = vpop.permute.xlu1 %4964 }
0x127d   : > { %2887 = vmatpush1.bf16.msra.mxu1 %v2853_v22  ;;  %v2855_v27 = vpack.c.bf16 %v4962_v20, %v4961_v10  ;;  %v4967_v33 = vunpack.i.h.bf16 %v4965_v25  ;;  %v4966_v37 = vunpack.i.l.bf16 %v4965_v25 }
0x127e   : > { %2888 = vmatprep.subr.bf16.mxu1 %v5297_v56  ;;  %v4970_v34 = vpop.permute.xlu0 %4969 }
0x127f   : > { %v2856_v58 = vpack.c.bf16 %v4967_v33, %v4966_v37  ;;  %v4972_v42 = vunpack.i.h.bf16 %v4970_v34  ;;  %v4971_v46 = vunpack.i.l.bf16 %v4970_v34 }
0x1280   : > { %v4975_v43 = vpop.permute.xlu1 %4974 }
0x1281   : > { %2889 = vmatpush1.bf16.msra.mxu1 %v2854_v28  ;;  %v2857_v18 = vpack.c.bf16 %v4972_v42, %v4971_v46  ;;  %v4977_v9 = vunpack.i.h.bf16 %v4975_v43  ;;  %v4976_v52 = vunpack.i.l.bf16 %v4975_v43 }
0x1282   : > { %2890 = vmatprep.subr.bf16.mxu1 %v5297_v56  ;;  %v4980_v14 = vpop.permute.xlu0 %4979 }
0x1283   : > { %v2858_v39 = vpack.c.bf16 %v4977_v9, %v4976_v52  ;;  %v4982_v12 = vunpack.i.h.bf16 %v4980_v14  ;;  %v4981_v61 = vunpack.i.l.bf16 %v4980_v14  ;;  %v2932_v9 = vld [vmem:[#allocation2 + $0x48] sm:$0xff] }
0x1284   : > { %v5195_v52 = vld [vmem:[%s6932_s5 + $0x44] ss:$8 sps:$4 sm:$0xff]  }
0x1285   : > { %2891 = vmatpush1.bf16.msra.mxu1 %v2855_v27  ;;  %v2859_v5 = vpack.c.bf16 %v4982_v12, %v4981_v61  ;;  %4326 = vmatprep.mubr.msk.bf16.mxu0 %vm634_vm1, %v5195_v52 }
0x1286   : > { %2892 = vmatprep.subr.bf16.mxu1 %v5297_v56 }
0x1289   : > { %2893 = vmatpush1.bf16.msra.mxu1 %v2856_v58 }
0x128a   : > { %2894 = vmatprep.subr.bf16.mxu1 %v5297_v56 }
0x128d   : > { %2895 = vmatpush1.bf16.msra.mxu1 %v2857_v18  ;;  %v2931_v18 = vld [vmem:[#allocation2 + $0x40] sm:$0xff] }
0x128e   : > { %2896 = vmatprep.subr.bf16.mxu1 %v5297_v56 }
0x1291   : > { %2897 = vmatpush1.bf16.msra.mxu1 %v2858_v39  ;;  %v2863_v47 = vpop.permute.xlu1 %2862 }
0x1292   : > { %2898 = vmatprep.subr.bf16.mxu1 %v5297_v56 }
0x1293   : > { %v2868_v32 = vpop.permute.xlu0 %2867 }
0x1295   : > { %2899 = vmatpush1.bf16.msra.mxu1 %v2859_v5 }
0x1296   : > { %3212 = vmatprep.subr.bf16.mxu1 %v5297_v56 }
0x1298   : > { %2915 = vmatmul.mubr.bf16.vlgmr.msra.gmra.mrb[20].mxu1 %v5194_v29 }
0x136b   : > { %v2916_v62 = vpop.f32.mrb[20].mxu1 }
0x136c   : > { %v2917_v0 = vadd.f32 %v2916_v62, %v2863_v47  ;;  %v2918_v41 = vpop.f32.mrb[21].mxu1 }
0x136d   : > { %v2919_v53 = vpop.f32.mrb[22].mxu1 }
0x136e   : > { %v6418_v15 = vadd.f32 %v2917_v0, %v2595_v16  ;;  %v2920_v44 = vadd.f32 %v2919_v53, %v2868_v32  ;;  %v2921_v13 = vpop.f32.mrb[23].mxu1 }
0x1370   : > { %v2925_v23 = vmax.f32 %v6418_v15, 0.0  ;;  %v6423_v55 = vadd.f32 %v2920_v44, %v2596_v35 }
0x1372   : > { %v2926_v45 = vmax.f32 %v6423_v55, 0.0  ;;  %2935 = vrot.lane.b32.xlu1 %v2925_v23, %s5299_s17 }
0x1374   : > { %2937 = vrot.lane.b32.xlu0 %v2926_v45, %s5299_s17 }
0x13e4   : > { %v2936_v48 = vpop.permute.xlu1 %2935 }
0x13e5   : > { %v2941_v16 = vsel %vm2254_vm5, 0.0, %v2936_v48 }
0x13e6   : > { %v2943_v63 = vsel %vm2257_vm4, %v2941_v16, 0.0  ;;  %v2938_v38 = vpop.permute.xlu0 %2937 }
0x13e7   : > { %v2942_v7 = vsel %vm2254_vm5, 0.0, %v2938_v38  ;;  %v2947_v11 = vmul.f32 %v2943_v63, %v6097_v54  ;;  %v2945_v21 = vmul.f32 %v2943_v63, %v6036_v19  ;;  %v2949_v20 = vmul.f32 %v2943_v63, %v6103_v49 }
0x13e8   : > { %v2944_v35 = vsel %vm2257_vm4, %v2942_v7, 0.0  ;;  %v2951_v27 = vmul.f32 %v2943_v63, %v6115_v6  ;;  %v2953_v34 = vmul.f32 %v2943_v63, %v6117_v31  ;;  %v2955_v46 = vmul.f32 %v2943_v63, %v6125_v26 }
0x13e9   : > { %v4983_v40 = vpack.i.bf16 %v2944_v35, %v2943_v63  ;;  %v2948_v22 = vmul.f32 %v2944_v35, %v6097_v54  ;;  %v2946_v36 = vmul.f32 %v2944_v35, %v6036_v19  ;;  %v2950_v50 = vmul.f32 %v2944_v35, %v6103_v49 }
0x13ea   : > { %v2952_v25 = vmul.f32 %v2944_v35, %v6115_v6  ;;  %v2954_v33 = vmul.f32 %v2944_v35, %v6117_v31  ;;  %v2956_v42 = vmul.f32 %v2944_v35, %v6125_v26 }
0x13eb   : > { %4984 = vrot.lane.b32.xlu1 %v4983_v40, %s5290_s20  ;;  %v4988_v51 = vpack.i.bf16 %v2948_v22, %v2947_v11  ;;  %v3017_v28 = vpack.c.bf16 %v2946_v36, %v2945_v21  ;;  %v4993_v10 = vpack.i.bf16 %v2950_v50, %v2949_v20 }
0x13ec   : > { %v5003_v37 = vpack.i.bf16 %v2952_v25, %v2951_v27  ;;  %v5008_v58 = vpack.i.bf16 %v2954_v33, %v2953_v34  ;;  %v5018_v43 = vpack.i.bf16 %v2956_v42, %v2955_v46  ;;  %v5197_v33 = vld [vmem:[%s6932_s5 + $0x40] ss:$8 sps:$4 sm:$0xff]  }
0x13ed   : > { %4989 = vrot.lane.b32.xlu0 %v4988_v51, %s5295_s25  ;;  %3049 = vmatpush1.bf16.msra.mxu0 %v3017_v28 }
0x13ee   : > { %3050 = vmatprep.subr.bf16.mxu0 %v5297_v56 }
0x13ef   : > { %4994 = vrot.lane.b32.xlu1 %v4993_v10, %s5302_s19 }
0x13f1   : > { %4999 = vrot.lane.b32.xlu0 %v4983_v40, %s6987_s28 }
0x13f3   : > { %5004 = vrot.lane.b32.xlu1 %v5003_v37, %s6988_s29 }
0x13f5   : > { %5009 = vrot.lane.b32.xlu0 %v5008_v58, %s6974_s18 }
0x13f7   : > { %5014 = vrot.lane.b32.xlu1 %v4983_v40, %s6972_s15 }
0x13f9   : > { %5019 = vrot.lane.b32.xlu0 %v5018_v43, %s6970_s24 }
0x13fb   : > { %3028 = vperm.xlu1 %4622, %v2931_v18  }
0x13fd   : > { %3033 = vperm.xlu0 %4541, %v2932_v9  }
0x145d   : > { %v4985_v14 = vpop.permute.xlu1 %4984 }
0x145e   : > { %v4987_v39 = vunpack.i.h.bf16 %v4985_v14  ;;  %v4986_v12 = vunpack.i.l.bf16 %v4985_v14 }
0x145f   : > { %v4990_v61 = vpop.permute.xlu0 %4989 }
0x1460   : > { %v3018_v5 = vpack.c.bf16 %v4987_v39, %v4986_v12  ;;  %v4992_v29 = vunpack.i.h.bf16 %v4990_v61  ;;  %v4991_v47 = vunpack.i.l.bf16 %v4990_v61 }
0x1461   : > { %v4995_v62 = vpop.permute.xlu1 %4994 }
0x1462   : > { %3051 = vmatpush1.bf16.msra.mxu0 %v3018_v5  ;;  %v3019_v0 = vpack.c.bf16 %v4992_v29, %v4991_v47  ;;  %v4997_v41 = vunpack.i.h.bf16 %v4995_v62  ;;  %v4996_v32 = vunpack.i.l.bf16 %v4995_v62 }
0x1463   : > { %3052 = vmatprep.subr.bf16.mxu0 %v5297_v56  ;;  %v5000_v53 = vpop.permute.xlu0 %4999 }
0x1464   : > { %v3020_v44 = vpack.c.bf16 %v4997_v41, %v4996_v32  ;;  %v5002_v13 = vunpack.i.h.bf16 %v5000_v53  ;;  %v5001_v48 = vunpack.i.l.bf16 %v5000_v53 }
0x1465   : > { %v5005_v16 = vpop.permute.xlu1 %5004 }
0x1466   : > { %3053 = vmatpush1.bf16.msra.mxu0 %v3019_v0  ;;  %v3021_v63 = vpack.c.bf16 %v5002_v13, %v5001_v48  ;;  %v5007_v38 = vunpack.i.h.bf16 %v5005_v16  ;;  %v5006_v7 = vunpack.i.l.bf16 %v5005_v16 }
0x1467   : > { %3054 = vmatprep.subr.bf16.mxu0 %v5297_v56  ;;  %v5010_v35 = vpop.permute.xlu0 %5009 }
0x1468   : > { %v3022_v11 = vpack.c.bf16 %v5007_v38, %v5006_v7  ;;  %v5012_v21 = vunpack.i.h.bf16 %v5010_v35  ;;  %v5011_v40 = vunpack.i.l.bf16 %v5010_v35 }
0x1469   : > { %v5015_v22 = vpop.permute.xlu1 %5014 }
0x146a   : > { %3055 = vmatpush1.bf16.msra.mxu0 %v3020_v44  ;;  %v3023_v36 = vpack.c.bf16 %v5012_v21, %v5011_v40  ;;  %v5017_v50 = vunpack.i.h.bf16 %v5015_v22  ;;  %v5016_v51 = vunpack.i.l.bf16 %v5015_v22 }
0x146b   : > { %3056 = vmatprep.subr.bf16.mxu0 %v5297_v56  ;;  %v5020_v28 = vpop.permute.xlu0 %5019 }
0x146c   : > { %v3024_v20 = vpack.c.bf16 %v5017_v50, %v5016_v51  ;;  %v5022_v10 = vunpack.i.h.bf16 %v5020_v28  ;;  %v5021_v25 = vunpack.i.l.bf16 %v5020_v28  ;;  %v3095_v51 = vld [vmem:[#allocation2 + $0x50] sm:$0xff]  ;;  %v3096_v28 = vld [vmem:[#allocation2 + $0x58] sm:$0xff] }
0x146e   : > { %3057 = vmatpush1.bf16.msra.mxu0 %v3021_v63  ;;  %v3025_v27 = vpack.c.bf16 %v5022_v10, %v5021_v25 }
0x146f   : > { %3058 = vmatprep.subr.bf16.mxu0 %v5297_v56 }
0x1472   : > { %3059 = vmatpush1.bf16.msra.mxu0 %v3022_v11 }
0x1473   : > { %3060 = vmatprep.subr.bf16.mxu0 %v5297_v56 }
0x1476   : > { %3061 = vmatpush1.bf16.msra.mxu0 %v3023_v36 }
0x1477   : > { %3062 = vmatprep.subr.bf16.mxu0 %v5297_v56 }
0x147a   : > { %3063 = vmatpush1.bf16.msra.mxu0 %v3024_v20  ;;  %v3029_v37 = vpop.permute.xlu1 %3028  ;;  %v5198_v20 = vld [vmem:[%s6932_s5 + $0x54] ss:$8 sps:$4 sm:$0xff]  }
0x147b   : > { %3064 = vmatprep.subr.bf16.mxu0 %v5297_v56  ;;  %4331 = vmatprep.mubr.msk.bf16.mxu1 %vm634_vm1, %v5198_v20 }
0x147c   : > { %v3034_v46 = vpop.permute.xlu0 %3033 }
0x147e   : > { %3065 = vmatpush1.bf16.msra.mxu0 %v3025_v27 }
0x147f   : > { %3378 = vmatprep.subr.bf16.mxu0 %v5297_v56 }
0x1481   : > { %3081 = vmatmul.mubr.bf16.vlgmr.msra.gmra.mrb[24].mxu0 %v5197_v33 }
0x1554   : > { %v3082_v34 = vpop.f32.mrb[24].mxu0 }
0x1555   : > { %v3083_v58 = vadd.f32 %v3082_v34, %v3029_v37  ;;  %v3084_v42 = vpop.f32.mrb[25].mxu0 }
0x1556   : > { %v3085_v43 = vpop.f32.mrb[26].mxu0 }
0x1557   : > { %v3089_v18 = vmax.f32 %v3083_v58, 0.0  ;;  %v3086_v9 = vadd.f32 %v3085_v43, %v3034_v46  ;;  %v3087_v52 = vpop.f32.mrb[27].mxu0 }
0x1559   : > { %v3090_v14 = vmax.f32 %v3086_v9, 0.0  ;;  %3099 = vrot.lane.b32.xlu1 %v3089_v18, %s5299_s17 }
0x155b   : > { %3101 = vrot.lane.b32.xlu0 %v3090_v14, %s5299_s17 }
0x15cb   : > { %v3100_v39 = vpop.permute.xlu1 %3099 }
0x15cc   : > { %v3105_v12 = vsel %vm2254_vm5, 0.0, %v3100_v39 }
0x15cd   : > { %v3107_v61 = vsel %vm2257_vm4, %v3105_v12, 0.0  ;;  %v3102_v5 = vpop.permute.xlu0 %3101 }
0x15ce   : > { %v3106_v29 = vsel %vm2254_vm5, 0.0, %v3102_v5  ;;  %v3111_v62 = vmul.f32 %v3107_v61, %v6097_v54  ;;  %v3109_v0 = vmul.f32 %v3107_v61, %v6036_v19  ;;  %v3113_v16 = vmul.f32 %v3107_v61, %v6103_v49 }
0x15cf   : > { %v3108_v47 = vsel %vm2257_vm4, %v3106_v29, 0.0  ;;  %v3115_v7 = vmul.f32 %v3107_v61, %v6115_v6  ;;  %v3117_v21 = vmul.f32 %v3107_v61, %v6117_v31  ;;  %v3119_v36 = vmul.f32 %v3107_v61, %v6125_v26 }
0x15d0   : > { %v5023_v41 = vpack.i.bf16 %v3108_v47, %v3107_v61  ;;  %v3112_v32 = vmul.f32 %v3108_v47, %v6097_v54  ;;  %v3110_v53 = vmul.f32 %v3108_v47, %v6036_v19  ;;  %v3114_v44 = vmul.f32 %v3108_v47, %v6103_v49 }
0x15d1   : > { %v3116_v38 = vmul.f32 %v3108_v47, %v6115_v6  ;;  %v3118_v35 = vmul.f32 %v3108_v47, %v6117_v31  ;;  %v3120_v22 = vmul.f32 %v3108_v47, %v6125_v26 }
0x15d2   : > { %5024 = vrot.lane.b32.xlu1 %v5023_v41, %s5290_s20  ;;  %v5028_v13 = vpack.i.bf16 %v3112_v32, %v3111_v62  ;;  %v3181_v48 = vpack.c.bf16 %v3110_v53, %v3109_v0  ;;  %v5033_v63 = vpack.i.bf16 %v3114_v44, %v3113_v16 }
0x15d3   : > { %v5043_v11 = vpack.i.bf16 %v3116_v38, %v3115_v7  ;;  %v5048_v40 = vpack.i.bf16 %v3118_v35, %v3117_v21  ;;  %v5058_v50 = vpack.i.bf16 %v3120_v22, %v3119_v36  ;;  %v5200_v35 = vld [vmem:[%s6932_s5 + $0x50] ss:$8 sps:$4 sm:$0xff]  }
0x15d4   : > { %5029 = vrot.lane.b32.xlu0 %v5028_v13, %s5295_s25  ;;  %3213 = vmatpush1.bf16.msra.mxu1 %v3181_v48 }
0x15d5   : > { %3214 = vmatprep.subr.bf16.mxu1 %v5297_v56 }
0x15d6   : > { %5034 = vrot.lane.b32.xlu1 %v5033_v63, %s5302_s19 }
0x15d8   : > { %5039 = vrot.lane.b32.xlu0 %v5023_v41, %s6987_s28 }
0x15da   : > { %5044 = vrot.lane.b32.xlu1 %v5043_v11, %s6988_s29 }
0x15dc   : > { %5049 = vrot.lane.b32.xlu0 %v5048_v40, %s6974_s18 }
0x15de   : > { %5054 = vrot.lane.b32.xlu1 %v5023_v41, %s6972_s15 }
0x15e0   : > { %5059 = vrot.lane.b32.xlu0 %v5058_v50, %s6970_s24 }
0x15e2   : > { %3192 = vperm.xlu1 %4622, %v3095_v51  }
0x15e4   : > { %3197 = vperm.xlu0 %4541, %v3096_v28  }
0x1644   : > { %v5025_v10 = vpop.permute.xlu1 %5024 }
0x1645   : > { %v5027_v25 = vunpack.i.h.bf16 %v5025_v10  ;;  %v5026_v27 = vunpack.i.l.bf16 %v5025_v10 }
0x1646   : > { %v5030_v33 = vpop.permute.xlu0 %5029 }
0x1647   : > { %v3182_v37 = vpack.c.bf16 %v5027_v25, %v5026_v27  ;;  %v5032_v34 = vunpack.i.h.bf16 %v5030_v33  ;;  %v5031_v58 = vunpack.i.l.bf16 %v5030_v33 }
0x1648   : > { %v5035_v42 = vpop.permute.xlu1 %5034 }
0x1649   : > { %3215 = vmatpush1.bf16.msra.mxu1 %v3182_v37  ;;  %v3183_v46 = vpack.c.bf16 %v5032_v34, %v5031_v58  ;;  %v5037_v43 = vunpack.i.h.bf16 %v5035_v42  ;;  %v5036_v18 = vunpack.i.l.bf16 %v5035_v42 }
0x164a   : > { %3216 = vmatprep.subr.bf16.mxu1 %v5297_v56  ;;  %v5040_v9 = vpop.permute.xlu0 %5039 }
0x164b   : > { %v3184_v52 = vpack.c.bf16 %v5037_v43, %v5036_v18  ;;  %v5042_v14 = vunpack.i.h.bf16 %v5040_v9  ;;  %v5041_v39 = vunpack.i.l.bf16 %v5040_v9 }
0x164c   : > { %v5045_v12 = vpop.permute.xlu1 %5044 }
0x164d   : > { %3217 = vmatpush1.bf16.msra.mxu1 %v3183_v46  ;;  %v3185_v61 = vpack.c.bf16 %v5042_v14, %v5041_v39  ;;  %v5047_v5 = vunpack.i.h.bf16 %v5045_v12  ;;  %v5046_v29 = vunpack.i.l.bf16 %v5045_v12 }
0x164e   : > { %3218 = vmatprep.subr.bf16.mxu1 %v5297_v56  ;;  %v5050_v47 = vpop.permute.xlu0 %5049 }
0x164f   : > { %v3186_v62 = vpack.c.bf16 %v5047_v5, %v5046_v29  ;;  %v5052_v0 = vunpack.i.h.bf16 %v5050_v47  ;;  %v5051_v41 = vunpack.i.l.bf16 %v5050_v47 }
0x1650   : > { %v5055_v32 = vpop.permute.xlu1 %5054 }
0x1651   : > { %3219 = vmatpush1.bf16.msra.mxu1 %v3184_v52  ;;  %v3187_v53 = vpack.c.bf16 %v5052_v0, %v5051_v41  ;;  %v5057_v44 = vunpack.i.h.bf16 %v5055_v32  ;;  %v5056_v13 = vunpack.i.l.bf16 %v5055_v32 }
0x1652   : > { %3220 = vmatprep.subr.bf16.mxu1 %v5297_v56  ;;  %v5060_v48 = vpop.permute.xlu0 %5059 }
0x1653   : > { %v3188_v16 = vpack.c.bf16 %v5057_v44, %v5056_v13  ;;  %v5062_v63 = vunpack.i.h.bf16 %v5060_v48  ;;  %v5061_v38 = vunpack.i.l.bf16 %v5060_v48  ;;  %v3262_v44 = vld [vmem:[#allocation2 + $0x68] sm:$0xff] }
0x1654   : > { %v5201_v13 = vld [vmem:[%s6932_s5 + $0x64] ss:$8 sps:$4 sm:$0xff]  }
0x1655   : > { %3221 = vmatpush1.bf16.msra.mxu1 %v3185_v61  ;;  %v3189_v7 = vpack.c.bf16 %v5062_v63, %v5061_v38  ;;  %4336 = vmatprep.mubr.msk.bf16.mxu0 %vm634_vm1, %v5201_v13 }
0x1656   : > { %3222 = vmatprep.subr.bf16.mxu1 %v5297_v56 }
0x1659   : > { %3223 = vmatpush1.bf16.msra.mxu1 %v3186_v62 }
0x165a   : > { %3224 = vmatprep.subr.bf16.mxu1 %v5297_v56 }
0x165d   : > { %3225 = vmatpush1.bf16.msra.mxu1 %v3187_v53  ;;  %v3261_v53 = vld [vmem:[#allocation2 + $0x60] sm:$0xff] }
0x165e   : > { %3226 = vmatprep.subr.bf16.mxu1 %v5297_v56 }
0x1661   : > { %3227 = vmatpush1.bf16.msra.mxu1 %v3188_v16  ;;  %v3193_v11 = vpop.permute.xlu1 %3192 }
0x1662   : > { %3228 = vmatprep.subr.bf16.mxu1 %v5297_v56 }
0x1663   : > { %v3198_v36 = vpop.permute.xlu0 %3197 }
0x1665   : > { %3229 = vmatpush1.bf16.msra.mxu1 %v3189_v7 }
0x1666   : > { %3542 = vmatprep.subr.bf16.mxu1 %v5297_v56 }
0x1668   : > { %3245 = vmatmul.mubr.bf16.vlgmr.msra.gmra.mrb[24].mxu1 %v5200_v35 }
0x173b   : > { %v3246_v21 = vpop.f32.mrb[24].mxu1 }
0x173c   : > { %v3247_v40 = vadd.f32 %v3246_v21, %v3193_v11  ;;  %v3248_v22 = vpop.f32.mrb[25].mxu1 }
0x173d   : > { %v3249_v50 = vpop.f32.mrb[26].mxu1 }
0x173e   : > { %v6516_v51 = vadd.f32 %v3247_v40, %v2925_v23  ;;  %v3250_v28 = vadd.f32 %v3249_v50, %v3198_v36  ;;  %v3251_v20 = vpop.f32.mrb[27].mxu1 }
0x1740   : > { %v3255_v10 = vmax.f32 %v6516_v51, 0.0  ;;  %v6521_v25 = vadd.f32 %v3250_v28, %v2926_v45  ;;  %v3587_v51 = vld [vmem:[#allocation4] sm:$0xf] }
0x1742   : > { %v3256_v27 = vmax.f32 %v6521_v25, 0.0  ;;  %3265 = vrot.lane.b32.xlu1 %v3255_v10, %s5299_s17 }
0x1744   : > { %3267 = vrot.lane.b32.xlu0 %v3256_v27, %s5299_s17 }
0x17b4   : > { %v3266_v15 = vpop.permute.xlu1 %3265 }
0x17b5   : > { %v3271_v23 = vsel %vm2254_vm5, 0.0, %v3266_v15 }
0x17b6   : > { %v3273_v33 = vsel %vm2257_vm4, %v3271_v23, 0.0  ;;  %v3268_v37 = vpop.permute.xlu0 %3267 }
0x17b7   : > { %v3272_v55 = vsel %vm2254_vm5, 0.0, %v3268_v37  ;;  %v3277_v34 = vmul.f32 %v3273_v33, %v6097_v54  ;;  %v3275_v58 = vmul.f32 %v3273_v33, %v6036_v19  ;;  %v3279_v14 = vmul.f32 %v3273_v33, %v6103_v49 }
0x17b8   : > { %v3274_v45 = vsel %vm2257_vm4, %v3272_v55, 0.0  ;;  %v3281_v61 = vmul.f32 %v3273_v33, %v6115_v6  ;;  %v3283_v47 = vmul.f32 %v3273_v33, %v6117_v31  ;;  %v3285_v41 = vmul.f32 %v3273_v33, %v6125_v26 }
0x17b9   : > { %v5063_v42 = vpack.i.bf16 %v3274_v45, %v3273_v33  ;;  %v3278_v46 = vmul.f32 %v3274_v45, %v6097_v54  ;;  %v3276_v43 = vmul.f32 %v3274_v45, %v6036_v19  ;;  %v3280_v18 = vmul.f32 %v3274_v45, %v6103_v49 }
0x17ba   : > { %v3282_v12 = vmul.f32 %v3274_v45, %v6115_v6  ;;  %v3284_v5 = vmul.f32 %v3274_v45, %v6117_v31  ;;  %v3286_v0 = vmul.f32 %v3274_v45, %v6125_v26 }
0x17bb   : > { %5064 = vrot.lane.b32.xlu1 %v5063_v42, %s5290_s20  ;;  %v5068_v9 = vpack.i.bf16 %v3278_v46, %v3277_v34  ;;  %v3347_v52 = vpack.c.bf16 %v3276_v43, %v3275_v58  ;;  %v5073_v39 = vpack.i.bf16 %v3280_v18, %v3279_v14 }
0x17bc   : > { %v5083_v29 = vpack.i.bf16 %v3282_v12, %v3281_v61  ;;  %v5088_v62 = vpack.i.bf16 %v3284_v5, %v3283_v47  ;;  %v5098_v32 = vpack.i.bf16 %v3286_v0, %v3285_v41  ;;  %v5203_v5 = vld [vmem:[%s6932_s5 + $0x60] ss:$8 sps:$4 sm:$0xff]  }
0x17bd   : > { %5069 = vrot.lane.b32.xlu0 %v5068_v9, %s5295_s25  ;;  %3379 = vmatpush1.bf16.msra.mxu0 %v3347_v52 }
0x17be   : > { %3380 = vmatprep.subr.bf16.mxu0 %v5297_v56 }
0x17bf   : > { %5074 = vrot.lane.b32.xlu1 %v5073_v39, %s5302_s19 }
0x17c1   : > { %5079 = vrot.lane.b32.xlu0 %v5063_v42, %s6987_s28 }
0x17c3   : > { %5084 = vrot.lane.b32.xlu1 %v5083_v29, %s6988_s29 }
0x17c5   : > { %5089 = vrot.lane.b32.xlu0 %v5088_v62, %s6974_s18 }
0x17c7   : > { %5094 = vrot.lane.b32.xlu1 %v5063_v42, %s6972_s15 }
0x17c9   : > { %5099 = vrot.lane.b32.xlu0 %v5098_v32, %s6970_s24 }
0x17cb   : > { %3358 = vperm.xlu1 %4622, %v3261_v53  }
0x17cd   : > { %3363 = vperm.xlu0 %4541, %v3262_v44  }
0x182d   : > { %v5065_v48 = vpop.permute.xlu1 %5064 }
0x182e   : > { %v5067_v16 = vunpack.i.h.bf16 %v5065_v48  ;;  %v5066_v63 = vunpack.i.l.bf16 %v5065_v48 }
0x182f   : > { %v5070_v38 = vpop.permute.xlu0 %5069 }
0x1830   : > { %v3348_v7 = vpack.c.bf16 %v5067_v16, %v5066_v63  ;;  %v5072_v35 = vunpack.i.h.bf16 %v5070_v38  ;;  %v5071_v11 = vunpack.i.l.bf16 %v5070_v38 }
0x1831   : > { %v5075_v21 = vpop.permute.xlu1 %5074 }
0x1832   : > { %3381 = vmatpush1.bf16.msra.mxu0 %v3348_v7  ;;  %v3349_v40 = vpack.c.bf16 %v5072_v35, %v5071_v11  ;;  %v5077_v22 = vunpack.i.h.bf16 %v5075_v21  ;;  %v5076_v36 = vunpack.i.l.bf16 %v5075_v21 }
0x1833   : > { %3382 = vmatprep.subr.bf16.mxu0 %v5297_v56  ;;  %v5080_v50 = vpop.permute.xlu0 %5079 }
0x1834   : > { %v3350_v28 = vpack.c.bf16 %v5077_v22, %v5076_v36  ;;  %v5082_v20 = vunpack.i.h.bf16 %v5080_v50  ;;  %v5081_v15 = vunpack.i.l.bf16 %v5080_v50 }
0x1835   : > { %v5085_v23 = vpop.permute.xlu1 %5084 }
0x1836   : > { %3383 = vmatpush1.bf16.msra.mxu0 %v3349_v40  ;;  %v3351_v33 = vpack.c.bf16 %v5082_v20, %v5081_v15  ;;  %v5087_v37 = vunpack.i.h.bf16 %v5085_v23  ;;  %v5086_v55 = vunpack.i.l.bf16 %v5085_v23 }
0x1837   : > { %3384 = vmatprep.subr.bf16.mxu0 %v5297_v56  ;;  %v5090_v45 = vpop.permute.xlu0 %5089 }
0x1838   : > { %v3352_v34 = vpack.c.bf16 %v5087_v37, %v5086_v55  ;;  %v5092_v58 = vunpack.i.h.bf16 %v5090_v45  ;;  %v5091_v42 = vunpack.i.l.bf16 %v5090_v45 }
0x1839   : > { %v5095_v46 = vpop.permute.xlu1 %5094 }
0x183a   : > { %3385 = vmatpush1.bf16.msra.mxu0 %v3350_v28  ;;  %v3353_v43 = vpack.c.bf16 %v5092_v58, %v5091_v42  ;;  %v5097_v18 = vunpack.i.h.bf16 %v5095_v46  ;;  %v5096_v9 = vunpack.i.l.bf16 %v5095_v46  ;;  %v3426_v46 = vld [vmem:[#allocation2 + $0x78] sm:$0xff] }
0x183b   : > { %3386 = vmatprep.subr.bf16.mxu0 %v5297_v56  ;;  %v5100_v52 = vpop.permute.xlu0 %5099 }
0x183c   : > { %v3354_v14 = vpack.c.bf16 %v5097_v18, %v5096_v9  ;;  %v5102_v39 = vunpack.i.h.bf16 %v5100_v52  ;;  %v5101_v12 = vunpack.i.l.bf16 %v5100_v52 }
0x183e   : > { %3387 = vmatpush1.bf16.msra.mxu0 %v3351_v33  ;;  %v3355_v61 = vpack.c.bf16 %v5102_v39, %v5101_v12 }
0x183f   : > { %3388 = vmatprep.subr.bf16.mxu0 %v5297_v56 }
0x1842   : > { %3389 = vmatpush1.bf16.msra.mxu0 %v3352_v34 }
0x1843   : > { %3390 = vmatprep.subr.bf16.mxu0 %v5297_v56 }
0x1846   : > { %3391 = vmatpush1.bf16.msra.mxu0 %v3353_v43  ;;  %v5204_v43 = vld [vmem:[%s6932_s5 + $0x74] ss:$8 sps:$4 sm:$0xff]  }
0x1847   : > { %3392 = vmatprep.subr.bf16.mxu0 %v5297_v56  ;;  %4341 = vmatprep.mubr.msk.bf16.mxu1 %vm634_vm1, %v5204_v43  ;;  %v3645_v43 = vld [vmem:[%s6937_s10 + $0x38] sm:$0xff] }
0x184a   : > { %3393 = vmatpush1.bf16.msra.mxu0 %v3354_v14  ;;  %v3359_v29 = vpop.permute.xlu1 %3358 }
0x184b   : > { %3394 = vmatprep.subr.bf16.mxu0 %v5297_v56 }
0x184c   : > { %v3364_v41 = vpop.permute.xlu0 %3363 }
0x184e   : > { %3395 = vmatpush1.bf16.msra.mxu0 %v3355_v61 }
0x1851   : > { %3411 = vmatmul.mubr.bf16.vlgmr.msra.gmra.mrb[28].mxu0 %v5203_v5 }
0x1924   : > { %v3412_v47 = vpop.f32.mrb[28].mxu0 }
0x1925   : > { %v3413_v62 = vadd.f32 %v3412_v47, %v3359_v29  ;;  %v3414_v0 = vpop.f32.mrb[29].mxu0 }
0x1926   : > { %v3415_v32 = vpop.f32.mrb[30].mxu0 }
0x1927   : > { %v3419_v53 = vmax.f32 %v3413_v62, 0.0  ;;  %v3416_v44 = vadd.f32 %v3415_v32, %v3364_v41  ;;  %v3417_v13 = vpop.f32.mrb[31].mxu0 }
0x1929   : > { %v3420_v48 = vmax.f32 %v3416_v44, 0.0  ;;  %3429 = vrot.lane.b32.xlu1 %v3419_v53, %s5299_s17 }
0x192b   : > { %3431 = vrot.lane.b32.xlu0 %v3420_v48, %s5299_s17  ;;  %s6989_s17 = smov 17  }
0x199b   : > { %v3430_v16 = vpop.permute.xlu1 %3429 }
0x199c   : > { %v3435_v63 = vsel %vm2254_vm5, 0.0, %v3430_v16 }
0x199d   : > { %v3437_v38 = vsel %vm2257_vm4, %v3435_v63, 0.0  ;;  %v3432_v7 = vpop.permute.xlu0 %3431 }
0x199e   : > { %v3436_v35 = vsel %vm2254_vm5, 0.0, %v3432_v7  ;;  %v3441_v21 = vmul.f32 %v3437_v38, %v6097_v54  ;;  %v3439_v40 = vmul.f32 %v3437_v38, %v6036_v19  ;;  %v3443_v23 = vmul.f32 %v3437_v38, %v6103_v49 }
0x199f   : > { %v3438_v11 = vsel %vm2257_vm4, %v3436_v35, 0.0  ;;  %v3447_v45 = vmul.f32 %v3437_v38, %v6117_v31  ;;  %v3449_v58 = vmul.f32 %v3437_v38, %v6125_v26  ;;  %vm5306_vm4 = vmmov 0  }
0x19a0   : > { %v5103_v22 = vpack.i.bf16 %v3438_v11, %v3437_v38  ;;  %v3442_v36 = vmul.f32 %v3438_v11, %v6097_v54  ;;  %v3440_v50 = vmul.f32 %v3438_v11, %v6036_v19  ;;  %v3444_v28 = vmul.f32 %v3438_v11, %v6103_v49 }
0x19a1   : > { %v3446_v37 = vmul.f32 %v3438_v11, %v6115_v6  ;;  %v3445_v19 = vmul.f32 %v3437_v38, %v6115_v6  ;;  %v3448_v54 = vmul.f32 %v3438_v11, %v6117_v31  ;;  %v3450_v34 = vmul.f32 %v3438_v11, %v6125_v26  ;;  %v3425_v6 = vld [vmem:[#allocation2 + $0x70] sm:$0xff]  ;;  %v4301_v31 = vld [vmem:[%s6930_s3 + $0x38] sm:$0xff] }
0x19a2   : > { %5104 = vrot.lane.b32.xlu1 %v5103_v22, %s5290_s20  ;;  %v5108_v20 = vpack.i.bf16 %v3442_v36, %v3441_v21  ;;  %v3511_v15 = vpack.c.bf16 %v3440_v50, %v3439_v40  ;;  %v5113_v33 = vpack.i.bf16 %v3444_v28, %v3443_v23  ;;  %v5206_v23 = vld [vmem:[%s6932_s5 + $0x70] ss:$8 sps:$4 sm:$0xff]  }
0x19a3   : > { %v5123_v55 = vpack.i.bf16 %v3446_v37, %v3445_v19  ;;  %v5128_v49 = vpack.i.bf16 %v3448_v54, %v3447_v45  ;;  %v5138_v42 = vpack.i.bf16 %v3450_v34, %v3449_v58 }
0x19a4   : > { %5109 = vrot.lane.b32.xlu0 %v5108_v20, %s5295_s25  ;;  %3543 = vmatpush1.bf16.msra.mxu1 %v3511_v15 }
0x19a5   : > { %3544 = vmatprep.subr.bf16.mxu1 %v5297_v56 }
0x19a6   : > { %5114 = vrot.lane.b32.xlu1 %v5113_v33, %s5302_s19  ;;  %v3739_v33 = vld [vmem:[%s6931_s4] sm:$0xf]  ;;  %s6990_s19 = smov 2  }
0x19a7   : > { %v3808_v34 = vrot.slane %v3739_v33, %v5479_v3  ;;  %v3792_v57 = vrot.slane %v3739_v33, %v582_v8  ;;  %v3788_v59 = vrot.slane %v3739_v33, %v5476_v2  ;;  %v3641_v8 = vld [vmem:[%s6937_s10 + $0x18] sm:$0xff] }
0x19a8   : > { %5119 = vrot.lane.b32.xlu0 %v5103_v22, %s6987_s28  ;;  %s6991_s28 = smov 16  }
0x19aa   : > { %5124 = vrot.lane.b32.xlu1 %v5123_v55, %s6988_s29  ;;  %v3812_v55 = vrot.slane %v3739_v33, %v602_v4  ;;  %v3818_v4 = vrot.slane %v3808_v34, %v5479_v3  ;;  %s6992_s29 = smov 18  }
0x19ac   : > { %5129 = vrot.lane.b32.xlu0 %v5128_v49, %s6974_s18 }
0x19ae   : > { %5134 = vrot.lane.b32.xlu1 %v5103_v22, %s6972_s15 }
0x19b0   : > { %5139 = vrot.lane.b32.xlu0 %v5138_v42, %s6970_s24  ;;  %v3638_v42 = vld [vmem:[%s6937_s10] sm:$0xff] }
0x19b2   : > { %3522 = vperm.xlu1 %4622, %v3425_v6  }
0x19b4   : > { %3527 = vperm.xlu0 %4541, %v3426_v46   ;;  %v3640_v46 = vld [vmem:[%s6937_s10 + $0x10] sm:$0xff] }
0x19b6   : > { %2182 = vperm.xlu1 %4622, %v4301_v31   ;;  %v3643_v31 = vld [vmem:[%s6937_s10 + $0x28] sm:$0xff] }
0x1a14   : > { %v5105_v26 = vpop.permute.xlu1 %5104 }
0x1a15   : > { %v5107_v18 = vunpack.i.h.bf16 %v5105_v26  ;;  %v5106_v9 = vunpack.i.l.bf16 %v5105_v26  ;;  %v4401_v26 = vpack.c.bf16 %v3640_v46, %v3638_v42 }
0x1a16   : > { %v5110_v52 = vpop.permute.xlu0 %5109 }
0x1a17   : > { %v3512_v14 = vpack.c.bf16 %v5107_v18, %v5106_v9  ;;  %v5112_v39 = vunpack.i.h.bf16 %v5110_v52  ;;  %v5111_v12 = vunpack.i.l.bf16 %v5110_v52  ;;  %v4403_v18 = vpack.c.bf16 %v3645_v43, %v3643_v31  ;;  %v3642_v9 = vld [vmem:[%s6937_s10 + $0x20] sm:$0xff]  ;;  %v3644_v52 = vld [vmem:[%s6937_s10 + $0x30] sm:$0xff] }
0x1a18   : > { %v5115_v61 = vpop.permute.xlu1 %5114 }
0x1a19   : > { %3545 = vmatpush1.bf16.msra.mxu1 %v3512_v14  ;;  %v3513_v5 = vpack.c.bf16 %v5112_v39, %v5111_v12  ;;  %v5117_v29 = vunpack.i.h.bf16 %v5115_v61  ;;  %v5116_v47 = vunpack.i.l.bf16 %v5115_v61  ;;  %v4405_v14 = vpack.c.bf16 %v3644_v52, %v3642_v9  ;;  %v3647_v39 = vld [vmem:[%s6937_s10 + $0x48] sm:$0xff]  ;;  %v3649_v12 = vld [vmem:[%s6937_s10 + $0x58] sm:$0xff] }
0x1a1a   : > { %3546 = vmatprep.subr.bf16.mxu1 %v5297_v56  ;;  %v5120_v62 = vpop.permute.xlu0 %5119  ;;  %v4407_v61 = vpack.c.bf16 %v3649_v12, %v3647_v39  ;;  %v3737_v12 = vld [vmem:[%s6939_s12] sm:$0xff] }
0x1a1b   : > { %v3514_v0 = vpack.c.bf16 %v5117_v29, %v5116_v47  ;;  %v5122_v41 = vunpack.i.h.bf16 %v5120_v62  ;;  %v5121_v32 = vunpack.i.l.bf16 %v5120_v62  ;;  %v3648_v29 = vld [vmem:[%s6937_s10 + $0x50] sm:$0xff]  ;;  %v3651_v47 = vld [vmem:[%s6937_s10 + $0x68] sm:$0xff] }
0x1a1c   : > { %v5125_v53 = vpop.permute.xlu1 %5124 }
0x1a1d   : > { %3547 = vmatpush1.bf16.msra.mxu1 %v3513_v5  ;;  %v3515_v44 = vpack.c.bf16 %v5122_v41, %v5121_v32  ;;  %v5127_v13 = vunpack.i.h.bf16 %v5125_v53  ;;  %v5126_v48 = vunpack.i.l.bf16 %v5125_v53  ;;  %v3646_v5 = vld [vmem:[%s6937_s10 + $0x40] sm:$0xff]  ;;  %v3652_v32 = vld [vmem:[%s6937_s10 + $0x70] sm:$0xff] }
0x1a1e   : > { %3548 = vmatprep.subr.bf16.mxu1 %v5297_v56  ;;  %v5130_v16 = vpop.permute.xlu0 %5129  ;;  %v4409_v62 = vpack.c.bf16 %v3648_v29, %v3646_v5  ;;  %v3650_v41 = vld [vmem:[%s6937_s10 + $0x60] sm:$0xff]  ;;  %v3738_v5 = vld [vmem:[%s6939_s12 + $0x8] sm:$0xff] }
0x1a1f   : > { %v3516_v63 = vpack.c.bf16 %v5127_v13, %v5126_v48  ;;  %v5132_v38 = vunpack.i.h.bf16 %v5130_v16  ;;  %v5131_v7 = vunpack.i.l.bf16 %v5130_v16  ;;  %v4413_v13 = vpack.c.bf16 %v3652_v32, %v3650_v41 }
0x1a20   : > { %v5135_v35 = vpop.permute.xlu1 %5134 }
0x1a21   : > { %3549 = vmatpush1.bf16.msra.mxu1 %v3514_v0  ;;  %v3517_v11 = vpack.c.bf16 %v5132_v38, %v5131_v7  ;;  %v5137_v21 = vunpack.i.h.bf16 %v5135_v35  ;;  %v5136_v40 = vunpack.i.l.bf16 %v5135_v35  ;;  %v3653_v0 = vld [vmem:[%s6937_s10 + $0x78] sm:$0xff] }
0x1a22   : > { %3550 = vmatprep.subr.bf16.mxu1 %v5297_v56  ;;  %v5140_v22 = vpop.permute.xlu0 %5139 }
0x1a23   : > { %v3518_v36 = vpack.c.bf16 %v5137_v21, %v5136_v40  ;;  %v5142_v50 = vunpack.i.h.bf16 %v5140_v22  ;;  %v5141_v28 = vunpack.i.l.bf16 %v5140_v22 }
0x1a25   : > { %3551 = vmatpush1.bf16.msra.mxu1 %v3515_v44  ;;  %v3519_v15 = vpack.c.bf16 %v5142_v50, %v5141_v28  ;;  %v4411_v44 = vpack.c.bf16 %v3653_v0, %v3651_v47 }
0x1a26   : > { %3552 = vmatprep.subr.bf16.mxu1 %v5297_v56 }
0x1a29   : > { %3553 = vmatpush1.bf16.msra.mxu1 %v3516_v63 }
0x1a2a   : > { %3554 = vmatprep.subr.bf16.mxu1 %v5297_v56 }
0x1a2d   : > { %3555 = vmatpush1.bf16.msra.mxu1 %v3517_v11 }
0x1a2e   : > { %3556 = vmatprep.subr.bf16.mxu1 %v5297_v56 }
0x1a31   : > { %v6609_v20 = vpop.permute.xlu1 %3522  ;;  %3557 = vmatpush1.bf16.msra.mxu1 %v3518_v36 }
0x1a32   : > { %3558 = vmatprep.subr.bf16.mxu1 %v5297_v56 }
0x1a33   : > { %v6715_v53 = vpop.permute.xlu0 %3527 }
0x1a35   : > { %v2183_v37 = vpop.permute.xlu1 %2182  ;;  %3559 = vmatpush1.bf16.msra.mxu1 %v3519_v15 }
0x1a36   : > { %v2229_v19 = vadd.f32 %v6316_v30, %v2183_v37  ;;  %v2231_v54 = vadd.f32 %v6318_v24, %v2183_v37  ;;  %v3822_v24 = vrot.slane %v3812_v55, %v5479_v3  ;;  %v3639_v3 = vld [vmem:[%s6937_s10 + $0x8] sm:$0xff] }
0x1a37   : > { %v4399_v6 = vpack.c.bf16 %v3641_v8, %v3639_v3 }
0x1a38   : > { %v6624_v45 = vadd.f32 %v2229_v19, %v1841_v17  ;;  %v6628_v49 = vadd.f32 %v2231_v54, %v1842_v60  ;;  %3575 = vmatmul.mubr.bf16.vlgmr.msra.gmra.mrb[28].mxu1 %v5206_v23  ;;  %v6647_v17 = vrot.slane %v3792_v57, %v5476_v2  ;;  %v6650_v60 = vrot.slane %v3788_v59, %v5476_v2 }
0x1a39   : > { %v5305_v2 = vmov 0.0   ;;  %4400 = vmatprep.subr.bf16.mxu0 %v4399_v6 }
0x1a3a   : > { %v2237_v58 = vmax.f32 %v6624_v45, 0.0  ;;  %v2238_v30 = vmax.f32 %v6628_v49, 0.0  ;;  %4393 = vmatprep.subr.bf16.mxu1 %v5305_v2  ;;  %3722 = vmatprep.mubr.f32.mxu0 %v5305_v2 }
0x1a3b   : > { %4395 = vmatprep.mubr.msk.bf16.mxu1 %vm5306_vm4, %v5305_v2  ;;  %4402 = vmatpush1.bf16.msra.mxu0 %v4401_v26 }
0x1a3c   : > { %3776 = vrot.lane.b32.xlu1 %v2238_v30, %s6989_s17  ;;  %3774 = vrot.lane.b32.xlu0 %v2237_v58, %s6989_s17  ;;  %s7000_s17 = smov 95  }
0x1a3d   : > { %4404 = vmatprep.subr.bf16.mxu0 %v4403_v18 }
0x1a3f   : > { %4406 = vmatpush1.bf16.msra.mxu0 %v4405_v14 }
0x1a40   : > { %3827 = vrot.lane.b32.xlu1 %v3822_v24, %s6990_s19  ;;  %3825 = vrot.lane.b32.xlu0 %v3818_v4, %s6990_s19  ;;  %s7001_s19 = sld [smem:[#allocation9_spill]] }
0x1a41   : > { %4408 = vmatprep.subr.bf16.mxu0 %v4407_v61 }
0x1a43   : > { %4410 = vmatpush1.bf16.msra.mxu0 %v4409_v62 }
0x1a44   : > { %3840 = vrot.lane.b32.xlu1 %v6647_v17, %s6991_s28  ;;  %3838 = vrot.lane.b32.xlu0 %v6650_v60, %s6991_s28 }
0x1a45   : > { %4412 = vmatprep.subr.bf16.mxu0 %v4411_v44 }
0x1a46   : > { %s555_s28 = scalar_lea.vmem %s7001_s19, %s5473_s22 }
0x1a47   : > { %4414 = vmatpush1.bf16.msra.mxu0 %v4413_v13 }
0x1a48   : > { %3851 = vrot.lane.b32.xlu1 %v3822_v24, %s6992_s29  ;;  %3849 = vrot.lane.b32.xlu0 %v3818_v4, %s6992_s29 }
0x1a4c   : > { %3862 = vrot.lane.b32.xlu1 %v6647_v17, %s6993_s30  ;;  %3860 = vrot.lane.b32.xlu0 %v6650_v60, %s6993_s30 }
0x1a50   : > { %3873 = vrot.lane.b32.xlu1 %v3822_v24, %s6994_s23  ;;  %3871 = vrot.lane.b32.xlu0 %v3818_v4, %s6994_s23 }
0x1a54   : > { %3592 = vperm.xlu0 %4541, %v3589_v1  }
0x1aae   : > { %v3777_v48 = vpop.permute.xlu1 %3776  ;;  %v3775_v16 = vpop.permute.xlu0 %3774 }
0x1aaf   : > { %v3783_v63 = vsel %vm568_vm0, %v3777_v48, 0.0  ;;  %v6719_v38 = vsel %vm568_vm0, %v3775_v16, %v3777_v48  ;;  %v6722_v7 = vsel %vm568_vm0, 0.0, %v3775_v16  ;;  %vm6996_vm0 = vcmask 261120  }
0x1ab0   : > { %3884 = vrot.lane.b32.xlu0 %v6722_v7, %s5290_s20  ;;  %v5143_v35 = vpack.i.bf16 %v3783_v63, %v6719_v38 }
0x1ab2   : > { %v3828_v11 = vpop.permute.xlu1 %3827  ;;  %5144 = vrot.lane.b32.xlu1 %v5143_v35, %s5290_s20  ;;  %v3826_v21 = vpop.permute.xlu0 %3825  ;;  %s6995_s20 = smov 112  }
0x1ab3   : > { %v3835_v40 = vmul.f32 %v3828_v11, %v3783_v63  ;;  %v3829_v22 = vsel %vm620_vm2, %v3826_v21, %v3828_v11  ;;  %v3833_v19 = vmul.f32 %v3826_v21, %v6722_v7  ;;  %vm6999_vm2 = vcmask 277504  }
0x1ab4   : > { %v3834_v36 = vmul.f32 %v3829_v22, %v6719_v38  ;;  %v3804_v11 = vmul.f32 %v6647_v17, %v6719_v38 }
0x1ab6   : > { %v5148_v50 = vpack.i.bf16 %v3835_v40, %v3834_v36  ;;  %v3841_v28 = vpop.permute.xlu1 %3840  ;;  %v3839_v15 = vpop.permute.xlu0 %3838 }
0x1ab7   : > { %v3848_v23 = vmul.f32 %v3841_v28, %v3783_v63  ;;  %v3842_v33 = vsel %vm634_vm1, %v3839_v15, %v3841_v28  ;;  %v3846_v4 = vmul.f32 %v3839_v15, %v6722_v7  ;;  %v3757_v28 = vld [vmem:[%s6940_s13 + $0x88] sm:$0xff]  ;;  %v3759_v15 = vld [vmem:[%s6940_s13 + $0x98] sm:$0xff] }
0x1ab8   : > { %v3847_v37 = vmul.f32 %v3842_v33, %v6719_v38  ;;  %5149 = vrot.lane.b32.xlu1 %v5148_v50, %s5295_s25  ;;  %v3756_v50 = vld [vmem:[%s6940_s13 + $0x80] sm:$0xff] }
0x1ab9   : > { %v4415_v17 = vpack.c.bf16 %v3757_v28, %v3756_v50 }
0x1aba   : > { %v5153_v54 = vpack.i.bf16 %v3848_v23, %v3847_v37  ;;  %v3852_v55 = vpop.permute.xlu1 %3851  ;;  %v3850_v34 = vpop.permute.xlu0 %3849  ;;  %v3742_v37 = vld [vmem:[%s6940_s13 + $0x10] sm:$0xff] }
0x1abb   : > { %v3853_v24 = vsel %vm646_vm3, %v3850_v34, %v3852_v55  ;;  %v3859_v57 = vmul.f32 %v3852_v55, %v3783_v63  ;;  %v3857_v43 = vmul.f32 %v3850_v34, %v6722_v7 }
0x1abc   : > { %3897 = vrot.lane.b32.xlu1 %v3833_v19, %s5295_s25  ;;  %5154 = vrot.lane.b32.xlu0 %v5153_v54, %s6995_s20  ;;  %v3858_v59 = vmul.f32 %v3853_v24, %v6719_v38  ;;  %s6998_s25 = smov 110   ;;  %v3743_v19 = vld [vmem:[%s6940_s13 + $0x18] sm:$0xff] }
0x1abd   : > { %v4421_v54 = vpack.c.bf16 %v3743_v19, %v3742_v37 }
0x1abe   : > { %v3863_v1 = vpop.permute.xlu1 %3862  ;;  %v3861_v2 = vpop.permute.xlu0 %3860  ;;  %v5163_v8 = vpack.i.bf16 %v3859_v57, %v3858_v59 }
0x1abf   : > { %v3864_v3 = vsel %vm6996_vm0, %v3861_v2, %v3863_v1  ;;  %v3870_v42 = vmul.f32 %v3863_v1, %v3783_v63  ;;  %v3868_v9 = vmul.f32 %v3861_v2, %v6722_v7 }
0x1ac0   : > { %5159 = vrot.lane.b32.xlu1 %v5143_v35, %s6997_s21  ;;  %3910 = vrot.lane.b32.xlu0 %v3846_v4, %s6995_s20  ;;  %v3869_v6 = vmul.f32 %v3864_v3, %v6719_v38 }
0x1ac2   : > { %v3874_v46 = vpop.permute.xlu1 %3873  ;;  %v3872_v31 = vpop.permute.xlu0 %3871  ;;  %v5168_v26 = vpack.i.bf16 %v3870_v42, %v3869_v6 }
0x1ac3   : > { %v3875_v18 = vsel %vm6999_vm2, %v3872_v31, %v3874_v46  ;;  %v3879_v52 = vmul.f32 %v3872_v31, %v6722_v7  ;;  %v3881_v61 = vmul.f32 %v3874_v46, %v3783_v63 }
0x1ac4   : > { %3920 = vrot.lane.b32.xlu1 %v6722_v7, %s6997_s21  ;;  %5164 = vrot.lane.b32.xlu0 %v5163_v8, %s6998_s25  ;;  %v3880_v14 = vmul.f32 %v3875_v18, %v6719_v38  ;;  %v3741_v38 = vld [vmem:[%s6940_s13 + $0x8] sm:$0xff]  ;;  %s550_s21 = scalar_lea.vmem %s6941_s14, %s5473_s22 }
0x1ac6   : > { %v5178_v39 = vpack.i.bf16 %v3880_v14, %v3879_v52 }
0x1ac8   : > { %3933 = vrot.lane.b32.xlu0 %v3857_v43, %s6998_s25  ;;  %5169 = vrot.lane.b32.xlu1 %v5168_v26, %s6985_s16 }
0x1acc   : > { %5174 = vrot.lane.b32.xlu0 %v5143_v35, %s7000_s17  ;;  %3946 = vrot.lane.b32.xlu1 %v3868_v9, %s6985_s16 }
0x1ad0   : > { %3956 = vrot.lane.b32.xlu0 %v6722_v7, %s7000_s17  ;;  %5179 = vrot.lane.b32.xlu1 %v5178_v39, %s6986_s26 }
0x1ad4   : > { %3973 = vrot.lane.b32.xlu0 %v3881_v61, %s6986_s26  ;;  %3991 = vperm.xlu1 %4622, %v3737_v12  }
0x1ad8   : > { %3996 = vperm.xlu0 %4541, %v3738_v5  }
0x1b0b   : > { %v3576_v29 = vpop.f32.mrb[28].mxu1 }
0x1b0c   : > { %v3577_v47 = vadd.f32 %v3576_v29, %v6609_v20  ;;  %v3578_v62 = vpop.f32.mrb[29].mxu1 }
0x1b0d   : > { %v3579_v0 = vpop.f32.mrb[30].mxu1 }
0x1b0e   : > { %v6768_v41 = vadd.f32 %v3577_v47, %v3255_v10  ;;  %v3580_v32 = vadd.f32 %v3579_v0, %v6715_v53  ;;  %v3581_v44 = vpop.f32.mrb[31].mxu1  ;;  %v3593_v10 = vpop.permute.xlu0 %3592 }
0x1b10   : > { %v6773_v13 = vadd.f32 %v3580_v32, %v3256_v27  ;;  %v3585_v48 = vmax.f32 %v6768_v41, 0.0  ;;  %v3803_v27 = vmul.f32 %v6650_v60, %v6722_v7  ;;  %v3740_v60 = vld [vmem:[%s6940_s13] sm:$0xff]  ;;  %v3758_v7 = vld [vmem:[%s6940_s13 + $0x90] sm:$0xff] }
0x1b11   : > { %v4417_v23 = vpack.c.bf16 %v3741_v38, %v3740_v60  ;;  %v4419_v33 = vpack.c.bf16 %v3759_v15, %v3758_v7 }
0x1b12   : > { %v3586_v16 = vmax.f32 %v6773_v13, 0.0 }
0x1b14   : > { %v3588_v20 = vpack.c.bf16 %v3586_v16, %v3585_v48 }
0x1b16   : > { %4394 = vmatpush3.bf16.msra.mxu1 %v3588_v20 }
0x1b17   : > { %4416 = vmatprep.subr.bf16.mxu1 %v4415_v17 }
0x1b19   : > { %4396 = vmatmul.mubr.msk.bf16.vlgmr.msra.gmra.mrb[32].mxu1 %vm634_vm1, %v3587_v51  ;;  %vm3654_vm1 = vcmask 523264  }
0x1b1a   : > { %4418 = vmatpush3.bf16.msra.mxu1 %v4417_v23 }
0x1b1b   : > { %4420 = vmatprep.subr.bf16.mxu1 %v4419_v33 }
0x1b1e   : > { %4422 = vmatpush3.bf16.msra.mxu1 %v4421_v54 }
0x1b22   : > { %v3885_v25 = vpop.permute.xlu0 %3884 }
0x1b24   : > { %v5145_v53 = vpop.permute.xlu1 %5144 }
0x1b25   : > { %v5147_v63 = vunpack.i.h.bf16 %v5145_v53  ;;  %v5146_v35 = vunpack.i.l.bf16 %v5145_v53 }
0x1b27   : > { %v3890_v21 = vsel %vm686_vm6, %v3885_v25, %v5146_v35  ;;  %v3891_v40 = vsel %vm686_vm6, %v5146_v35, %v5147_v63 }
0x1b28   : > { %v3979_v22 = vpack.c.bf16 %v3890_v21, %v3803_v27  ;;  %v3980_v36 = vpack.c.bf16 %v3891_v40, %v3804_v11 }
0x1b2a   : > { %4013 = vmatprep.subr.bf16.mxu0 %v3980_v36  ;;  %v5150_v55 = vpop.permute.xlu1 %5149 }
0x1b2b   : > { %v5152_v46 = vunpack.i.h.bf16 %v5150_v55  ;;  %v5151_v31 = vunpack.i.l.bf16 %v5150_v55  ;;  %v5207_v55 = vld [vmem:[%s6938_s11] sm:$0xff]  }
0x1b2d   : > { %v3904_v29 = vsel %vm700_vm8, %v5151_v31, %v5152_v46  ;;  %v3764_v46 = vld [vmem:[%s6940_s13 + $0xc0] sm:$0xff] }
0x1b2e   : > { %v5155_v34 = vpop.permute.xlu0 %5154  ;;  %v3898_v24 = vpop.permute.xlu1 %3897 }
0x1b2f   : > { %v5157_v8 = vunpack.i.h.bf16 %v5155_v34  ;;  %v5156_v42 = vunpack.i.l.bf16 %v5155_v34  ;;  %v3760_v34 = vld [vmem:[%s6940_s13 + $0xa0] sm:$0xff] }
0x1b31   : > { %v3917_v52 = vsel %vm714_vm7, %v5156_v42, %v5157_v8  ;;  %v3746_v8 = vld [vmem:[%s6940_s13 + $0x30] sm:$0xff] }
0x1b32   : > { %v3911_v4 = vpop.permute.xlu0 %3910  ;;  %v5160_v57 = vpop.permute.xlu1 %5159  ;;  %v3982_v0 = vpack.c.bf16 %v3917_v52, %v3904_v29  ;;  %v3766_v52 = vld [vmem:[%s6940_s13 + $0xd0] sm:$0xff]  ;;  %v3768_v29 = vld [vmem:[%s6940_s13 + $0xe0] sm:$0xff] }
0x1b33   : > { %v5162_v12 = vunpack.i.h.bf16 %v5160_v57  ;;  %v5161_v61 = vunpack.i.l.bf16 %v5160_v57  ;;  %v3916_v47 = vsel %vm714_vm7, %v3911_v4, %v5156_v42  ;;  %v3744_v57 = vld [vmem:[%s6940_s13 + $0x20] sm:$0xff]  ;;  %v3747_v42 = vld [vmem:[%s6940_s13 + $0x38] sm:$0xff] }
0x1b35   : > { %v3927_v27 = vsel %vm725_vm10, %v5161_v61, %v5162_v12 }
0x1b36   : > { %v5165_v59 = vpop.permute.xlu0 %5164  ;;  %v3921_v1 = vpop.permute.xlu1 %3920 }
0x1b37   : > { %v5167_v26 = vunpack.i.h.bf16 %v5165_v59  ;;  %v5166_v18 = vunpack.i.l.bf16 %v5165_v59  ;;  %v3926_v50 = vsel %vm725_vm10, %v3921_v1, %v5161_v61  ;;  %v3745_v59 = vld [vmem:[%s6940_s13 + $0x28] sm:$0xff]  ;;  %v3762_v1 = vld [vmem:[%s6940_s13 + $0xb0] sm:$0xff] }
0x1b38   : > { %v3750_v61 = vld [vmem:[%s6940_s13 + $0x50] sm:$0xff] }
0x1b39   : > { %v3940_v51 = vsel %vm739_vm9, %v5166_v18, %v5167_v26 }
0x1b3a   : > { %v3934_v2 = vpop.permute.xlu0 %3933  ;;  %v5170_v3 = vpop.permute.xlu1 %5169  ;;  %v3984_v21 = vpack.c.bf16 %v3940_v51, %v3927_v27  ;;  %v3770_v51 = vld [vmem:[%s6940_s13 + $0xf0] sm:$0xff] }
0x1b3b   : > { %v5172_v35 = vunpack.i.h.bf16 %v5170_v3  ;;  %v5171_v25 = vunpack.i.l.bf16 %v5170_v3  ;;  %v3939_v11 = vsel %vm739_vm9, %v3934_v2, %v5166_v18  ;;  %v4425_v2 = vpack.c.bf16 %v3745_v59, %v3744_v57  ;;  %v3763_v3 = vld [vmem:[%s6940_s13 + $0xb8] sm:$0xff]  ;;  %v3748_v18 = vld [vmem:[%s6940_s13 + $0x40] sm:$0xff] }
0x1b3c   : > { %v3983_v28 = vpack.c.bf16 %v3939_v11, %v3926_v50 }
0x1b3d   : > { %v3953_v60 = vsel %vm753_vm12, %v5171_v25, %v5172_v35  ;;  %v3755_v35 = vld [vmem:[%s6940_s13 + $0x78] sm:$0xff] }
0x1b3e   : > { %v5175_v6 = vpop.permute.xlu0 %5174  ;;  %v3947_v43 = vpop.permute.xlu1 %3946 }
0x1b3f   : > { %v5177_v44 = vunpack.i.h.bf16 %v5175_v6  ;;  %v5176_v20 = vunpack.i.l.bf16 %v5175_v6  ;;  %v3952_v23 = vsel %vm753_vm12, %v3947_v43, %v5171_v25  ;;  %v4427_v6 = vpack.c.bf16 %v3763_v3, %v3762_v1 }
0x1b40   : > { %v4429_v43 = vpack.c.bf16 %v3747_v42, %v3746_v8 }
0x1b42   : > { %v3957_v62 = vpop.permute.xlu0 %3956  ;;  %v5180_v53 = vpop.permute.xlu1 %5179 }
0x1b43   : > { %v5182_v40 = vunpack.i.h.bf16 %v5180_v53  ;;  %v5181_v36 = vunpack.i.l.bf16 %v5180_v53  ;;  %v3962_v17 = vsel %vm764_vm11, %v3957_v62, %v5176_v20 }
0x1b44   : > { %v3985_v33 = vpack.c.bf16 %v3962_v17, %v3952_v23 }
0x1b45   : > { %v3975_v15 = vsel %vm778_vm13, %v5181_v36, %v5182_v40 }
0x1b46   : > { %v3987_v19 = vpack.c.bf16 %v3975_v15, %v3975_v15 }
0x1b48   : > { %v4008_v54 = vsel %vm802_vm14, %v3987_v19, 0 }
0x1bec   : > { %v3632_v9 = vpop.f32.mrb[32].mxu1 }
0x1bed   : > { %v3633_v14 = vadd.f32 %v3632_v9, %v3593_v10  ;;  %v4397_v39 = vpop.f32.mrb[33].mxu1  ;;  %v3903_v10 = vsel %vm700_vm8, %v3898_v24, %v5151_v31  ;;  %v3761_v24 = vld [vmem:[%s6940_s13 + $0xa8] sm:$0xff] }
0x1bee   : > { %v3635_v5 = vpop.f32.mrb[34].mxu1  ;;  %v3981_v63 = vpack.c.bf16 %v3916_v47, %v3903_v10  ;;  %v4423_v4 = vpack.c.bf16 %v3761_v24, %v3760_v34  ;;  %v3765_v31 = vld [vmem:[%s6940_s13 + $0xc8] sm:$0xff]  ;;  %v3771_v10 = vld [vmem:[%s6940_s13 + $0xf8] sm:$0xff] }
0x1bef   : > { %4343 = vmatmul.mubr.msk.f32.vlgmr.msra.gmra.mrb[32].mxu0 %vm3654_vm1, %v3633_v14  ;;  %v4398_v32 = vpop.f32.mrb[35].mxu1  ;;  %v4431_v26 = vpack.c.bf16 %v3765_v31, %v3764_v46  ;;  %v3749_v9 = vld [vmem:[%s6940_s13 + $0x48] sm:$0xff]  ;;  %v3767_v14 = vld [vmem:[%s6940_s13 + $0xd8] sm:$0xff]  ;;  %v4443_v53 = vpack.c.bf16 %v3771_v10, %v3770_v51 }
0x1bf0   : > { %4014 = vmatpush1.bf16.msra.mxu0 %v3979_v22  ;;  %4045 = vmatprep.mubr.bf16.mxu0 %v5297_v56  ;;  %v3963_v22 = vsel %vm764_vm11, %v5176_v20, %v5177_v44  ;;  %v3974_v56 = vpop.permute.xlu0 %3973  ;;  %v4433_v39 = vpack.c.bf16 %v3749_v9, %v3748_v18  ;;  %v4435_v12 = vpack.c.bf16 %v3767_v14, %v3766_v52  ;;  %v3751_v5 = vld [vmem:[%s6940_s13 + $0x58] sm:$0xff]  ;;  %v3769_v47 = vld [vmem:[%s6940_s13 + $0xe8] sm:$0xff]  ;;  %v3752_v32 = vld [vmem:[%s6940_s13 + $0x60] sm:$0xff] }
0x1bf1   : > { %4015 = vmatprep.subr.bf16.mxu0 %v3982_v0  ;;  %v3986_v38 = vpack.c.bf16 %v3963_v22, %v3953_v60  ;;  %v3976_v7 = vsel %vm778_vm13, %v5182_v40, %v3974_v56  ;;  %4424 = vmatprep.subr.bf16.mxu1 %v4423_v4  ;;  %v4437_v62 = vpack.c.bf16 %v3751_v5, %v3750_v61  ;;  %v3753_v44 = vld [vmem:[%s6940_s13 + $0x68] sm:$0xff]  ;;  %v3992_v56 = vpop.permute.xlu1 %3991 }
0x1bf2   : > { %v3988_v37 = vpack.c.bf16 %v3976_v7, %v3976_v7  ;;  %4426 = vmatpush3.bf16.msra.mxu1 %v4425_v2  ;;  %v4439_v0 = vpack.c.bf16 %v3769_v47, %v3768_v29  ;;  %v4441_v20 = vpack.c.bf16 %v3753_v44, %v3752_v32 }
0x1bf3   : > { %4428 = vmatprep.subr.bf16.mxu1 %v4427_v6 }
0x1bf4   : > { %4016 = vmatpush1.bf16.msra.mxu0 %v3981_v63  ;;  %v3754_v63 = vld [vmem:[%s6940_s13 + $0x70] sm:$0xff]  ;;  %v3997_v45 = vpop.permute.xlu0 %3996 }
0x1bf5   : > { %4017 = vmatprep.subr.bf16.mxu0 %v3984_v21  ;;  %v4445_v25 = vpack.c.bf16 %v3755_v35, %v3754_v63 }
0x1bf6   : > { %4430 = vmatpush3.bf16.msra.mxu1 %v4429_v43 }
0x1bf7   : > { %4432 = vmatprep.subr.bf16.mxu1 %v4431_v26 }
0x1bf8   : > { %4018 = vmatpush1.bf16.msra.mxu0 %v3983_v28 }
0x1bf9   : > { %4019 = vmatprep.subr.bf16.mxu0 %v3986_v38 }
0x1bfa   : > { %4434 = vmatpush3.bf16.msra.mxu1 %v4433_v39 }
0x1bfb   : > { %4436 = vmatprep.subr.bf16.mxu1 %v4435_v12 }
0x1bfc   : > { %4020 = vmatpush1.bf16.msra.mxu0 %v3985_v33 }
0x1bfd   : > { %4345 = vmatprep.subr.msk.bf16.mxu0 %vm802_vm14, %v3988_v37 }
0x1bfe   : > { %4438 = vmatpush3.bf16.msra.mxu1 %v4437_v62 }
0x1bff   : > { %4440 = vmatprep.subr.bf16.mxu1 %v4439_v0 }
0x1c00   : > { %4022 = vmatpush1.bf16.msra.mxu0 %v4008_v54 }
0x1c02   : > { %4442 = vmatpush3.bf16.msra.mxu1 %v4441_v20 }
0x1c03   : > { %4346 = vmatmul.mubr.msk.bf16.vlgmr.msra.gmra.mrb[36].mxu0 %vm798_vm15, %v5207_v55  ;;  %4444 = vmatprep.subr.bf16.mxu1 %v4443_v53 }
0x1c06   : > { %4446 = vmatpush3.bf16.msra.mxu1 %v4445_v25 }
0x1cc2   : > { %v3724_v27 = vpop.f32.mrb[32].mxu0 }
0x1cc3   : > { %v3729_v11 = vadd.f32 %v3724_v27, %v2237_v58  ;;  %v3726_v21 = vpop.f32.mrb[33].mxu0 }
0x1cc4   : > { %v3730_v40 = vadd.f32 %v3726_v21, %v2238_v30 }
0x1cc5   : > { %v3731_v36 = vmax.f32 %v3729_v11, 0.0 }
0x1cc6   : > { %v3732_v22 = vmax.f32 %v3730_v40, 0.0 }
0x1cc7   : > { %3733 = vst [vmem:[%s550_s21] sm:$0xff] %v3731_v36 }
0x1cc8   : > { %3734 = vst [vmem:[%s550_s21 + $0x8] sm:$0xff] %v3732_v22 }
0x1cd6   : > { %v4047_v50 = vpop.f32.mrb[36].mxu0 }
0x1cd7   : > { %v4049_v28 = vpop.f32.mrb[37].mxu0  ;;  %v4048_v58 = vadd.f32 %v4047_v50, %v3992_v56 }
0x1cd8   : > { %v4050_v60 = vadd.f32 %v4049_v28, %v3992_v56  ;;  %v4051_v17 = vpop.f32.mrb[38].mxu0 }
0x1cd9   : > { %v4053_v38 = vpop.f32.mrb[39].mxu0  ;;  %v4052_v15 = vadd.f32 %v4051_v17, %v3997_v45 }
0x1cda   : > { %v4054_v7 = vadd.f32 %v4053_v38, %v3997_v45  ;;  %4120 = vmatprep.mubr.f32.mxu1 %v4050_v60 }
0x1cdb   : > { %4121 = vmatmul.mubr.f32.vlgmr.msra.gmra.mrb[36].mxu1 %v4048_v58 }
0x1cdc   : > { %4125 = vmatprep.mubr.f32.mxu1 %v4054_v7 }
0x1cdf   : > { %4126 = vmatmul.mubr.f32.gmra.mrb[38].mxu1 %v4052_v15 }
0x1dae   : > { %v4387_v49 = vpop.f32.mrb[36].mxu1 }
0x1daf   : > { %v4388_v30 = vpop.f32.mrb[37].mxu1 }
0x1db0   : > { %v4389_v23 = vadd.f32 %v4388_v30, %v4387_v49 }
0x1db2   : > { %v4123_v33 = vadd.f32 %v4389_v23, %v3585_v48  ;;  %v4390_v37 = vpop.f32.mrb[38].mxu1 }
0x1db3   : > { %v4391_v19 = vpop.f32.mrb[39].mxu1 }
0x1db4   : > { %v4131_v54 = vmax.f32 %v4123_v33, 0.0  ;;  %v4392_v55 = vadd.f32 %v4391_v19, %v4390_v37 }
0x1db6   : > { %4133 = vst.msk [vmem:[%s555_s28] sm:$0xff] %vm3654_vm1, %v4131_v54  ;;  %v4128_v34 = vadd.f32 %v4392_v55, %v3586_v16 }
0x1db8   : > { %v4132_v24 = vmax.f32 %v4128_v34, 0.0 }
0x1dba   : > { %4134 = vst.msk [vmem:[%s555_s28 + $0x8] sm:$0xff] %vm3654_vm1, %v4132_v24 }
0x1dbb PF: > { %s7002_s29 = sld [smem:[#allocation8_spill]] }
0x1dc1   : > { %s28_s18 = sadd.s32 1, %s7002_s29  }
0x1dc2   : > { %p25_p5 = scmp.ge.s32.totalorder %s28_s18, 4  }
0x1dc4   :  { %27 = sbr.rel (!%p25_p5) target bundleno = 4 (0x4), region = 158 }
0x1dcb   :  { %4172 = vsyncpa [#allocation3], 1 }
0x1dcc   :  { %4174 = vsyncpa [#allocation3 + $0x1], 1 }
0x1dcd   :  { %4175 = vsyncpa [#allocation5], 1 }

</bundles_post_ra>
